<compile_context>
chip_gen: v7x
topology: tpu7x:2x2x1
jax: 0.10.0
libtpu: 0.0.40
codegen_flags: <defaults>
</compile_context>

<pallas_src>
import math
import functools

import jax
import jax.numpy as jnp
from jax.experimental import pallas as pl
from jax.experimental.pallas import tpu as pltpu

PAD = 0  # onmt.Constants.PAD

# ---- "opt" hyper-parameters (small, consistent with the module) ----
MODEL_SIZE = 32
N_HEADS = 4
INNER_SIZE = 64
LAYERS = 2
VOCAB = 50


# ----------------------------- Pallas kernels -----------------------------

def _decoder_layer_kernel(H, final_ln,
                          x_ref, ctx_ref, mt_ref, ms_ref,
                          g_attn_ref, b_attn_ref, w_qkv_ref, wo_self_ref,
                          g_src_ref, b_src_ref, wq_src_ref, w_kv_src_ref, wo_src_ref,
                          g_ffn_ref, b_ffn_ref, w1_ref, b1_ref, w2_ref, b2_ref,
                          g_post_ref, b_post_ref,
                          o_ref, cov_ref):
    f32 = jnp.float32
    bf16 = jnp.bfloat16

    x = x_ref[0]           # (Lt, D) f32
    ctx = ctx_ref[0]       # (Ls, D) f32
    mt = mt_ref[0]         # (Lt, Lt) additive mask
    ms = ms_ref[0]         # (Lt, Ls) additive mask
    D = x.shape[-1]
    Dh = D // H

    def ln(v, g_ref, b_ref):
        mean = jnp.mean(v, axis=-1, keepdims=True)
        var = jnp.mean(jnp.square(v - mean), axis=-1, keepdims=True)  # biased, like nn.LayerNorm
        return (v - mean) * jax.lax.rsqrt(var + 1e-5) * g_ref[...] + b_ref[...]

    def softmax(s):
        s = s - jnp.max(s, axis=-1, keepdims=True)
        e = jnp.exp(s)
        return e * pl.reciprocal(jnp.sum(e, axis=-1, keepdims=True), approx=True)

    def heads_attention(q, k, v, amask, want_cov):
        # q: (Lq, D), k/v: (Lk, D); scale is already folded into the Q projection.
        outs = []
        cov = None
        for h in range(H):
            qh = q[:, h * Dh:(h + 1) * Dh].astype(bf16)
            kh = k[:, h * Dh:(h + 1) * Dh].astype(bf16)
            vh = v[:, h * Dh:(h + 1) * Dh].astype(bf16)
            s = jax.lax.dot_general(qh, kh, (((1,), (1,)), ((), ())),
                                    preferred_element_type=f32)       # (Lq, Lk)
            p = softmax(s + amask)
            outs.append(jnp.dot(p.astype(bf16), vh, preferred_element_type=f32))
            if want_cov:
                cov = p if cov is None else cov + p
        return jnp.concatenate(outs, axis=-1), cov

    # --- masked self attention (pre-LN, residual; dropout = identity at inference) ---
    xn = ln(x, g_attn_ref, b_attn_ref).astype(bf16)
    qkv = jnp.dot(xn, w_qkv_ref[...], preferred_element_type=f32)      # (Lt, 3D)
    attn, _ = heads_attention(qkv[:, :D], qkv[:, D:2 * D], qkv[:, 2 * D:], mt, False)
    x = x + jnp.dot(attn.astype(bf16), wo_self_ref[...], preferred_element_type=f32)

    # --- encoder-decoder attention (coverage = head-averaged probs, reduced in-kernel) ---
    xn = ln(x, g_src_ref, b_src_ref).astype(bf16)
    q = jnp.dot(xn, wq_src_ref[...], preferred_element_type=f32)       # (Lt, D)
    kv = jnp.dot(ctx.astype(bf16), w_kv_src_ref[...], preferred_element_type=f32)  # (Ls, 2D)
    attn, cov = heads_attention(q, kv[:, :D], kv[:, D:], ms, True)
    x = x + jnp.dot(attn.astype(bf16), wo_src_ref[...], preferred_element_type=f32)
    cov_ref[0] = cov * (1.0 / H)

    # --- position-wise feed forward (relu), residual fused into the epilogue ---
    xn = ln(x, g_ffn_ref, b_ffn_ref).astype(bf16)
    h1 = jnp.maximum(jnp.dot(xn, w1_ref[...], preferred_element_type=f32) + b1_ref[...], 0.0)
    h2 = jnp.dot(h1.astype(bf16), w2_ref[...], preferred_element_type=f32) + b2_ref[...]
    out = x + h2

    # --- postprocess_layer ('n' = LayerNorm) fused into the LAST layer's kernel ---
    if final_ln:
        out = ln(out, g_post_ref, b_post_ref)
    o_ref[0] = out


def decoder_layer_pallas(x, ctx, amask_tgt, amask_src, lp, post_g, post_b,
                         n_heads, final_ln):
    """x: (B, Lt, D) f32, ctx: (B, Ls, D) f32, masks: (B, Lt, Lt)/(B, Lt, Ls) additive f32."""
    B, Lt, D = x.shape
    Ls = ctx.shape[1]
    kernel = functools.partial(_decoder_layer_kernel, n_heads, final_ln)

    def full2d(a):
        return pl.BlockSpec(a.shape, lambda b: (0, 0))

    x_out, cov = pl.pallas_call(
        kernel,
        out_shape=(jax.ShapeDtypeStruct((B, Lt, D), jnp.float32),
                   jax.ShapeDtypeStruct((B, Lt, Ls), jnp.float32)),
        grid=(B,),
        in_specs=[
            pl.BlockSpec((1, Lt, D), lambda b: (b, 0, 0)),
            pl.BlockSpec((1, Ls, D), lambda b: (b, 0, 0)),
            pl.BlockSpec((1, Lt, Lt), lambda b: (b, 0, 0)),
            pl.BlockSpec((1, Lt, Ls), lambda b: (b, 0, 0)),
            full2d(lp['ln_attn_g']), full2d(lp['ln_attn_b']),
            full2d(lp['w_self_qkv']), full2d(lp['wo_self']),
            full2d(lp['ln_src_g']), full2d(lp['ln_src_b']),
            full2d(lp['wq_src']), full2d(lp['w_src_kv']), full2d(lp['wo_src']),
            full2d(lp['ln_ffn_g']), full2d(lp['ln_ffn_b']),
            full2d(lp['w1']), full2d(lp['b1']),
            full2d(lp['w2']), full2d(lp['b2']),
            full2d(post_g), full2d(post_b),
        ],
        out_specs=(
            pl.BlockSpec((1, Lt, D), lambda b: (b, 0, 0)),
            pl.BlockSpec((1, Lt, Ls), lambda b: (b, 0, 0)),
        ),
        compiler_params=pltpu.CompilerParams(
            dimension_semantics=("parallel",),
            vmem_limit_bytes=32 * 1024 * 1024,
        ),
    )(x, ctx, amask_tgt, amask_src,
      lp['ln_attn_g'], lp['ln_attn_b'], lp['w_self_qkv'], lp['wo_self'],
      lp['ln_src_g'], lp['ln_src_b'], lp['wq_src'], lp['w_src_kv'], lp['wo_src'],
      lp['ln_ffn_g'], lp['ln_ffn_b'], lp['w1'], lp['b1'], lp['w2'], lp['b2'],
      post_g, post_b)
    return x_out, cov


# ----------------------------- model glue (plain JAX) -----------------------------

def sinusoidal_pe(length, d_model):
    pos = jnp.arange(length, dtype=jnp.float32)[:, None]
    div = jnp.exp(jnp.arange(0, d_model, 2, dtype=jnp.float32)
                  * -(math.log(10000.0) / d_model))
    pe = jnp.zeros((length, d_model), jnp.float32)
    pe = pe.at[:, 0::2].set(jnp.sin(pos * div))
    pe = pe.at[:, 1::2].set(jnp.cos(pos * div))
    return pe


def transformer_decoder_forward(params, input_tokens, context, src_tokens):
    """input_tokens: (B, len_tgt) int32; context: (len_src, B, D); src_tokens: (B, len_src).

    Returns dict: hidden (len_tgt, B, D) [time-first, like the PyTorch code],
                  coverage (B, len_tgt, len_src) from the last layer's enc-dec attention."""
    B, Lt = input_tokens.shape
    Ls, _, D = context.shape

    # --- process_embedding: lookup * sqrt(d_model) + positional encoding ---
    emb = params['word_lut'][input_tokens] * math.sqrt(D)        # (B, Lt, D)
    emb = emb + sinusoidal_pe(Lt, D)[None, :, :]

    # --- masks (additive, -1e9 where masked) ---
    causal = jnp.triu(jnp.ones((Lt, Lt), dtype=bool), k=1)
    mask_tgt = (input_tokens == PAD)[:, None, :] | causal[None, :, :]   # (B, Lt, Lt)
    mask_src = jnp.broadcast_to((src_tokens == PAD)[:, None, :], (B, Lt, Ls))
    amask_tgt = jnp.where(mask_tgt, -1e9, 0.0).astype(jnp.float32)
    amask_src = jnp.where(mask_src, -1e9, 0.0).astype(jnp.float32)

    # --- batch-first activations inside the kernels; preprocess ('d') = identity in eval ---
    x = emb.astype(jnp.float32)                                   # (B, Lt, D)
    ctx = jnp.transpose(context, (1, 0, 2)).astype(jnp.float32)   # (B, Ls, D)

    coverage = None
    n_layers = len(params['layers'])
    for i, lp in enumerate(params['layers']):
        # postprocess_layer ('n') is fused into the last layer's kernel epilogue.
        x, coverage = decoder_layer_pallas(
            x, ctx, amask_tgt, amask_src, lp,
            params['post_ln_g'], params['post_ln_b'],
            N_HEADS, final_ln=(i == n_layers - 1))

    out = x.transpose(1, 0, 2)                                    # time-first (Lt, B, D)
    return {'hidden': out, 'coverage': coverage}


# ----------------------------- deterministic parameter init -----------------------------

def _pack_layer_params(raw, n_heads):
    """Fuse QKV / KV weights, fold 1/sqrt(d_head) into Q, cast matmul weights to bf16."""
    D = raw['wq_self'].shape[0]
    Dh = D // n_heads
    scale = 1.0 / math.sqrt(Dh)
    bf16 = jnp.bfloat16
    f32 = jnp.float32
    return {
        'ln_attn_g': raw['ln_attn_g'].reshape(1, D).astype(f32),
        'ln_attn_b': raw['ln_attn_b'].reshape(1, D).astype(f32),
        'w_self_qkv': jnp.concatenate(
            [raw['wq_self'] * scale, raw['wk_self'], raw['wv_self']], axis=1).astype(bf16),
        'wo_self': raw['wo_self'].astype(bf16),
        'ln_src_g': raw['ln_src_g'].reshape(1, D).astype(f32),
        'ln_src_b': raw['ln_src_b'].reshape(1, D).astype(f32),
        'wq_src': (raw['wq_src'] * scale).astype(bf16),
        'w_src_kv': jnp.concatenate([raw['wk_src'], raw['wv_src']], axis=1).astype(bf16),
        'wo_src': raw['wo_src'].astype(bf16),
        'ln_ffn_g': raw['ln_ffn_g'].reshape(1, D).astype(f32),
        'ln_ffn_b': raw['ln_ffn_b'].reshape(1, D).astype(f32),
        'w1': raw['w1'].astype(bf16),
        'b1': raw['b1'].reshape(1, -1).astype(f32),
        'w2': raw['w2'].astype(bf16),
        'b2': raw['b2'].reshape(1, -1).astype(f32),
    }


def init_params(key):
    def nrm(k, shape, scale=0.1):
        return (scale * jax.random.normal(k, shape)).astype(jnp.float32)

    keys = iter(jax.random.split(key, 4 + LAYERS * 10))
    D, F = MODEL_SIZE, INNER_SIZE

    word_lut = nrm(next(keys), (VOCAB, D), 1.0)
    word_lut = word_lut.at[PAD].set(0.0)            # padding_idx=PAD -> zero row

    params = {
        'word_lut': word_lut,
        'post_ln_g': jnp.ones((1, D), jnp.float32),
        'post_ln_b': jnp.zeros((1, D), jnp.float32),
        'layers': [],
    }
    for _ in range(LAYERS):
        raw = {
            'ln_attn_g': jnp.ones((D,), jnp.float32), 'ln_attn_b': jnp.zeros((D,), jnp.float32),
            'wq_self': nrm(next(keys), (D, D)), 'wk_self': nrm(next(keys), (D, D)),
            'wv_self': nrm(next(keys), (D, D)), 'wo_self': nrm(next(keys), (D, D)),
            'ln_src_g': jnp.ones((D,), jnp.float32), 'ln_src_b': jnp.zeros((D,), jnp.float32),
            'wq_src': nrm(next(keys), (D, D)), 'wk_src': nrm(next(keys), (D, D)),
            'wv_src': nrm(next(keys), (D, D)), 'wo_src': nrm(next(keys), (D, D)),
            'ln_ffn_g': jnp.ones((D,), jnp.float32), 'ln_ffn_b': jnp.zeros((D,), jnp.float32),
            'w1': nrm(next(keys), (D, F)), 'b1': jnp.zeros((F,), jnp.float32),
            'w2': nrm(next(keys), (F, D)), 'b2': jnp.zeros((D,), jnp.float32),
        }
        params['layers'].append(_pack_layer_params(raw, N_HEADS))
    return params


# ----------------------------- main -----------------------------

if __name__ == "__main__":
    key = jax.random.PRNGKey(0)
    kp, kt, ks, kc = jax.random.split(key, 4)

    params = init_params(kp)

    B, Lt, Ls = 2, 8, 8
    input_tokens = jax.random.randint(kt, (B, Lt), 1, VOCAB).astype(jnp.int32)
    input_tokens = input_tokens.at[1, -2:].set(PAD)    # some target padding
    src_tokens = jax.random.randint(ks, (B, Ls), 1, VOCAB).astype(jnp.int32)
    src_tokens = src_tokens.at[0, -1].set(PAD)         # some source padding
    context = (0.1 * jax.random.normal(kc, (Ls, B, MODEL_SIZE))).astype(jnp.float32)

    forward = jax.jit(transformer_decoder_forward)
    out = forward(params, input_tokens, context, src_tokens)
    hidden = jax.block_until_ready(out['hidden'])
    coverage = jax.block_until_ready(out['coverage'])

    assert hidden.shape == (Lt, B, MODEL_SIZE)
    assert coverage.shape == (B, Lt, Ls)
    assert bool(jnp.all(jnp.isfinite(hidden)))
    assert bool(jnp.all(jnp.isfinite(coverage)))
    # coverage rows are (approximately) normalized probability distributions
    assert bool(jnp.all(jnp.abs(coverage.sum(-1) - 1.0) < 1e-2))
    print("KERNEL_OK")
</pallas_src>

<mosaic_0001>
module attributes {stable_mosaic.version = 11 : i64} {
  func.func @_decoder_layer_kernel(%arg0: i32, %arg1: memref<1x8x32xf32, #tpu.memory_space<vmem>>, %arg2: memref<1x8x32xf32, #tpu.memory_space<vmem>>, %arg3: memref<1x8x8xf32, #tpu.memory_space<vmem>>, %arg4: memref<1x8x8xf32, #tpu.memory_space<vmem>>, %arg5: memref<1x32xf32, #tpu.memory_space<vmem>>, %arg6: memref<1x32xf32, #tpu.memory_space<vmem>>, %arg7: memref<32x96xbf16, #tpu.memory_space<vmem>>, %arg8: memref<32x32xbf16, #tpu.memory_space<vmem>>, %arg9: memref<1x32xf32, #tpu.memory_space<vmem>>, %arg10: memref<1x32xf32, #tpu.memory_space<vmem>>, %arg11: memref<32x32xbf16, #tpu.memory_space<vmem>>, %arg12: memref<32x64xbf16, #tpu.memory_space<vmem>>, %arg13: memref<32x32xbf16, #tpu.memory_space<vmem>>, %arg14: memref<1x32xf32, #tpu.memory_space<vmem>>, %arg15: memref<1x32xf32, #tpu.memory_space<vmem>>, %arg16: memref<32x64xbf16, #tpu.memory_space<vmem>>, %arg17: memref<1x64xf32, #tpu.memory_space<vmem>>, %arg18: memref<64x32xbf16, #tpu.memory_space<vmem>>, %arg19: memref<1x32xf32, #tpu.memory_space<vmem>>, %arg20: memref<1x32xf32, #tpu.memory_space<vmem>>, %arg21: memref<1x32xf32, #tpu.memory_space<vmem>>, %arg22: memref<1x8x32xf32, #tpu.memory_space<vmem>>, %arg23: memref<1x8x8xf32, #tpu.memory_space<vmem>>) attributes {dimension_semantics = [#tpu.dimension_semantics<parallel>], iteration_bounds = array<i64: 2>, scalar_prefetch = 0 : i64, scratch_operands = 0 : i64, tpu.core_type = #tpu.core_type<tc>, window_params = [{transform_indices = @transform_0, window_bounds = array<i64: 1, 8, 32>}, {transform_indices = @transform_1, window_bounds = array<i64: 1, 8, 32>}, {transform_indices = @transform_2, window_bounds = array<i64: 1, 8, 8>}, {transform_indices = @transform_3, window_bounds = array<i64: 1, 8, 8>}, {pipeline_mode = #tpu.pipeline_mode<synchronous>, transform_indices = @transform_4, window_bounds = array<i64: 1, 32>}, {pipeline_mode = #tpu.pipeline_mode<synchronous>, transform_indices = @transform_5, window_bounds = array<i64: 1, 32>}, {pipeline_mode = #tpu.pipeline_mode<synchronous>, transform_indices = @transform_6, window_bounds = array<i64: 32, 96>}, {pipeline_mode = #tpu.pipeline_mode<synchronous>, transform_indices = @transform_7, window_bounds = array<i64: 32, 32>}, {pipeline_mode = #tpu.pipeline_mode<synchronous>, transform_indices = @transform_8, window_bounds = array<i64: 1, 32>}, {pipeline_mode = #tpu.pipeline_mode<synchronous>, transform_indices = @transform_9, window_bounds = array<i64: 1, 32>}, {pipeline_mode = #tpu.pipeline_mode<synchronous>, transform_indices = @transform_10, window_bounds = array<i64: 32, 32>}, {pipeline_mode = #tpu.pipeline_mode<synchronous>, transform_indices = @transform_11, window_bounds = array<i64: 32, 64>}, {pipeline_mode = #tpu.pipeline_mode<synchronous>, transform_indices = @transform_12, window_bounds = array<i64: 32, 32>}, {pipeline_mode = #tpu.pipeline_mode<synchronous>, transform_indices = @transform_13, window_bounds = array<i64: 1, 32>}, {pipeline_mode = #tpu.pipeline_mode<synchronous>, transform_indices = @transform_14, window_bounds = array<i64: 1, 32>}, {pipeline_mode = #tpu.pipeline_mode<synchronous>, transform_indices = @transform_15, window_bounds = array<i64: 32, 64>}, {pipeline_mode = #tpu.pipeline_mode<synchronous>, transform_indices = @transform_16, window_bounds = array<i64: 1, 64>}, {pipeline_mode = #tpu.pipeline_mode<synchronous>, transform_indices = @transform_17, window_bounds = array<i64: 64, 32>}, {pipeline_mode = #tpu.pipeline_mode<synchronous>, transform_indices = @transform_18, window_bounds = array<i64: 1, 32>}, {pipeline_mode = #tpu.pipeline_mode<synchronous>, transform_indices = @transform_19, window_bounds = array<i64: 1, 32>}, {pipeline_mode = #tpu.pipeline_mode<synchronous>, transform_indices = @transform_20, window_bounds = array<i64: 1, 32>}, {transform_indices = @transform_21, window_bounds = array<i64: 1, 8, 32>}, {transform_indices = @transform_22, window_bounds = array<i64: 1, 8, 8>}]} {
    %c0 = arith.constant 0 : index
    %c0_0 = arith.constant 0 : index
    %c0_1 = arith.constant 0 : index
    %0 = vector.load %arg1[%c0, %c0_0, %c0_1] : memref<1x8x32xf32, #tpu.memory_space<vmem>>, vector<1x8x32xf32>
    %1 = vector.shape_cast %0 : vector<1x8x32xf32> to vector<8x32xf32>
    %c0_2 = arith.constant 0 : index
    %c0_3 = arith.constant 0 : index
    %c0_4 = arith.constant 0 : index
    %2 = vector.load %arg2[%c0_2, %c0_3, %c0_4] : memref<1x8x32xf32, #tpu.memory_space<vmem>>, vector<1x8x32xf32>
    %3 = vector.shape_cast %2 : vector<1x8x32xf32> to vector<8x32xf32>
    %c0_5 = arith.constant 0 : index
    %c0_6 = arith.constant 0 : index
    %c0_7 = arith.constant 0 : index
    %4 = vector.load %arg3[%c0_5, %c0_6, %c0_7] : memref<1x8x8xf32, #tpu.memory_space<vmem>>, vector<1x8x8xf32>
    %5 = vector.shape_cast %4 : vector<1x8x8xf32> to vector<8x8xf32>
    %c0_8 = arith.constant 0 : index
    %c0_9 = arith.constant 0 : index
    %c0_10 = arith.constant 0 : index
    %6 = vector.load %arg4[%c0_8, %c0_9, %c0_10] : memref<1x8x8xf32, #tpu.memory_space<vmem>>, vector<1x8x8xf32>
    %7 = vector.shape_cast %6 : vector<1x8x8xf32> to vector<8x8xf32>
    %cst = arith.constant dense<0.000000e+00> : vector<8xf32>
    %8 = vector.multi_reduction <add>, %1, %cst [1] : vector<8x32xf32> to vector<8xf32>
    %9 = vector.shape_cast %8 : vector<8xf32> to vector<8x1xf32>
    %cst_11 = arith.constant 3.200000e+01 : f32
    %10 = vector.broadcast %cst_11 : f32 to vector<8x1xf32>
    %11 = arith.divf %9, %10 : vector<8x1xf32>
    %12 = vector.broadcast %11 : vector<8x1xf32> to vector<8x32xf32>
    %13 = arith.subf %1, %12 : vector<8x32xf32>
    %14 = arith.mulf %13, %13 : vector<8x32xf32>
    %cst_12 = arith.constant dense<0.000000e+00> : vector<8xf32>
    %15 = vector.multi_reduction <add>, %14, %cst_12 [1] : vector<8x32xf32> to vector<8xf32>
    %16 = vector.shape_cast %15 : vector<8xf32> to vector<8x1xf32>
    %cst_13 = arith.constant 3.200000e+01 : f32
    %17 = vector.broadcast %cst_13 : f32 to vector<8x1xf32>
    %18 = arith.divf %16, %17 : vector<8x1xf32>
    %19 = vector.broadcast %11 : vector<8x1xf32> to vector<8x32xf32>
    %20 = arith.subf %1, %19 : vector<8x32xf32>
    %cst_14 = arith.constant 9.99999974E-6 : f32
    %21 = vector.broadcast %cst_14 : f32 to vector<8x1xf32>
    %22 = arith.addf %18, %21 : vector<8x1xf32>
    %23 = math.rsqrt %22 : vector<8x1xf32>
    %24 = vector.broadcast %23 : vector<8x1xf32> to vector<8x32xf32>
    %25 = arith.mulf %20, %24 : vector<8x32xf32>
    %c0_15 = arith.constant 0 : index
    %c0_16 = arith.constant 0 : index
    %26 = vector.load %arg5[%c0_15, %c0_16] : memref<1x32xf32, #tpu.memory_space<vmem>>, vector<1x32xf32>
    %27 = vector.broadcast %26 : vector<1x32xf32> to vector<8x32xf32>
    %28 = arith.mulf %25, %27 : vector<8x32xf32>
    %c0_17 = arith.constant 0 : index
    %c0_18 = arith.constant 0 : index
    %29 = vector.load %arg6[%c0_17, %c0_18] : memref<1x32xf32, #tpu.memory_space<vmem>>, vector<1x32xf32>
    %30 = vector.broadcast %29 : vector<1x32xf32> to vector<8x32xf32>
    %31 = arith.addf %28, %30 : vector<8x32xf32>
    %32 = arith.truncf %31 : vector<8x32xf32> to vector<8x32xbf16>
    %c0_19 = arith.constant 0 : index
    %c0_20 = arith.constant 0 : index
    %33 = vector.load %arg7[%c0_19, %c0_20] : memref<32x96xbf16, #tpu.memory_space<vmem>>, vector<32x96xbf16>
    %cst_21 = arith.constant dense<0.000000e+00> : vector<8x96xf32>
    %34 = tpu.matmul %32, %33, %cst_21 {dimension_numbers = #tpu.dot_dimension_numbers<[1], [0], [0], [1], [0, 0, 1, 1], [], []>} : vector<8x32xbf16>, vector<32x96xbf16>, vector<8x96xf32> -> vector<8x96xf32>
    %35 = vector.extract_strided_slice %34 {offsets = [0, 0], sizes = [8, 32], strides = [1, 1]} : vector<8x96xf32> to vector<8x32xf32>
    %36 = vector.extract_strided_slice %34 {offsets = [0, 32], sizes = [8, 32], strides = [1, 1]} : vector<8x96xf32> to vector<8x32xf32>
    %37 = vector.extract_strided_slice %34 {offsets = [0, 64], sizes = [8, 32], strides = [1, 1]} : vector<8x96xf32> to vector<8x32xf32>
    %38 = vector.extract_strided_slice %35 {offsets = [0, 0], sizes = [8, 8], strides = [1, 1]} : vector<8x32xf32> to vector<8x8xf32>
    %39 = arith.truncf %38 : vector<8x8xf32> to vector<8x8xbf16>
    %40 = vector.extract_strided_slice %36 {offsets = [0, 0], sizes = [8, 8], strides = [1, 1]} : vector<8x32xf32> to vector<8x8xf32>
    %41 = arith.truncf %40 : vector<8x8xf32> to vector<8x8xbf16>
    %42 = vector.extract_strided_slice %37 {offsets = [0, 0], sizes = [8, 8], strides = [1, 1]} : vector<8x32xf32> to vector<8x8xf32>
    %43 = arith.truncf %42 : vector<8x8xf32> to vector<8x8xbf16>
    %cst_22 = arith.constant dense<0.000000e+00> : vector<8x8xf32>
    %44 = tpu.matmul %39, %41, %cst_22 {dimension_numbers = #tpu.dot_dimension_numbers<[1], [1], [0], [0], [0, 0, 1, 0], [], []>} : vector<8x8xbf16>, vector<8x8xbf16>, vector<8x8xf32> -> vector<8x8xf32>
    %45 = arith.addf %44, %5 : vector<8x8xf32>
    %cst_23 = arith.constant dense<0xFF800000> : vector<8xf32>
    %46 = vector.multi_reduction <maximumf>, %45, %cst_23 [1] : vector<8x8xf32> to vector<8xf32>
    %47 = vector.shape_cast %46 : vector<8xf32> to vector<8x1xf32>
    %48 = vector.broadcast %47 : vector<8x1xf32> to vector<8x8xf32>
    %49 = arith.subf %45, %48 : vector<8x8xf32>
    %50 = math.exp %49 : vector<8x8xf32>
    %cst_24 = arith.constant dense<0.000000e+00> : vector<8xf32>
    %51 = vector.multi_reduction <add>, %50, %cst_24 [1] : vector<8x8xf32> to vector<8xf32>
    %52 = vector.shape_cast %51 : vector<8xf32> to vector<8x1xf32>
    %53 = tpu.reciprocal %52 {approx = true} : vector<8x1xf32> -> vector<8x1xf32>
    %54 = vector.broadcast %53 : vector<8x1xf32> to vector<8x8xf32>
    %55 = arith.mulf %50, %54 : vector<8x8xf32>
    %56 = arith.truncf %55 : vector<8x8xf32> to vector<8x8xbf16>
    %cst_25 = arith.constant dense<0.000000e+00> : vector<8x8xf32>
    %57 = tpu.matmul %56, %43, %cst_25 {dimension_numbers = #tpu.dot_dimension_numbers<[1], [0], [0], [1], [0, 0, 1, 1], [], []>} : vector<8x8xbf16>, vector<8x8xbf16>, vector<8x8xf32> -> vector<8x8xf32>
    %58 = vector.extract_strided_slice %35 {offsets = [0, 8], sizes = [8, 8], strides = [1, 1]} : vector<8x32xf32> to vector<8x8xf32>
    %59 = arith.truncf %58 : vector<8x8xf32> to vector<8x8xbf16>
    %60 = vector.extract_strided_slice %36 {offsets = [0, 8], sizes = [8, 8], strides = [1, 1]} : vector<8x32xf32> to vector<8x8xf32>
    %61 = arith.truncf %60 : vector<8x8xf32> to vector<8x8xbf16>
    %62 = vector.extract_strided_slice %37 {offsets = [0, 8], sizes = [8, 8], strides = [1, 1]} : vector<8x32xf32> to vector<8x8xf32>
    %63 = arith.truncf %62 : vector<8x8xf32> to vector<8x8xbf16>
    %cst_26 = arith.constant dense<0.000000e+00> : vector<8x8xf32>
    %64 = tpu.matmul %59, %61, %cst_26 {dimension_numbers = #tpu.dot_dimension_numbers<[1], [1], [0], [0], [0, 0, 1, 0], [], []>} : vector<8x8xbf16>, vector<8x8xbf16>, vector<8x8xf32> -> vector<8x8xf32>
    %65 = arith.addf %64, %5 : vector<8x8xf32>
    %cst_27 = arith.constant dense<0xFF800000> : vector<8xf32>
    %66 = vector.multi_reduction <maximumf>, %65, %cst_27 [1] : vector<8x8xf32> to vector<8xf32>
    %67 = vector.shape_cast %66 : vector<8xf32> to vector<8x1xf32>
    %68 = vector.broadcast %67 : vector<8x1xf32> to vector<8x8xf32>
    %69 = arith.subf %65, %68 : vector<8x8xf32>
    %70 = math.exp %69 : vector<8x8xf32>
    %cst_28 = arith.constant dense<0.000000e+00> : vector<8xf32>
    %71 = vector.multi_reduction <add>, %70, %cst_28 [1] : vector<8x8xf32> to vector<8xf32>
    %72 = vector.shape_cast %71 : vector<8xf32> to vector<8x1xf32>
    %73 = tpu.reciprocal %72 {approx = true} : vector<8x1xf32> -> vector<8x1xf32>
    %74 = vector.broadcast %73 : vector<8x1xf32> to vector<8x8xf32>
    %75 = arith.mulf %70, %74 : vector<8x8xf32>
    %76 = arith.truncf %75 : vector<8x8xf32> to vector<8x8xbf16>
    %cst_29 = arith.constant dense<0.000000e+00> : vector<8x8xf32>
    %77 = tpu.matmul %76, %63, %cst_29 {dimension_numbers = #tpu.dot_dimension_numbers<[1], [0], [0], [1], [0, 0, 1, 1], [], []>} : vector<8x8xbf16>, vector<8x8xbf16>, vector<8x8xf32> -> vector<8x8xf32>
    %78 = vector.extract_strided_slice %35 {offsets = [0, 16], sizes = [8, 8], strides = [1, 1]} : vector<8x32xf32> to vector<8x8xf32>
    %79 = arith.truncf %78 : vector<8x8xf32> to vector<8x8xbf16>
    %80 = vector.extract_strided_slice %36 {offsets = [0, 16], sizes = [8, 8], strides = [1, 1]} : vector<8x32xf32> to vector<8x8xf32>
    %81 = arith.truncf %80 : vector<8x8xf32> to vector<8x8xbf16>
    %82 = vector.extract_strided_slice %37 {offsets = [0, 16], sizes = [8, 8], strides = [1, 1]} : vector<8x32xf32> to vector<8x8xf32>
    %83 = arith.truncf %82 : vector<8x8xf32> to vector<8x8xbf16>
    %cst_30 = arith.constant dense<0.000000e+00> : vector<8x8xf32>
    %84 = tpu.matmul %79, %81, %cst_30 {dimension_numbers = #tpu.dot_dimension_numbers<[1], [1], [0], [0], [0, 0, 1, 0], [], []>} : vector<8x8xbf16>, vector<8x8xbf16>, vector<8x8xf32> -> vector<8x8xf32>
    %85 = arith.addf %84, %5 : vector<8x8xf32>
    %cst_31 = arith.constant dense<0xFF800000> : vector<8xf32>
    %86 = vector.multi_reduction <maximumf>, %85, %cst_31 [1] : vector<8x8xf32> to vector<8xf32>
    %87 = vector.shape_cast %86 : vector<8xf32> to vector<8x1xf32>
    %88 = vector.broadcast %87 : vector<8x1xf32> to vector<8x8xf32>
    %89 = arith.subf %85, %88 : vector<8x8xf32>
    %90 = math.exp %89 : vector<8x8xf32>
    %cst_32 = arith.constant dense<0.000000e+00> : vector<8xf32>
    %91 = vector.multi_reduction <add>, %90, %cst_32 [1] : vector<8x8xf32> to vector<8xf32>
    %92 = vector.shape_cast %91 : vector<8xf32> to vector<8x1xf32>
    %93 = tpu.reciprocal %92 {approx = true} : vector<8x1xf32> -> vector<8x1xf32>
    %94 = vector.broadcast %93 : vector<8x1xf32> to vector<8x8xf32>
    %95 = arith.mulf %90, %94 : vector<8x8xf32>
    %96 = arith.truncf %95 : vector<8x8xf32> to vector<8x8xbf16>
    %cst_33 = arith.constant dense<0.000000e+00> : vector<8x8xf32>
    %97 = tpu.matmul %96, %83, %cst_33 {dimension_numbers = #tpu.dot_dimension_numbers<[1], [0], [0], [1], [0, 0, 1, 1], [], []>} : vector<8x8xbf16>, vector<8x8xbf16>, vector<8x8xf32> -> vector<8x8xf32>
    %98 = vector.extract_strided_slice %35 {offsets = [0, 24], sizes = [8, 8], strides = [1, 1]} : vector<8x32xf32> to vector<8x8xf32>
    %99 = arith.truncf %98 : vector<8x8xf32> to vector<8x8xbf16>
    %100 = vector.extract_strided_slice %36 {offsets = [0, 24], sizes = [8, 8], strides = [1, 1]} : vector<8x32xf32> to vector<8x8xf32>
    %101 = arith.truncf %100 : vector<8x8xf32> to vector<8x8xbf16>
    %102 = vector.extract_strided_slice %37 {offsets = [0, 24], sizes = [8, 8], strides = [1, 1]} : vector<8x32xf32> to vector<8x8xf32>
    %103 = arith.truncf %102 : vector<8x8xf32> to vector<8x8xbf16>
    %cst_34 = arith.constant dense<0.000000e+00> : vector<8x8xf32>
    %104 = tpu.matmul %99, %101, %cst_34 {dimension_numbers = #tpu.dot_dimension_numbers<[1], [1], [0], [0], [0, 0, 1, 0], [], []>} : vector<8x8xbf16>, vector<8x8xbf16>, vector<8x8xf32> -> vector<8x8xf32>
    %105 = arith.addf %104, %5 : vector<8x8xf32>
    %cst_35 = arith.constant dense<0xFF800000> : vector<8xf32>
    %106 = vector.multi_reduction <maximumf>, %105, %cst_35 [1] : vector<8x8xf32> to vector<8xf32>
    %107 = vector.shape_cast %106 : vector<8xf32> to vector<8x1xf32>
    %108 = vector.broadcast %107 : vector<8x1xf32> to vector<8x8xf32>
    %109 = arith.subf %105, %108 : vector<8x8xf32>
    %110 = math.exp %109 : vector<8x8xf32>
    %cst_36 = arith.constant dense<0.000000e+00> : vector<8xf32>
    %111 = vector.multi_reduction <add>, %110, %cst_36 [1] : vector<8x8xf32> to vector<8xf32>
    %112 = vector.shape_cast %111 : vector<8xf32> to vector<8x1xf32>
    %113 = tpu.reciprocal %112 {approx = true} : vector<8x1xf32> -> vector<8x1xf32>
    %114 = vector.broadcast %113 : vector<8x1xf32> to vector<8x8xf32>
    %115 = arith.mulf %110, %114 : vector<8x8xf32>
    %116 = arith.truncf %115 : vector<8x8xf32> to vector<8x8xbf16>
    %cst_37 = arith.constant dense<0.000000e+00> : vector<8x8xf32>
    %117 = tpu.matmul %116, %103, %cst_37 {dimension_numbers = #tpu.dot_dimension_numbers<[1], [0], [0], [1], [0, 0, 1, 1], [], []>} : vector<8x8xbf16>, vector<8x8xbf16>, vector<8x8xf32> -> vector<8x8xf32>
    %118 = tpu.concatenate %57, %77, %97, %117 in 1 : vector<8x8xf32>, vector<8x8xf32>, vector<8x8xf32>, vector<8x8xf32> -> vector<8x32xf32>
    %119 = arith.truncf %118 : vector<8x32xf32> to vector<8x32xbf16>
    %c0_38 = arith.constant 0 : index
    %c0_39 = arith.constant 0 : index
    %120 = vector.load %arg8[%c0_38, %c0_39] : memref<32x32xbf16, #tpu.memory_space<vmem>>, vector<32x32xbf16>
    %cst_40 = arith.constant dense<0.000000e+00> : vector<8x32xf32>
    %121 = tpu.matmul %119, %120, %cst_40 {dimension_numbers = #tpu.dot_dimension_numbers<[1], [0], [0], [1], [0, 0, 1, 1], [], []>} : vector<8x32xbf16>, vector<32x32xbf16>, vector<8x32xf32> -> vector<8x32xf32>
    %122 = arith.addf %1, %121 : vector<8x32xf32>
    %cst_41 = arith.constant dense<0.000000e+00> : vector<8xf32>
    %123 = vector.multi_reduction <add>, %122, %cst_41 [1] : vector<8x32xf32> to vector<8xf32>
    %124 = vector.shape_cast %123 : vector<8xf32> to vector<8x1xf32>
    %cst_42 = arith.constant 3.200000e+01 : f32
    %125 = vector.broadcast %cst_42 : f32 to vector<8x1xf32>
    %126 = arith.divf %124, %125 : vector<8x1xf32>
    %127 = vector.broadcast %126 : vector<8x1xf32> to vector<8x32xf32>
    %128 = arith.subf %122, %127 : vector<8x32xf32>
    %129 = arith.mulf %128, %128 : vector<8x32xf32>
    %cst_43 = arith.constant dense<0.000000e+00> : vector<8xf32>
    %130 = vector.multi_reduction <add>, %129, %cst_43 [1] : vector<8x32xf32> to vector<8xf32>
    %131 = vector.shape_cast %130 : vector<8xf32> to vector<8x1xf32>
    %cst_44 = arith.constant 3.200000e+01 : f32
    %132 = vector.broadcast %cst_44 : f32 to vector<8x1xf32>
    %133 = arith.divf %131, %132 : vector<8x1xf32>
    %134 = vector.broadcast %126 : vector<8x1xf32> to vector<8x32xf32>
    %135 = arith.subf %122, %134 : vector<8x32xf32>
    %cst_45 = arith.constant 9.99999974E-6 : f32
    %136 = vector.broadcast %cst_45 : f32 to vector<8x1xf32>
    %137 = arith.addf %133, %136 : vector<8x1xf32>
    %138 = math.rsqrt %137 : vector<8x1xf32>
    %139 = vector.broadcast %138 : vector<8x1xf32> to vector<8x32xf32>
    %140 = arith.mulf %135, %139 : vector<8x32xf32>
    %c0_46 = arith.constant 0 : index
    %c0_47 = arith.constant 0 : index
    %141 = vector.load %arg9[%c0_46, %c0_47] : memref<1x32xf32, #tpu.memory_space<vmem>>, vector<1x32xf32>
    %142 = vector.broadcast %141 : vector<1x32xf32> to vector<8x32xf32>
    %143 = arith.mulf %140, %142 : vector<8x32xf32>
    %c0_48 = arith.constant 0 : index
    %c0_49 = arith.constant 0 : index
    %144 = vector.load %arg10[%c0_48, %c0_49] : memref<1x32xf32, #tpu.memory_space<vmem>>, vector<1x32xf32>
    %145 = vector.broadcast %144 : vector<1x32xf32> to vector<8x32xf32>
    %146 = arith.addf %143, %145 : vector<8x32xf32>
    %147 = arith.truncf %146 : vector<8x32xf32> to vector<8x32xbf16>
    %c0_50 = arith.constant 0 : index
    %c0_51 = arith.constant 0 : index
    %148 = vector.load %arg11[%c0_50, %c0_51] : memref<32x32xbf16, #tpu.memory_space<vmem>>, vector<32x32xbf16>
    %cst_52 = arith.constant dense<0.000000e+00> : vector<8x32xf32>
    %149 = tpu.matmul %147, %148, %cst_52 {dimension_numbers = #tpu.dot_dimension_numbers<[1], [0], [0], [1], [0, 0, 1, 1], [], []>} : vector<8x32xbf16>, vector<32x32xbf16>, vector<8x32xf32> -> vector<8x32xf32>
    %150 = arith.truncf %3 : vector<8x32xf32> to vector<8x32xbf16>
    %c0_53 = arith.constant 0 : index
    %c0_54 = arith.constant 0 : index
    %151 = vector.load %arg12[%c0_53, %c0_54] : memref<32x64xbf16, #tpu.memory_space<vmem>>, vector<32x64xbf16>
    %cst_55 = arith.constant dense<0.000000e+00> : vector<8x64xf32>
    %152 = tpu.matmul %150, %151, %cst_55 {dimension_numbers = #tpu.dot_dimension_numbers<[1], [0], [0], [1], [0, 0, 1, 1], [], []>} : vector<8x32xbf16>, vector<32x64xbf16>, vector<8x64xf32> -> vector<8x64xf32>
    %153 = vector.extract_strided_slice %152 {offsets = [0, 0], sizes = [8, 32], strides = [1, 1]} : vector<8x64xf32> to vector<8x32xf32>
    %154 = vector.extract_strided_slice %152 {offsets = [0, 32], sizes = [8, 32], strides = [1, 1]} : vector<8x64xf32> to vector<8x32xf32>
    %155 = vector.extract_strided_slice %149 {offsets = [0, 0], sizes = [8, 8], strides = [1, 1]} : vector<8x32xf32> to vector<8x8xf32>
    %156 = arith.truncf %155 : vector<8x8xf32> to vector<8x8xbf16>
    %157 = vector.extract_strided_slice %153 {offsets = [0, 0], sizes = [8, 8], strides = [1, 1]} : vector<8x32xf32> to vector<8x8xf32>
    %158 = arith.truncf %157 : vector<8x8xf32> to vector<8x8xbf16>
    %159 = vector.extract_strided_slice %154 {offsets = [0, 0], sizes = [8, 8], strides = [1, 1]} : vector<8x32xf32> to vector<8x8xf32>
    %160 = arith.truncf %159 : vector<8x8xf32> to vector<8x8xbf16>
    %cst_56 = arith.constant dense<0.000000e+00> : vector<8x8xf32>
    %161 = tpu.matmul %156, %158, %cst_56 {dimension_numbers = #tpu.dot_dimension_numbers<[1], [1], [0], [0], [0, 0, 1, 0], [], []>} : vector<8x8xbf16>, vector<8x8xbf16>, vector<8x8xf32> -> vector<8x8xf32>
    %162 = arith.addf %161, %7 : vector<8x8xf32>
    %cst_57 = arith.constant dense<0xFF800000> : vector<8xf32>
    %163 = vector.multi_reduction <maximumf>, %162, %cst_57 [1] : vector<8x8xf32> to vector<8xf32>
    %164 = vector.shape_cast %163 : vector<8xf32> to vector<8x1xf32>
    %165 = vector.broadcast %164 : vector<8x1xf32> to vector<8x8xf32>
    %166 = arith.subf %162, %165 : vector<8x8xf32>
    %167 = math.exp %166 : vector<8x8xf32>
    %cst_58 = arith.constant dense<0.000000e+00> : vector<8xf32>
    %168 = vector.multi_reduction <add>, %167, %cst_58 [1] : vector<8x8xf32> to vector<8xf32>
    %169 = vector.shape_cast %168 : vector<8xf32> to vector<8x1xf32>
    %170 = tpu.reciprocal %169 {approx = true} : vector<8x1xf32> -> vector<8x1xf32>
    %171 = vector.broadcast %170 : vector<8x1xf32> to vector<8x8xf32>
    %172 = arith.mulf %167, %171 : vector<8x8xf32>
    %173 = arith.truncf %172 : vector<8x8xf32> to vector<8x8xbf16>
    %cst_59 = arith.constant dense<0.000000e+00> : vector<8x8xf32>
    %174 = tpu.matmul %173, %160, %cst_59 {dimension_numbers = #tpu.dot_dimension_numbers<[1], [0], [0], [1], [0, 0, 1, 1], [], []>} : vector<8x8xbf16>, vector<8x8xbf16>, vector<8x8xf32> -> vector<8x8xf32>
    %175 = vector.extract_strided_slice %149 {offsets = [0, 8], sizes = [8, 8], strides = [1, 1]} : vector<8x32xf32> to vector<8x8xf32>
    %176 = arith.truncf %175 : vector<8x8xf32> to vector<8x8xbf16>
    %177 = vector.extract_strided_slice %153 {offsets = [0, 8], sizes = [8, 8], strides = [1, 1]} : vector<8x32xf32> to vector<8x8xf32>
    %178 = arith.truncf %177 : vector<8x8xf32> to vector<8x8xbf16>
    %179 = vector.extract_strided_slice %154 {offsets = [0, 8], sizes = [8, 8], strides = [1, 1]} : vector<8x32xf32> to vector<8x8xf32>
    %180 = arith.truncf %179 : vector<8x8xf32> to vector<8x8xbf16>
    %cst_60 = arith.constant dense<0.000000e+00> : vector<8x8xf32>
    %181 = tpu.matmul %176, %178, %cst_60 {dimension_numbers = #tpu.dot_dimension_numbers<[1], [1], [0], [0], [0, 0, 1, 0], [], []>} : vector<8x8xbf16>, vector<8x8xbf16>, vector<8x8xf32> -> vector<8x8xf32>
    %182 = arith.addf %181, %7 : vector<8x8xf32>
    %cst_61 = arith.constant dense<0xFF800000> : vector<8xf32>
    %183 = vector.multi_reduction <maximumf>, %182, %cst_61 [1] : vector<8x8xf32> to vector<8xf32>
    %184 = vector.shape_cast %183 : vector<8xf32> to vector<8x1xf32>
    %185 = vector.broadcast %184 : vector<8x1xf32> to vector<8x8xf32>
    %186 = arith.subf %182, %185 : vector<8x8xf32>
    %187 = math.exp %186 : vector<8x8xf32>
    %cst_62 = arith.constant dense<0.000000e+00> : vector<8xf32>
    %188 = vector.multi_reduction <add>, %187, %cst_62 [1] : vector<8x8xf32> to vector<8xf32>
    %189 = vector.shape_cast %188 : vector<8xf32> to vector<8x1xf32>
    %190 = tpu.reciprocal %189 {approx = true} : vector<8x1xf32> -> vector<8x1xf32>
    %191 = vector.broadcast %190 : vector<8x1xf32> to vector<8x8xf32>
    %192 = arith.mulf %187, %191 : vector<8x8xf32>
    %193 = arith.truncf %192 : vector<8x8xf32> to vector<8x8xbf16>
    %cst_63 = arith.constant dense<0.000000e+00> : vector<8x8xf32>
    %194 = tpu.matmul %193, %180, %cst_63 {dimension_numbers = #tpu.dot_dimension_numbers<[1], [0], [0], [1], [0, 0, 1, 1], [], []>} : vector<8x8xbf16>, vector<8x8xbf16>, vector<8x8xf32> -> vector<8x8xf32>
    %195 = arith.addf %172, %192 : vector<8x8xf32>
    %196 = vector.extract_strided_slice %149 {offsets = [0, 16], sizes = [8, 8], strides = [1, 1]} : vector<8x32xf32> to vector<8x8xf32>
    %197 = arith.truncf %196 : vector<8x8xf32> to vector<8x8xbf16>
    %198 = vector.extract_strided_slice %153 {offsets = [0, 16], sizes = [8, 8], strides = [1, 1]} : vector<8x32xf32> to vector<8x8xf32>
    %199 = arith.truncf %198 : vector<8x8xf32> to vector<8x8xbf16>
    %200 = vector.extract_strided_slice %154 {offsets = [0, 16], sizes = [8, 8], strides = [1, 1]} : vector<8x32xf32> to vector<8x8xf32>
    %201 = arith.truncf %200 : vector<8x8xf32> to vector<8x8xbf16>
    %cst_64 = arith.constant dense<0.000000e+00> : vector<8x8xf32>
    %202 = tpu.matmul %197, %199, %cst_64 {dimension_numbers = #tpu.dot_dimension_numbers<[1], [1], [0], [0], [0, 0, 1, 0], [], []>} : vector<8x8xbf16>, vector<8x8xbf16>, vector<8x8xf32> -> vector<8x8xf32>
    %203 = arith.addf %202, %7 : vector<8x8xf32>
    %cst_65 = arith.constant dense<0xFF800000> : vector<8xf32>
    %204 = vector.multi_reduction <maximumf>, %203, %cst_65 [1] : vector<8x8xf32> to vector<8xf32>
    %205 = vector.shape_cast %204 : vector<8xf32> to vector<8x1xf32>
    %206 = vector.broadcast %205 : vector<8x1xf32> to vector<8x8xf32>
    %207 = arith.subf %203, %206 : vector<8x8xf32>
    %208 = math.exp %207 : vector<8x8xf32>
    %cst_66 = arith.constant dense<0.000000e+00> : vector<8xf32>
    %209 = vector.multi_reduction <add>, %208, %cst_66 [1] : vector<8x8xf32> to vector<8xf32>
    %210 = vector.shape_cast %209 : vector<8xf32> to vector<8x1xf32>
    %211 = tpu.reciprocal %210 {approx = true} : vector<8x1xf32> -> vector<8x1xf32>
    %212 = vector.broadcast %211 : vector<8x1xf32> to vector<8x8xf32>
    %213 = arith.mulf %208, %212 : vector<8x8xf32>
    %214 = arith.truncf %213 : vector<8x8xf32> to vector<8x8xbf16>
    %cst_67 = arith.constant dense<0.000000e+00> : vector<8x8xf32>
    %215 = tpu.matmul %214, %201, %cst_67 {dimension_numbers = #tpu.dot_dimension_numbers<[1], [0], [0], [1], [0, 0, 1, 1], [], []>} : vector<8x8xbf16>, vector<8x8xbf16>, vector<8x8xf32> -> vector<8x8xf32>
    %216 = arith.addf %195, %213 : vector<8x8xf32>
    %217 = vector.extract_strided_slice %149 {offsets = [0, 24], sizes = [8, 8], strides = [1, 1]} : vector<8x32xf32> to vector<8x8xf32>
    %218 = arith.truncf %217 : vector<8x8xf32> to vector<8x8xbf16>
    %219 = vector.extract_strided_slice %153 {offsets = [0, 24], sizes = [8, 8], strides = [1, 1]} : vector<8x32xf32> to vector<8x8xf32>
    %220 = arith.truncf %219 : vector<8x8xf32> to vector<8x8xbf16>
    %221 = vector.extract_strided_slice %154 {offsets = [0, 24], sizes = [8, 8], strides = [1, 1]} : vector<8x32xf32> to vector<8x8xf32>
    %222 = arith.truncf %221 : vector<8x8xf32> to vector<8x8xbf16>
    %cst_68 = arith.constant dense<0.000000e+00> : vector<8x8xf32>
    %223 = tpu.matmul %218, %220, %cst_68 {dimension_numbers = #tpu.dot_dimension_numbers<[1], [1], [0], [0], [0, 0, 1, 0], [], []>} : vector<8x8xbf16>, vector<8x8xbf16>, vector<8x8xf32> -> vector<8x8xf32>
    %224 = arith.addf %223, %7 : vector<8x8xf32>
    %cst_69 = arith.constant dense<0xFF800000> : vector<8xf32>
    %225 = vector.multi_reduction <maximumf>, %224, %cst_69 [1] : vector<8x8xf32> to vector<8xf32>
    %226 = vector.shape_cast %225 : vector<8xf32> to vector<8x1xf32>
    %227 = vector.broadcast %226 : vector<8x1xf32> to vector<8x8xf32>
    %228 = arith.subf %224, %227 : vector<8x8xf32>
    %229 = math.exp %228 : vector<8x8xf32>
    %cst_70 = arith.constant dense<0.000000e+00> : vector<8xf32>
    %230 = vector.multi_reduction <add>, %229, %cst_70 [1] : vector<8x8xf32> to vector<8xf32>
    %231 = vector.shape_cast %230 : vector<8xf32> to vector<8x1xf32>
    %232 = tpu.reciprocal %231 {approx = true} : vector<8x1xf32> -> vector<8x1xf32>
    %233 = vector.broadcast %232 : vector<8x1xf32> to vector<8x8xf32>
    %234 = arith.mulf %229, %233 : vector<8x8xf32>
    %235 = arith.truncf %234 : vector<8x8xf32> to vector<8x8xbf16>
    %cst_71 = arith.constant dense<0.000000e+00> : vector<8x8xf32>
    %236 = tpu.matmul %235, %222, %cst_71 {dimension_numbers = #tpu.dot_dimension_numbers<[1], [0], [0], [1], [0, 0, 1, 1], [], []>} : vector<8x8xbf16>, vector<8x8xbf16>, vector<8x8xf32> -> vector<8x8xf32>
    %237 = arith.addf %216, %234 : vector<8x8xf32>
    %238 = tpu.concatenate %174, %194, %215, %236 in 1 : vector<8x8xf32>, vector<8x8xf32>, vector<8x8xf32>, vector<8x8xf32> -> vector<8x32xf32>
    %239 = arith.truncf %238 : vector<8x32xf32> to vector<8x32xbf16>
    %c0_72 = arith.constant 0 : index
    %c0_73 = arith.constant 0 : index
    %240 = vector.load %arg13[%c0_72, %c0_73] : memref<32x32xbf16, #tpu.memory_space<vmem>>, vector<32x32xbf16>
    %cst_74 = arith.constant dense<0.000000e+00> : vector<8x32xf32>
    %241 = tpu.matmul %239, %240, %cst_74 {dimension_numbers = #tpu.dot_dimension_numbers<[1], [0], [0], [1], [0, 0, 1, 1], [], []>} : vector<8x32xbf16>, vector<32x32xbf16>, vector<8x32xf32> -> vector<8x32xf32>
    %242 = arith.addf %122, %241 : vector<8x32xf32>
    %cst_75 = arith.constant 2.500000e-01 : f32
    %243 = vector.broadcast %cst_75 : f32 to vector<8x8xf32>
    %244 = arith.mulf %237, %243 : vector<8x8xf32>
    %c0_76 = arith.constant 0 : index
    %c0_77 = arith.constant 0 : index
    %c0_78 = arith.constant 0 : index
    %245 = vector.load %arg23[%c0_76, %c0_77, %c0_78] : memref<1x8x8xf32, #tpu.memory_space<vmem>>, vector<1x8x8xf32>
    %246 = vector.shape_cast %245 : vector<1x8x8xf32> to vector<8x8xf32>
    %247 = vector.shape_cast %244 : vector<8x8xf32> to vector<1x8x8xf32>
    tpu.vector_store %arg23[%c0_76, %c0_77, %c0_78], %247 {strides = array<i32>} : memref<1x8x8xf32, #tpu.memory_space<vmem>>, vector<1x8x8xf32>,
    %cst_79 = arith.constant dense<0.000000e+00> : vector<8xf32>
    %248 = vector.multi_reduction <add>, %242, %cst_79 [1] : vector<8x32xf32> to vector<8xf32>
    %249 = vector.shape_cast %248 : vector<8xf32> to vector<8x1xf32>
    %cst_80 = arith.constant 3.200000e+01 : f32
    %250 = vector.broadcast %cst_80 : f32 to vector<8x1xf32>
    %251 = arith.divf %249, %250 : vector<8x1xf32>
    %252 = vector.broadcast %251 : vector<8x1xf32> to vector<8x32xf32>
    %253 = arith.subf %242, %252 : vector<8x32xf32>
    %254 = arith.mulf %253, %253 : vector<8x32xf32>
    %cst_81 = arith.constant dense<0.000000e+00> : vector<8xf32>
    %255 = vector.multi_reduction <add>, %254, %cst_81 [1] : vector<8x32xf32> to vector<8xf32>
    %256 = vector.shape_cast %255 : vector<8xf32> to vector<8x1xf32>
    %cst_82 = arith.constant 3.200000e+01 : f32
    %257 = vector.broadcast %cst_82 : f32 to vector<8x1xf32>
    %258 = arith.divf %256, %257 : vector<8x1xf32>
    %259 = vector.broadcast %251 : vector<8x1xf32> to vector<8x32xf32>
    %260 = arith.subf %242, %259 : vector<8x32xf32>
    %cst_83 = arith.constant 9.99999974E-6 : f32
    %261 = vector.broadcast %cst_83 : f32 to vector<8x1xf32>
    %262 = arith.addf %258, %261 : vector<8x1xf32>
    %263 = math.rsqrt %262 : vector<8x1xf32>
    %264 = vector.broadcast %263 : vector<8x1xf32> to vector<8x32xf32>
    %265 = arith.mulf %260, %264 : vector<8x32xf32>
    %c0_84 = arith.constant 0 : index
    %c0_85 = arith.constant 0 : index
    %266 = vector.load %arg14[%c0_84, %c0_85] : memref<1x32xf32, #tpu.memory_space<vmem>>, vector<1x32xf32>
    %267 = vector.broadcast %266 : vector<1x32xf32> to vector<8x32xf32>
    %268 = arith.mulf %265, %267 : vector<8x32xf32>
    %c0_86 = arith.constant 0 : index
    %c0_87 = arith.constant 0 : index
    %269 = vector.load %arg15[%c0_86, %c0_87] : memref<1x32xf32, #tpu.memory_space<vmem>>, vector<1x32xf32>
    %270 = vector.broadcast %269 : vector<1x32xf32> to vector<8x32xf32>
    %271 = arith.addf %268, %270 : vector<8x32xf32>
    %272 = arith.truncf %271 : vector<8x32xf32> to vector<8x32xbf16>
    %c0_88 = arith.constant 0 : index
    %c0_89 = arith.constant 0 : index
    %273 = vector.load %arg16[%c0_88, %c0_89] : memref<32x64xbf16, #tpu.memory_space<vmem>>, vector<32x64xbf16>
    %cst_90 = arith.constant dense<0.000000e+00> : vector<8x64xf32>
    %274 = tpu.matmul %272, %273, %cst_90 {dimension_numbers = #tpu.dot_dimension_numbers<[1], [0], [0], [1], [0, 0, 1, 1], [], []>} : vector<8x32xbf16>, vector<32x64xbf16>, vector<8x64xf32> -> vector<8x64xf32>
    %c0_91 = arith.constant 0 : index
    %c0_92 = arith.constant 0 : index
    %275 = vector.load %arg17[%c0_91, %c0_92] : memref<1x64xf32, #tpu.memory_space<vmem>>, vector<1x64xf32>
    %276 = vector.broadcast %275 : vector<1x64xf32> to vector<8x64xf32>
    %277 = arith.addf %274, %276 : vector<8x64xf32>
    %cst_93 = arith.constant 0.000000e+00 : f32
    %278 = vector.broadcast %cst_93 : f32 to vector<8x64xf32>
    %279 = arith.maximumf %277, %278 : vector<8x64xf32>
    %280 = arith.truncf %279 : vector<8x64xf32> to vector<8x64xbf16>
    %c0_94 = arith.constant 0 : index
    %c0_95 = arith.constant 0 : index
    %281 = vector.load %arg18[%c0_94, %c0_95] : memref<64x32xbf16, #tpu.memory_space<vmem>>, vector<64x32xbf16>
    %cst_96 = arith.constant dense<0.000000e+00> : vector<8x32xf32>
    %282 = tpu.matmul %280, %281, %cst_96 {dimension_numbers = #tpu.dot_dimension_numbers<[1], [0], [0], [1], [0, 0, 1, 1], [], []>} : vector<8x64xbf16>, vector<64x32xbf16>, vector<8x32xf32> -> vector<8x32xf32>
    %c0_97 = arith.constant 0 : index
    %c0_98 = arith.constant 0 : index
    %283 = vector.load %arg19[%c0_97, %c0_98] : memref<1x32xf32, #tpu.memory_space<vmem>>, vector<1x32xf32>
    %284 = vector.broadcast %283 : vector<1x32xf32> to vector<8x32xf32>
    %285 = arith.addf %282, %284 : vector<8x32xf32>
    %286 = arith.addf %242, %285 : vector<8x32xf32>
    %c0_99 = arith.constant 0 : index
    %c0_100 = arith.constant 0 : index
    %c0_101 = arith.constant 0 : index
    %287 = vector.load %arg22[%c0_99, %c0_100, %c0_101] : memref<1x8x32xf32, #tpu.memory_space<vmem>>, vector<1x8x32xf32>
    %288 = vector.shape_cast %287 : vector<1x8x32xf32> to vector<8x32xf32>
    %289 = vector.shape_cast %286 : vector<8x32xf32> to vector<1x8x32xf32>
    tpu.vector_store %arg22[%c0_99, %c0_100, %c0_101], %289 {strides = array<i32>} : memref<1x8x32xf32, #tpu.memory_space<vmem>>, vector<1x8x32xf32>,
    return
  }
  func.func @transform_0(%arg0: i32) -> (i32, i32, i32) {
    %c0_i32 = arith.constant 0 : i32
    %c0_i32_0 = arith.constant 0 : i32
    %c0_i32_1 = arith.constant 0 : i32
    return %arg0, %c0_i32, %c0_i32_0 : i32, i32, i32
  }
  func.func @transform_1(%arg0: i32) -> (i32, i32, i32) {
    %c0_i32 = arith.constant 0 : i32
    %c0_i32_0 = arith.constant 0 : i32
    %c0_i32_1 = arith.constant 0 : i32
    return %arg0, %c0_i32, %c0_i32_0 : i32, i32, i32
  }
  func.func @transform_2(%arg0: i32) -> (i32, i32, i32) {
    %c0_i32 = arith.constant 0 : i32
    %c0_i32_0 = arith.constant 0 : i32
    %c0_i32_1 = arith.constant 0 : i32
    return %arg0, %c0_i32, %c0_i32_0 : i32, i32, i32
  }
  func.func @transform_3(%arg0: i32) -> (i32, i32, i32) {
    %c0_i32 = arith.constant 0 : i32
    %c0_i32_0 = arith.constant 0 : i32
    %c0_i32_1 = arith.constant 0 : i32
    return %arg0, %c0_i32, %c0_i32_0 : i32, i32, i32
  }
  func.func @transform_4(%arg0: i32) -> (i32, i32) {
    %c0_i32 = arith.constant 0 : i32
    %c0_i32_0 = arith.constant 0 : i32
    %c0_i32_1 = arith.constant 0 : i32
    return %c0_i32, %c0_i32_0 : i32, i32
  }
  func.func @transform_5(%arg0: i32) -> (i32, i32) {
    %c0_i32 = arith.constant 0 : i32
    %c0_i32_0 = arith.constant 0 : i32
    %c0_i32_1 = arith.constant 0 : i32
    return %c0_i32, %c0_i32_0 : i32, i32
  }
  func.func @transform_6(%arg0: i32) -> (i32, i32) {
    %c0_i32 = arith.constant 0 : i32
    %c0_i32_0 = arith.constant 0 : i32
    %c0_i32_1 = arith.constant 0 : i32
    return %c0_i32, %c0_i32_0 : i32, i32
  }
  func.func @transform_7(%arg0: i32) -> (i32, i32) {
    %c0_i32 = arith.constant 0 : i32
    %c0_i32_0 = arith.constant 0 : i32
    %c0_i32_1 = arith.constant 0 : i32
    return %c0_i32, %c0_i32_0 : i32, i32
  }
  func.func @transform_8(%arg0: i32) -> (i32, i32) {
    %c0_i32 = arith.constant 0 : i32
    %c0_i32_0 = arith.constant 0 : i32
    %c0_i32_1 = arith.constant 0 : i32
    return %c0_i32, %c0_i32_0 : i32, i32
  }
  func.func @transform_9(%arg0: i32) -> (i32, i32) {
    %c0_i32 = arith.constant 0 : i32
    %c0_i32_0 = arith.constant 0 : i32
    %c0_i32_1 = arith.constant 0 : i32
    return %c0_i32, %c0_i32_0 : i32, i32
  }
  func.func @transform_10(%arg0: i32) -> (i32, i32) {
    %c0_i32 = arith.constant 0 : i32
    %c0_i32_0 = arith.constant 0 : i32
    %c0_i32_1 = arith.constant 0 : i32
    return %c0_i32, %c0_i32_0 : i32, i32
  }
  func.func @transform_11(%arg0: i32) -> (i32, i32) {
    %c0_i32 = arith.constant 0 : i32
    %c0_i32_0 = arith.constant 0 : i32
    %c0_i32_1 = arith.constant 0 : i32
    return %c0_i32, %c0_i32_0 : i32, i32
  }
  func.func @transform_12(%arg0: i32) -> (i32, i32) {
    %c0_i32 = arith.constant 0 : i32
    %c0_i32_0 = arith.constant 0 : i32
    %c0_i32_1 = arith.constant 0 : i32
    return %c0_i32, %c0_i32_0 : i32, i32
  }
  func.func @transform_13(%arg0: i32) -> (i32, i32) {
    %c0_i32 = arith.constant 0 : i32
    %c0_i32_0 = arith.constant 0 : i32
    %c0_i32_1 = arith.constant 0 : i32
    return %c0_i32, %c0_i32_0 : i32, i32
  }
  func.func @transform_14(%arg0: i32) -> (i32, i32) {
    %c0_i32 = arith.constant 0 : i32
    %c0_i32_0 = arith.constant 0 : i32
    %c0_i32_1 = arith.constant 0 : i32
    return %c0_i32, %c0_i32_0 : i32, i32
  }
  func.func @transform_15(%arg0: i32) -> (i32, i32) {
    %c0_i32 = arith.constant 0 : i32
    %c0_i32_0 = arith.constant 0 : i32
    %c0_i32_1 = arith.constant 0 : i32
    return %c0_i32, %c0_i32_0 : i32, i32
  }
  func.func @transform_16(%arg0: i32) -> (i32, i32) {
    %c0_i32 = arith.constant 0 : i32
    %c0_i32_0 = arith.constant 0 : i32
    %c0_i32_1 = arith.constant 0 : i32
    return %c0_i32, %c0_i32_0 : i32, i32
  }
  func.func @transform_17(%arg0: i32) -> (i32, i32) {
    %c0_i32 = arith.constant 0 : i32
    %c0_i32_0 = arith.constant 0 : i32
    %c0_i32_1 = arith.constant 0 : i32
    return %c0_i32, %c0_i32_0 : i32, i32
  }
  func.func @transform_18(%arg0: i32) -> (i32, i32) {
    %c0_i32 = arith.constant 0 : i32
    %c0_i32_0 = arith.constant 0 : i32
    %c0_i32_1 = arith.constant 0 : i32
    return %c0_i32, %c0_i32_0 : i32, i32
  }
  func.func @transform_19(%arg0: i32) -> (i32, i32) {
    %c0_i32 = arith.constant 0 : i32
    %c0_i32_0 = arith.constant 0 : i32
    %c0_i32_1 = arith.constant 0 : i32
    return %c0_i32, %c0_i32_0 : i32, i32
  }
  func.func @transform_20(%arg0: i32) -> (i32, i32) {
    %c0_i32 = arith.constant 0 : i32
    %c0_i32_0 = arith.constant 0 : i32
    %c0_i32_1 = arith.constant 0 : i32
    return %c0_i32, %c0_i32_0 : i32, i32
  }
  func.func @transform_21(%arg0: i32) -> (i32, i32, i32) {
    %c0_i32 = arith.constant 0 : i32
    %c0_i32_0 = arith.constant 0 : i32
    %c0_i32_1 = arith.constant 0 : i32
    return %arg0, %c0_i32, %c0_i32_0 : i32, i32, i32
  }
  func.func @transform_22(%arg0: i32) -> (i32, i32, i32) {
    %c0_i32 = arith.constant 0 : i32
    %c0_i32_0 = arith.constant 0 : i32
    %c0_i32_1 = arith.constant 0 : i32
    return %arg0, %c0_i32, %c0_i32_0 : i32, i32, i32
  }
}

module attributes {stable_mosaic.version = 11 : i64} {
  func.func @_decoder_layer_kernel(%arg0: i32, %arg1: memref<1x8x32xf32, #tpu.memory_space<vmem>>, %arg2: memref<1x8x32xf32, #tpu.memory_space<vmem>>, %arg3: memref<1x8x8xf32, #tpu.memory_space<vmem>>, %arg4: memref<1x8x8xf32, #tpu.memory_space<vmem>>, %arg5: memref<1x32xf32, #tpu.memory_space<vmem>>, %arg6: memref<1x32xf32, #tpu.memory_space<vmem>>, %arg7: memref<32x96xbf16, #tpu.memory_space<vmem>>, %arg8: memref<32x32xbf16, #tpu.memory_space<vmem>>, %arg9: memref<1x32xf32, #tpu.memory_space<vmem>>, %arg10: memref<1x32xf32, #tpu.memory_space<vmem>>, %arg11: memref<32x32xbf16, #tpu.memory_space<vmem>>, %arg12: memref<32x64xbf16, #tpu.memory_space<vmem>>, %arg13: memref<32x32xbf16, #tpu.memory_space<vmem>>, %arg14: memref<1x32xf32, #tpu.memory_space<vmem>>, %arg15: memref<1x32xf32, #tpu.memory_space<vmem>>, %arg16: memref<32x64xbf16, #tpu.memory_space<vmem>>, %arg17: memref<1x64xf32, #tpu.memory_space<vmem>>, %arg18: memref<64x32xbf16, #tpu.memory_space<vmem>>, %arg19: memref<1x32xf32, #tpu.memory_space<vmem>>, %arg20: memref<1x32xf32, #tpu.memory_space<vmem>>, %arg21: memref<1x32xf32, #tpu.memory_space<vmem>>, %arg22: memref<1x8x32xf32, #tpu.memory_space<vmem>>, %arg23: memref<1x8x8xf32, #tpu.memory_space<vmem>>) attributes {dimension_semantics = [#tpu.dimension_semantics<parallel>], iteration_bounds = array<i64: 2>, scalar_prefetch = 0 : i64, scratch_operands = 0 : i64, tpu.core_type = #tpu.core_type<tc>, window_params = [{transform_indices = @transform_0, window_bounds = array<i64: 1, 8, 32>}, {transform_indices = @transform_1, window_bounds = array<i64: 1, 8, 32>}, {transform_indices = @transform_2, window_bounds = array<i64: 1, 8, 8>}, {transform_indices = @transform_3, window_bounds = array<i64: 1, 8, 8>}, {pipeline_mode = #tpu.pipeline_mode<synchronous>, transform_indices = @transform_4, window_bounds = array<i64: 1, 32>}, {pipeline_mode = #tpu.pipeline_mode<synchronous>, transform_indices = @transform_5, window_bounds = array<i64: 1, 32>}, {pipeline_mode = #tpu.pipeline_mode<synchronous>, transform_indices = @transform_6, window_bounds = array<i64: 32, 96>}, {pipeline_mode = #tpu.pipeline_mode<synchronous>, transform_indices = @transform_7, window_bounds = array<i64: 32, 32>}, {pipeline_mode = #tpu.pipeline_mode<synchronous>, transform_indices = @transform_8, window_bounds = array<i64: 1, 32>}, {pipeline_mode = #tpu.pipeline_mode<synchronous>, transform_indices = @transform_9, window_bounds = array<i64: 1, 32>}, {pipeline_mode = #tpu.pipeline_mode<synchronous>, transform_indices = @transform_10, window_bounds = array<i64: 32, 32>}, {pipeline_mode = #tpu.pipeline_mode<synchronous>, transform_indices = @transform_11, window_bounds = array<i64: 32, 64>}, {pipeline_mode = #tpu.pipeline_mode<synchronous>, transform_indices = @transform_12, window_bounds = array<i64: 32, 32>}, {pipeline_mode = #tpu.pipeline_mode<synchronous>, transform_indices = @transform_13, window_bounds = array<i64: 1, 32>}, {pipeline_mode = #tpu.pipeline_mode<synchronous>, transform_indices = @transform_14, window_bounds = array<i64: 1, 32>}, {pipeline_mode = #tpu.pipeline_mode<synchronous>, transform_indices = @transform_15, window_bounds = array<i64: 32, 64>}, {pipeline_mode = #tpu.pipeline_mode<synchronous>, transform_indices = @transform_16, window_bounds = array<i64: 1, 64>}, {pipeline_mode = #tpu.pipeline_mode<synchronous>, transform_indices = @transform_17, window_bounds = array<i64: 64, 32>}, {pipeline_mode = #tpu.pipeline_mode<synchronous>, transform_indices = @transform_18, window_bounds = array<i64: 1, 32>}, {pipeline_mode = #tpu.pipeline_mode<synchronous>, transform_indices = @transform_19, window_bounds = array<i64: 1, 32>}, {pipeline_mode = #tpu.pipeline_mode<synchronous>, transform_indices = @transform_20, window_bounds = array<i64: 1, 32>}, {transform_indices = @transform_21, window_bounds = array<i64: 1, 8, 32>}, {transform_indices = @transform_22, window_bounds = array<i64: 1, 8, 8>}]} {
    %c0 = arith.constant 0 : index
    %c0_0 = arith.constant 0 : index
    %c0_1 = arith.constant 0 : index
    %0 = vector.load %arg1[%c0, %c0_0, %c0_1] : memref<1x8x32xf32, #tpu.memory_space<vmem>>, vector<1x8x32xf32>
    %1 = vector.shape_cast %0 : vector<1x8x32xf32> to vector<8x32xf32>
    %c0_2 = arith.constant 0 : index
    %c0_3 = arith.constant 0 : index
    %c0_4 = arith.constant 0 : index
    %2 = vector.load %arg2[%c0_2, %c0_3, %c0_4] : memref<1x8x32xf32, #tpu.memory_space<vmem>>, vector<1x8x32xf32>
    %3 = vector.shape_cast %2 : vector<1x8x32xf32> to vector<8x32xf32>
    %c0_5 = arith.constant 0 : index
    %c0_6 = arith.constant 0 : index
    %c0_7 = arith.constant 0 : index
    %4 = vector.load %arg3[%c0_5, %c0_6, %c0_7] : memref<1x8x8xf32, #tpu.memory_space<vmem>>, vector<1x8x8xf32>
    %5 = vector.shape_cast %4 : vector<1x8x8xf32> to vector<8x8xf32>
    %c0_8 = arith.constant 0 : index
    %c0_9 = arith.constant 0 : index
    %c0_10 = arith.constant 0 : index
    %6 = vector.load %arg4[%c0_8, %c0_9, %c0_10] : memref<1x8x8xf32, #tpu.memory_space<vmem>>, vector<1x8x8xf32>
    %7 = vector.shape_cast %6 : vector<1x8x8xf32> to vector<8x8xf32>
    %cst = arith.constant dense<0.000000e+00> : vector<8xf32>
    %8 = vector.multi_reduction <add>, %1, %cst [1] : vector<8x32xf32> to vector<8xf32>
    %9 = vector.shape_cast %8 : vector<8xf32> to vector<8x1xf32>
    %cst_11 = arith.constant 3.200000e+01 : f32
    %10 = vector.broadcast %cst_11 : f32 to vector<8x1xf32>
    %11 = arith.divf %9, %10 : vector<8x1xf32>
    %12 = vector.broadcast %11 : vector<8x1xf32> to vector<8x32xf32>
    %13 = arith.subf %1, %12 : vector<8x32xf32>
    %14 = arith.mulf %13, %13 : vector<8x32xf32>
    %cst_12 = arith.constant dense<0.000000e+00> : vector<8xf32>
    %15 = vector.multi_reduction <add>, %14, %cst_12 [1] : vector<8x32xf32> to vector<8xf32>
    %16 = vector.shape_cast %15 : vector<8xf32> to vector<8x1xf32>
    %cst_13 = arith.constant 3.200000e+01 : f32
    %17 = vector.broadcast %cst_13 : f32 to vector<8x1xf32>
    %18 = arith.divf %16, %17 : vector<8x1xf32>
    %19 = vector.broadcast %11 : vector<8x1xf32> to vector<8x32xf32>
    %20 = arith.subf %1, %19 : vector<8x32xf32>
    %cst_14 = arith.constant 9.99999974E-6 : f32
    %21 = vector.broadcast %cst_14 : f32 to vector<8x1xf32>
    %22 = arith.addf %18, %21 : vector<8x1xf32>
    %23 = math.rsqrt %22 : vector<8x1xf32>
    %24 = vector.broadcast %23 : vector<8x1xf32> to vector<8x32xf32>
    %25 = arith.mulf %20, %24 : vector<8x32xf32>
    %c0_15 = arith.constant 0 : index
    %c0_16 = arith.constant 0 : index
    %26 = vector.load %arg5[%c0_15, %c0_16] : memref<1x32xf32, #tpu.memory_space<vmem>>, vector<1x32xf32>
    %27 = vector.broadcast %26 : vector<1x32xf32> to vector<8x32xf32>
    %28 = arith.mulf %25, %27 : vector<8x32xf32>
    %c0_17 = arith.constant 0 : index
    %c0_18 = arith.constant 0 : index
    %29 = vector.load %arg6[%c0_17, %c0_18] : memref<1x32xf32, #tpu.memory_space<vmem>>, vector<1x32xf32>
    %30 = vector.broadcast %29 : vector<1x32xf32> to vector<8x32xf32>
    %31 = arith.addf %28, %30 : vector<8x32xf32>
    %32 = arith.truncf %31 : vector<8x32xf32> to vector<8x32xbf16>
    %c0_19 = arith.constant 0 : index
    %c0_20 = arith.constant 0 : index
    %33 = vector.load %arg7[%c0_19, %c0_20] : memref<32x96xbf16, #tpu.memory_space<vmem>>, vector<32x96xbf16>
    %cst_21 = arith.constant dense<0.000000e+00> : vector<8x96xf32>
    %34 = tpu.matmul %32, %33, %cst_21 {dimension_numbers = #tpu.dot_dimension_numbers<[1], [0], [0], [1], [0, 0, 1, 1], [], []>} : vector<8x32xbf16>, vector<32x96xbf16>, vector<8x96xf32> -> vector<8x96xf32>
    %35 = vector.extract_strided_slice %34 {offsets = [0, 0], sizes = [8, 32], strides = [1, 1]} : vector<8x96xf32> to vector<8x32xf32>
    %36 = vector.extract_strided_slice %34 {offsets = [0, 32], sizes = [8, 32], strides = [1, 1]} : vector<8x96xf32> to vector<8x32xf32>
    %37 = vector.extract_strided_slice %34 {offsets = [0, 64], sizes = [8, 32], strides = [1, 1]} : vector<8x96xf32> to vector<8x32xf32>
    %38 = vector.extract_strided_slice %35 {offsets = [0, 0], sizes = [8, 8], strides = [1, 1]} : vector<8x32xf32> to vector<8x8xf32>
    %39 = arith.truncf %38 : vector<8x8xf32> to vector<8x8xbf16>
    %40 = vector.extract_strided_slice %36 {offsets = [0, 0], sizes = [8, 8], strides = [1, 1]} : vector<8x32xf32> to vector<8x8xf32>
    %41 = arith.truncf %40 : vector<8x8xf32> to vector<8x8xbf16>
    %42 = vector.extract_strided_slice %37 {offsets = [0, 0], sizes = [8, 8], strides = [1, 1]} : vector<8x32xf32> to vector<8x8xf32>
    %43 = arith.truncf %42 : vector<8x8xf32> to vector<8x8xbf16>
    %cst_22 = arith.constant dense<0.000000e+00> : vector<8x8xf32>
    %44 = tpu.matmul %39, %41, %cst_22 {dimension_numbers = #tpu.dot_dimension_numbers<[1], [1], [0], [0], [0, 0, 1, 0], [], []>} : vector<8x8xbf16>, vector<8x8xbf16>, vector<8x8xf32> -> vector<8x8xf32>
    %45 = arith.addf %44, %5 : vector<8x8xf32>
    %cst_23 = arith.constant dense<0xFF800000> : vector<8xf32>
    %46 = vector.multi_reduction <maximumf>, %45, %cst_23 [1] : vector<8x8xf32> to vector<8xf32>
    %47 = vector.shape_cast %46 : vector<8xf32> to vector<8x1xf32>
    %48 = vector.broadcast %47 : vector<8x1xf32> to vector<8x8xf32>
    %49 = arith.subf %45, %48 : vector<8x8xf32>
    %50 = math.exp %49 : vector<8x8xf32>
    %cst_24 = arith.constant dense<0.000000e+00> : vector<8xf32>
    %51 = vector.multi_reduction <add>, %50, %cst_24 [1] : vector<8x8xf32> to vector<8xf32>
    %52 = vector.shape_cast %51 : vector<8xf32> to vector<8x1xf32>
    %53 = tpu.reciprocal %52 {approx = true} : vector<8x1xf32> -> vector<8x1xf32>
    %54 = vector.broadcast %53 : vector<8x1xf32> to vector<8x8xf32>
    %55 = arith.mulf %50, %54 : vector<8x8xf32>
    %56 = arith.truncf %55 : vector<8x8xf32> to vector<8x8xbf16>
    %cst_25 = arith.constant dense<0.000000e+00> : vector<8x8xf32>
    %57 = tpu.matmul %56, %43, %cst_25 {dimension_numbers = #tpu.dot_dimension_numbers<[1], [0], [0], [1], [0, 0, 1, 1], [], []>} : vector<8x8xbf16>, vector<8x8xbf16>, vector<8x8xf32> -> vector<8x8xf32>
    %58 = vector.extract_strided_slice %35 {offsets = [0, 8], sizes = [8, 8], strides = [1, 1]} : vector<8x32xf32> to vector<8x8xf32>
    %59 = arith.truncf %58 : vector<8x8xf32> to vector<8x8xbf16>
    %60 = vector.extract_strided_slice %36 {offsets = [0, 8], sizes = [8, 8], strides = [1, 1]} : vector<8x32xf32> to vector<8x8xf32>
    %61 = arith.truncf %60 : vector<8x8xf32> to vector<8x8xbf16>
    %62 = vector.extract_strided_slice %37 {offsets = [0, 8], sizes = [8, 8], strides = [1, 1]} : vector<8x32xf32> to vector<8x8xf32>
    %63 = arith.truncf %62 : vector<8x8xf32> to vector<8x8xbf16>
    %cst_26 = arith.constant dense<0.000000e+00> : vector<8x8xf32>
    %64 = tpu.matmul %59, %61, %cst_26 {dimension_numbers = #tpu.dot_dimension_numbers<[1], [1], [0], [0], [0, 0, 1, 0], [], []>} : vector<8x8xbf16>, vector<8x8xbf16>, vector<8x8xf32> -> vector<8x8xf32>
    %65 = arith.addf %64, %5 : vector<8x8xf32>
    %cst_27 = arith.constant dense<0xFF800000> : vector<8xf32>
    %66 = vector.multi_reduction <maximumf>, %65, %cst_27 [1] : vector<8x8xf32> to vector<8xf32>
    %67 = vector.shape_cast %66 : vector<8xf32> to vector<8x1xf32>
    %68 = vector.broadcast %67 : vector<8x1xf32> to vector<8x8xf32>
    %69 = arith.subf %65, %68 : vector<8x8xf32>
    %70 = math.exp %69 : vector<8x8xf32>
    %cst_28 = arith.constant dense<0.000000e+00> : vector<8xf32>
    %71 = vector.multi_reduction <add>, %70, %cst_28 [1] : vector<8x8xf32> to vector<8xf32>
    %72 = vector.shape_cast %71 : vector<8xf32> to vector<8x1xf32>
    %73 = tpu.reciprocal %72 {approx = true} : vector<8x1xf32> -> vector<8x1xf32>
    %74 = vector.broadcast %73 : vector<8x1xf32> to vector<8x8xf32>
    %75 = arith.mulf %70, %74 : vector<8x8xf32>
    %76 = arith.truncf %75 : vector<8x8xf32> to vector<8x8xbf16>
    %cst_29 = arith.constant dense<0.000000e+00> : vector<8x8xf32>
    %77 = tpu.matmul %76, %63, %cst_29 {dimension_numbers = #tpu.dot_dimension_numbers<[1], [0], [0], [1], [0, 0, 1, 1], [], []>} : vector<8x8xbf16>, vector<8x8xbf16>, vector<8x8xf32> -> vector<8x8xf32>
    %78 = vector.extract_strided_slice %35 {offsets = [0, 16], sizes = [8, 8], strides = [1, 1]} : vector<8x32xf32> to vector<8x8xf32>
    %79 = arith.truncf %78 : vector<8x8xf32> to vector<8x8xbf16>
    %80 = vector.extract_strided_slice %36 {offsets = [0, 16], sizes = [8, 8], strides = [1, 1]} : vector<8x32xf32> to vector<8x8xf32>
    %81 = arith.truncf %80 : vector<8x8xf32> to vector<8x8xbf16>
    %82 = vector.extract_strided_slice %37 {offsets = [0, 16], sizes = [8, 8], strides = [1, 1]} : vector<8x32xf32> to vector<8x8xf32>
    %83 = arith.truncf %82 : vector<8x8xf32> to vector<8x8xbf16>
    %cst_30 = arith.constant dense<0.000000e+00> : vector<8x8xf32>
    %84 = tpu.matmul %79, %81, %cst_30 {dimension_numbers = #tpu.dot_dimension_numbers<[1], [1], [0], [0], [0, 0, 1, 0], [], []>} : vector<8x8xbf16>, vector<8x8xbf16>, vector<8x8xf32> -> vector<8x8xf32>
    %85 = arith.addf %84, %5 : vector<8x8xf32>
    %cst_31 = arith.constant dense<0xFF800000> : vector<8xf32>
    %86 = vector.multi_reduction <maximumf>, %85, %cst_31 [1] : vector<8x8xf32> to vector<8xf32>
    %87 = vector.shape_cast %86 : vector<8xf32> to vector<8x1xf32>
    %88 = vector.broadcast %87 : vector<8x1xf32> to vector<8x8xf32>
    %89 = arith.subf %85, %88 : vector<8x8xf32>
    %90 = math.exp %89 : vector<8x8xf32>
    %cst_32 = arith.constant dense<0.000000e+00> : vector<8xf32>
    %91 = vector.multi_reduction <add>, %90, %cst_32 [1] : vector<8x8xf32> to vector<8xf32>
    %92 = vector.shape_cast %91 : vector<8xf32> to vector<8x1xf32>
    %93 = tpu.reciprocal %92 {approx = true} : vector<8x1xf32> -> vector<8x1xf32>
    %94 = vector.broadcast %93 : vector<8x1xf32> to vector<8x8xf32>
    %95 = arith.mulf %90, %94 : vector<8x8xf32>
    %96 = arith.truncf %95 : vector<8x8xf32> to vector<8x8xbf16>
    %cst_33 = arith.constant dense<0.000000e+00> : vector<8x8xf32>
    %97 = tpu.matmul %96, %83, %cst_33 {dimension_numbers = #tpu.dot_dimension_numbers<[1], [0], [0], [1], [0, 0, 1, 1], [], []>} : vector<8x8xbf16>, vector<8x8xbf16>, vector<8x8xf32> -> vector<8x8xf32>
    %98 = vector.extract_strided_slice %35 {offsets = [0, 24], sizes = [8, 8], strides = [1, 1]} : vector<8x32xf32> to vector<8x8xf32>
    %99 = arith.truncf %98 : vector<8x8xf32> to vector<8x8xbf16>
    %100 = vector.extract_strided_slice %36 {offsets = [0, 24], sizes = [8, 8], strides = [1, 1]} : vector<8x32xf32> to vector<8x8xf32>
    %101 = arith.truncf %100 : vector<8x8xf32> to vector<8x8xbf16>
    %102 = vector.extract_strided_slice %37 {offsets = [0, 24], sizes = [8, 8], strides = [1, 1]} : vector<8x32xf32> to vector<8x8xf32>
    %103 = arith.truncf %102 : vector<8x8xf32> to vector<8x8xbf16>
    %cst_34 = arith.constant dense<0.000000e+00> : vector<8x8xf32>
    %104 = tpu.matmul %99, %101, %cst_34 {dimension_numbers = #tpu.dot_dimension_numbers<[1], [1], [0], [0], [0, 0, 1, 0], [], []>} : vector<8x8xbf16>, vector<8x8xbf16>, vector<8x8xf32> -> vector<8x8xf32>
    %105 = arith.addf %104, %5 : vector<8x8xf32>
    %cst_35 = arith.constant dense<0xFF800000> : vector<8xf32>
    %106 = vector.multi_reduction <maximumf>, %105, %cst_35 [1] : vector<8x8xf32> to vector<8xf32>
    %107 = vector.shape_cast %106 : vector<8xf32> to vector<8x1xf32>
    %108 = vector.broadcast %107 : vector<8x1xf32> to vector<8x8xf32>
    %109 = arith.subf %105, %108 : vector<8x8xf32>
    %110 = math.exp %109 : vector<8x8xf32>
    %cst_36 = arith.constant dense<0.000000e+00> : vector<8xf32>
    %111 = vector.multi_reduction <add>, %110, %cst_36 [1] : vector<8x8xf32> to vector<8xf32>
    %112 = vector.shape_cast %111 : vector<8xf32> to vector<8x1xf32>
    %113 = tpu.reciprocal %112 {approx = true} : vector<8x1xf32> -> vector<8x1xf32>
    %114 = vector.broadcast %113 : vector<8x1xf32> to vector<8x8xf32>
    %115 = arith.mulf %110, %114 : vector<8x8xf32>
    %116 = arith.truncf %115 : vector<8x8xf32> to vector<8x8xbf16>
    %cst_37 = arith.constant dense<0.000000e+00> : vector<8x8xf32>
    %117 = tpu.matmul %116, %103, %cst_37 {dimension_numbers = #tpu.dot_dimension_numbers<[1], [0], [0], [1], [0, 0, 1, 1], [], []>} : vector<8x8xbf16>, vector<8x8xbf16>, vector<8x8xf32> -> vector<8x8xf32>
    %118 = tpu.concatenate %57, %77, %97, %117 in 1 : vector<8x8xf32>, vector<8x8xf32>, vector<8x8xf32>, vector<8x8xf32> -> vector<8x32xf32>
    %119 = arith.truncf %118 : vector<8x32xf32> to vector<8x32xbf16>
    %c0_38 = arith.constant 0 : index
    %c0_39 = arith.constant 0 : index
    %120 = vector.load %arg8[%c0_38, %c0_39] : memref<32x32xbf16, #tpu.memory_space<vmem>>, vector<32x32xbf16>
    %cst_40 = arith.constant dense<0.000000e+00> : vector<8x32xf32>
    %121 = tpu.matmul %119, %120, %cst_40 {dimension_numbers = #tpu.dot_dimension_numbers<[1], [0], [0], [1], [0, 0, 1, 1], [], []>} : vector<8x32xbf16>, vector<32x32xbf16>, vector<8x32xf32> -> vector<8x32xf32>
    %122 = arith.addf %1, %121 : vector<8x32xf32>
    %cst_41 = arith.constant dense<0.000000e+00> : vector<8xf32>
    %123 = vector.multi_reduction <add>, %122, %cst_41 [1] : vector<8x32xf32> to vector<8xf32>
    %124 = vector.shape_cast %123 : vector<8xf32> to vector<8x1xf32>
    %cst_42 = arith.constant 3.200000e+01 : f32
    %125 = vector.broadcast %cst_42 : f32 to vector<8x1xf32>
    %126 = arith.divf %124, %125 : vector<8x1xf32>
    %127 = vector.broadcast %126 : vector<8x1xf32> to vector<8x32xf32>
    %128 = arith.subf %122, %127 : vector<8x32xf32>
    %129 = arith.mulf %128, %128 : vector<8x32xf32>
    %cst_43 = arith.constant dense<0.000000e+00> : vector<8xf32>
    %130 = vector.multi_reduction <add>, %129, %cst_43 [1] : vector<8x32xf32> to vector<8xf32>
    %131 = vector.shape_cast %130 : vector<8xf32> to vector<8x1xf32>
    %cst_44 = arith.constant 3.200000e+01 : f32
    %132 = vector.broadcast %cst_44 : f32 to vector<8x1xf32>
    %133 = arith.divf %131, %132 : vector<8x1xf32>
    %134 = vector.broadcast %126 : vector<8x1xf32> to vector<8x32xf32>
    %135 = arith.subf %122, %134 : vector<8x32xf32>
    %cst_45 = arith.constant 9.99999974E-6 : f32
    %136 = vector.broadcast %cst_45 : f32 to vector<8x1xf32>
    %137 = arith.addf %133, %136 : vector<8x1xf32>
    %138 = math.rsqrt %137 : vector<8x1xf32>
    %139 = vector.broadcast %138 : vector<8x1xf32> to vector<8x32xf32>
    %140 = arith.mulf %135, %139 : vector<8x32xf32>
    %c0_46 = arith.constant 0 : index
    %c0_47 = arith.constant 0 : index
    %141 = vector.load %arg9[%c0_46, %c0_47] : memref<1x32xf32, #tpu.memory_space<vmem>>, vector<1x32xf32>
    %142 = vector.broadcast %141 : vector<1x32xf32> to vector<8x32xf32>
    %143 = arith.mulf %140, %142 : vector<8x32xf32>
    %c0_48 = arith.constant 0 : index
    %c0_49 = arith.constant 0 : index
    %144 = vector.load %arg10[%c0_48, %c0_49] : memref<1x32xf32, #tpu.memory_space<vmem>>, vector<1x32xf32>
    %145 = vector.broadcast %144 : vector<1x32xf32> to vector<8x32xf32>
    %146 = arith.addf %143, %145 : vector<8x32xf32>
    %147 = arith.truncf %146 : vector<8x32xf32> to vector<8x32xbf16>
    %c0_50 = arith.constant 0 : index
    %c0_51 = arith.constant 0 : index
    %148 = vector.load %arg11[%c0_50, %c0_51] : memref<32x32xbf16, #tpu.memory_space<vmem>>, vector<32x32xbf16>
    %cst_52 = arith.constant dense<0.000000e+00> : vector<8x32xf32>
    %149 = tpu.matmul %147, %148, %cst_52 {dimension_numbers = #tpu.dot_dimension_numbers<[1], [0], [0], [1], [0, 0, 1, 1], [], []>} : vector<8x32xbf16>, vector<32x32xbf16>, vector<8x32xf32> -> vector<8x32xf32>
    %150 = arith.truncf %3 : vector<8x32xf32> to vector<8x32xbf16>
    %c0_53 = arith.constant 0 : index
    %c0_54 = arith.constant 0 : index
    %151 = vector.load %arg12[%c0_53, %c0_54] : memref<32x64xbf16, #tpu.memory_space<vmem>>, vector<32x64xbf16>
    %cst_55 = arith.constant dense<0.000000e+00> : vector<8x64xf32>
    %152 = tpu.matmul %150, %151, %cst_55 {dimension_numbers = #tpu.dot_dimension_numbers<[1], [0], [0], [1], [0, 0, 1, 1], [], []>} : vector<8x32xbf16>, vector<32x64xbf16>, vector<8x64xf32> -> vector<8x64xf32>
    %153 = vector.extract_strided_slice %152 {offsets = [0, 0], sizes = [8, 32], strides = [1, 1]} : vector<8x64xf32> to vector<8x32xf32>
    %154 = vector.extract_strided_slice %152 {offsets = [0, 32], sizes = [8, 32], strides = [1, 1]} : vector<8x64xf32> to vector<8x32xf32>
    %155 = vector.extract_strided_slice %149 {offsets = [0, 0], sizes = [8, 8], strides = [1, 1]} : vector<8x32xf32> to vector<8x8xf32>
    %156 = arith.truncf %155 : vector<8x8xf32> to vector<8x8xbf16>
    %157 = vector.extract_strided_slice %153 {offsets = [0, 0], sizes = [8, 8], strides = [1, 1]} : vector<8x32xf32> to vector<8x8xf32>
    %158 = arith.truncf %157 : vector<8x8xf32> to vector<8x8xbf16>
    %159 = vector.extract_strided_slice %154 {offsets = [0, 0], sizes = [8, 8], strides = [1, 1]} : vector<8x32xf32> to vector<8x8xf32>
    %160 = arith.truncf %159 : vector<8x8xf32> to vector<8x8xbf16>
    %cst_56 = arith.constant dense<0.000000e+00> : vector<8x8xf32>
    %161 = tpu.matmul %156, %158, %cst_56 {dimension_numbers = #tpu.dot_dimension_numbers<[1], [1], [0], [0], [0, 0, 1, 0], [], []>} : vector<8x8xbf16>, vector<8x8xbf16>, vector<8x8xf32> -> vector<8x8xf32>
    %162 = arith.addf %161, %7 : vector<8x8xf32>
    %cst_57 = arith.constant dense<0xFF800000> : vector<8xf32>
    %163 = vector.multi_reduction <maximumf>, %162, %cst_57 [1] : vector<8x8xf32> to vector<8xf32>
    %164 = vector.shape_cast %163 : vector<8xf32> to vector<8x1xf32>
    %165 = vector.broadcast %164 : vector<8x1xf32> to vector<8x8xf32>
    %166 = arith.subf %162, %165 : vector<8x8xf32>
    %167 = math.exp %166 : vector<8x8xf32>
    %cst_58 = arith.constant dense<0.000000e+00> : vector<8xf32>
    %168 = vector.multi_reduction <add>, %167, %cst_58 [1] : vector<8x8xf32> to vector<8xf32>
    %169 = vector.shape_cast %168 : vector<8xf32> to vector<8x1xf32>
    %170 = tpu.reciprocal %169 {approx = true} : vector<8x1xf32> -> vector<8x1xf32>
    %171 = vector.broadcast %170 : vector<8x1xf32> to vector<8x8xf32>
    %172 = arith.mulf %167, %171 : vector<8x8xf32>
    %173 = arith.truncf %172 : vector<8x8xf32> to vector<8x8xbf16>
    %cst_59 = arith.constant dense<0.000000e+00> : vector<8x8xf32>
    %174 = tpu.matmul %173, %160, %cst_59 {dimension_numbers = #tpu.dot_dimension_numbers<[1], [0], [0], [1], [0, 0, 1, 1], [], []>} : vector<8x8xbf16>, vector<8x8xbf16>, vector<8x8xf32> -> vector<8x8xf32>
    %175 = vector.extract_strided_slice %149 {offsets = [0, 8], sizes = [8, 8], strides = [1, 1]} : vector<8x32xf32> to vector<8x8xf32>
    %176 = arith.truncf %175 : vector<8x8xf32> to vector<8x8xbf16>
    %177 = vector.extract_strided_slice %153 {offsets = [0, 8], sizes = [8, 8], strides = [1, 1]} : vector<8x32xf32> to vector<8x8xf32>
    %178 = arith.truncf %177 : vector<8x8xf32> to vector<8x8xbf16>
    %179 = vector.extract_strided_slice %154 {offsets = [0, 8], sizes = [8, 8], strides = [1, 1]} : vector<8x32xf32> to vector<8x8xf32>
    %180 = arith.truncf %179 : vector<8x8xf32> to vector<8x8xbf16>
    %cst_60 = arith.constant dense<0.000000e+00> : vector<8x8xf32>
    %181 = tpu.matmul %176, %178, %cst_60 {dimension_numbers = #tpu.dot_dimension_numbers<[1], [1], [0], [0], [0, 0, 1, 0], [], []>} : vector<8x8xbf16>, vector<8x8xbf16>, vector<8x8xf32> -> vector<8x8xf32>
    %182 = arith.addf %181, %7 : vector<8x8xf32>
    %cst_61 = arith.constant dense<0xFF800000> : vector<8xf32>
    %183 = vector.multi_reduction <maximumf>, %182, %cst_61 [1] : vector<8x8xf32> to vector<8xf32>
    %184 = vector.shape_cast %183 : vector<8xf32> to vector<8x1xf32>
    %185 = vector.broadcast %184 : vector<8x1xf32> to vector<8x8xf32>
    %186 = arith.subf %182, %185 : vector<8x8xf32>
    %187 = math.exp %186 : vector<8x8xf32>
    %cst_62 = arith.constant dense<0.000000e+00> : vector<8xf32>
    %188 = vector.multi_reduction <add>, %187, %cst_62 [1] : vector<8x8xf32> to vector<8xf32>
    %189 = vector.shape_cast %188 : vector<8xf32> to vector<8x1xf32>
    %190 = tpu.reciprocal %189 {approx = true} : vector<8x1xf32> -> vector<8x1xf32>
    %191 = vector.broadcast %190 : vector<8x1xf32> to vector<8x8xf32>
    %192 = arith.mulf %187, %191 : vector<8x8xf32>
    %193 = arith.truncf %192 : vector<8x8xf32> to vector<8x8xbf16>
    %cst_63 = arith.constant dense<0.000000e+00> : vector<8x8xf32>
    %194 = tpu.matmul %193, %180, %cst_63 {dimension_numbers = #tpu.dot_dimension_numbers<[1], [0], [0], [1], [0, 0, 1, 1], [], []>} : vector<8x8xbf16>, vector<8x8xbf16>, vector<8x8xf32> -> vector<8x8xf32>
    %195 = arith.addf %172, %192 : vector<8x8xf32>
    %196 = vector.extract_strided_slice %149 {offsets = [0, 16], sizes = [8, 8], strides = [1, 1]} : vector<8x32xf32> to vector<8x8xf32>
    %197 = arith.truncf %196 : vector<8x8xf32> to vector<8x8xbf16>
    %198 = vector.extract_strided_slice %153 {offsets = [0, 16], sizes = [8, 8], strides = [1, 1]} : vector<8x32xf32> to vector<8x8xf32>
    %199 = arith.truncf %198 : vector<8x8xf32> to vector<8x8xbf16>
    %200 = vector.extract_strided_slice %154 {offsets = [0, 16], sizes = [8, 8], strides = [1, 1]} : vector<8x32xf32> to vector<8x8xf32>
    %201 = arith.truncf %200 : vector<8x8xf32> to vector<8x8xbf16>
    %cst_64 = arith.constant dense<0.000000e+00> : vector<8x8xf32>
    %202 = tpu.matmul %197, %199, %cst_64 {dimension_numbers = #tpu.dot_dimension_numbers<[1], [1], [0], [0], [0, 0, 1, 0], [], []>} : vector<8x8xbf16>, vector<8x8xbf16>, vector<8x8xf32> -> vector<8x8xf32>
    %203 = arith.addf %202, %7 : vector<8x8xf32>
    %cst_65 = arith.constant dense<0xFF800000> : vector<8xf32>
    %204 = vector.multi_reduction <maximumf>, %203, %cst_65 [1] : vector<8x8xf32> to vector<8xf32>
    %205 = vector.shape_cast %204 : vector<8xf32> to vector<8x1xf32>
    %206 = vector.broadcast %205 : vector<8x1xf32> to vector<8x8xf32>
    %207 = arith.subf %203, %206 : vector<8x8xf32>
    %208 = math.exp %207 : vector<8x8xf32>
    %cst_66 = arith.constant dense<0.000000e+00> : vector<8xf32>
    %209 = vector.multi_reduction <add>, %208, %cst_66 [1] : vector<8x8xf32> to vector<8xf32>
    %210 = vector.shape_cast %209 : vector<8xf32> to vector<8x1xf32>
    %211 = tpu.reciprocal %210 {approx = true} : vector<8x1xf32> -> vector<8x1xf32>
    %212 = vector.broadcast %211 : vector<8x1xf32> to vector<8x8xf32>
    %213 = arith.mulf %208, %212 : vector<8x8xf32>
    %214 = arith.truncf %213 : vector<8x8xf32> to vector<8x8xbf16>
    %cst_67 = arith.constant dense<0.000000e+00> : vector<8x8xf32>
    %215 = tpu.matmul %214, %201, %cst_67 {dimension_numbers = #tpu.dot_dimension_numbers<[1], [0], [0], [1], [0, 0, 1, 1], [], []>} : vector<8x8xbf16>, vector<8x8xbf16>, vector<8x8xf32> -> vector<8x8xf32>
    %216 = arith.addf %195, %213 : vector<8x8xf32>
    %217 = vector.extract_strided_slice %149 {offsets = [0, 24], sizes = [8, 8], strides = [1, 1]} : vector<8x32xf32> to vector<8x8xf32>
    %218 = arith.truncf %217 : vector<8x8xf32> to vector<8x8xbf16>
    %219 = vector.extract_strided_slice %153 {offsets = [0, 24], sizes = [8, 8], strides = [1, 1]} : vector<8x32xf32> to vector<8x8xf32>
    %220 = arith.truncf %219 : vector<8x8xf32> to vector<8x8xbf16>
    %221 = vector.extract_strided_slice %154 {offsets = [0, 24], sizes = [8, 8], strides = [1, 1]} : vector<8x32xf32> to vector<8x8xf32>
    %222 = arith.truncf %221 : vector<8x8xf32> to vector<8x8xbf16>
    %cst_68 = arith.constant dense<0.000000e+00> : vector<8x8xf32>
    %223 = tpu.matmul %218, %220, %cst_68 {dimension_numbers = #tpu.dot_dimension_numbers<[1], [1], [0], [0], [0, 0, 1, 0], [], []>} : vector<8x8xbf16>, vector<8x8xbf16>, vector<8x8xf32> -> vector<8x8xf32>
    %224 = arith.addf %223, %7 : vector<8x8xf32>
    %cst_69 = arith.constant dense<0xFF800000> : vector<8xf32>
    %225 = vector.multi_reduction <maximumf>, %224, %cst_69 [1] : vector<8x8xf32> to vector<8xf32>
    %226 = vector.shape_cast %225 : vector<8xf32> to vector<8x1xf32>
    %227 = vector.broadcast %226 : vector<8x1xf32> to vector<8x8xf32>
    %228 = arith.subf %224, %227 : vector<8x8xf32>
    %229 = math.exp %228 : vector<8x8xf32>
    %cst_70 = arith.constant dense<0.000000e+00> : vector<8xf32>
    %230 = vector.multi_reduction <add>, %229, %cst_70 [1] : vector<8x8xf32> to vector<8xf32>
    %231 = vector.shape_cast %230 : vector<8xf32> to vector<8x1xf32>
    %232 = tpu.reciprocal %231 {approx = true} : vector<8x1xf32> -> vector<8x1xf32>
    %233 = vector.broadcast %232 : vector<8x1xf32> to vector<8x8xf32>
    %234 = arith.mulf %229, %233 : vector<8x8xf32>
    %235 = arith.truncf %234 : vector<8x8xf32> to vector<8x8xbf16>
    %cst_71 = arith.constant dense<0.000000e+00> : vector<8x8xf32>
    %236 = tpu.matmul %235, %222, %cst_71 {dimension_numbers = #tpu.dot_dimension_numbers<[1], [0], [0], [1], [0, 0, 1, 1], [], []>} : vector<8x8xbf16>, vector<8x8xbf16>, vector<8x8xf32> -> vector<8x8xf32>
    %237 = arith.addf %216, %234 : vector<8x8xf32>
    %238 = tpu.concatenate %174, %194, %215, %236 in 1 : vector<8x8xf32>, vector<8x8xf32>, vector<8x8xf32>, vector<8x8xf32> -> vector<8x32xf32>
    %239 = arith.truncf %238 : vector<8x32xf32> to vector<8x32xbf16>
    %c0_72 = arith.constant 0 : index
    %c0_73 = arith.constant 0 : index
    %240 = vector.load %arg13[%c0_72, %c0_73] : memref<32x32xbf16, #tpu.memory_space<vmem>>, vector<32x32xbf16>
    %cst_74 = arith.constant dense<0.000000e+00> : vector<8x32xf32>
    %241 = tpu.matmul %239, %240, %cst_74 {dimension_numbers = #tpu.dot_dimension_numbers<[1], [0], [0], [1], [0, 0, 1, 1], [], []>} : vector<8x32xbf16>, vector<32x32xbf16>, vector<8x32xf32> -> vector<8x32xf32>
    %242 = arith.addf %122, %241 : vector<8x32xf32>
    %cst_75 = arith.constant 2.500000e-01 : f32
    %243 = vector.broadcast %cst_75 : f32 to vector<8x8xf32>
    %244 = arith.mulf %237, %243 : vector<8x8xf32>
    %c0_76 = arith.constant 0 : index
    %c0_77 = arith.constant 0 : index
    %c0_78 = arith.constant 0 : index
    %245 = vector.load %arg23[%c0_76, %c0_77, %c0_78] : memref<1x8x8xf32, #tpu.memory_space<vmem>>, vector<1x8x8xf32>
    %246 = vector.shape_cast %245 : vector<1x8x8xf32> to vector<8x8xf32>
    %247 = vector.shape_cast %244 : vector<8x8xf32> to vector<1x8x8xf32>
    tpu.vector_store %arg23[%c0_76, %c0_77, %c0_78], %247 {strides = array<i32>} : memref<1x8x8xf32, #tpu.memory_space<vmem>>, vector<1x8x8xf32>,
    %cst_79 = arith.constant dense<0.000000e+00> : vector<8xf32>
    %248 = vector.multi_reduction <add>, %242, %cst_79 [1] : vector<8x32xf32> to vector<8xf32>
    %249 = vector.shape_cast %248 : vector<8xf32> to vector<8x1xf32>
    %cst_80 = arith.constant 3.200000e+01 : f32
    %250 = vector.broadcast %cst_80 : f32 to vector<8x1xf32>
    %251 = arith.divf %249, %250 : vector<8x1xf32>
    %252 = vector.broadcast %251 : vector<8x1xf32> to vector<8x32xf32>
    %253 = arith.subf %242, %252 : vector<8x32xf32>
    %254 = arith.mulf %253, %253 : vector<8x32xf32>
    %cst_81 = arith.constant dense<0.000000e+00> : vector<8xf32>
    %255 = vector.multi_reduction <add>, %254, %cst_81 [1] : vector<8x32xf32> to vector<8xf32>
    %256 = vector.shape_cast %255 : vector<8xf32> to vector<8x1xf32>
    %cst_82 = arith.constant 3.200000e+01 : f32
    %257 = vector.broadcast %cst_82 : f32 to vector<8x1xf32>
    %258 = arith.divf %256, %257 : vector<8x1xf32>
    %259 = vector.broadcast %251 : vector<8x1xf32> to vector<8x32xf32>
    %260 = arith.subf %242, %259 : vector<8x32xf32>
    %cst_83 = arith.constant 9.99999974E-6 : f32
    %261 = vector.broadcast %cst_83 : f32 to vector<8x1xf32>
    %262 = arith.addf %258, %261 : vector<8x1xf32>
    %263 = math.rsqrt %262 : vector<8x1xf32>
    %264 = vector.broadcast %263 : vector<8x1xf32> to vector<8x32xf32>
    %265 = arith.mulf %260, %264 : vector<8x32xf32>
    %c0_84 = arith.constant 0 : index
    %c0_85 = arith.constant 0 : index
    %266 = vector.load %arg14[%c0_84, %c0_85] : memref<1x32xf32, #tpu.memory_space<vmem>>, vector<1x32xf32>
    %267 = vector.broadcast %266 : vector<1x32xf32> to vector<8x32xf32>
    %268 = arith.mulf %265, %267 : vector<8x32xf32>
    %c0_86 = arith.constant 0 : index
    %c0_87 = arith.constant 0 : index
    %269 = vector.load %arg15[%c0_86, %c0_87] : memref<1x32xf32, #tpu.memory_space<vmem>>, vector<1x32xf32>
    %270 = vector.broadcast %269 : vector<1x32xf32> to vector<8x32xf32>
    %271 = arith.addf %268, %270 : vector<8x32xf32>
    %272 = arith.truncf %271 : vector<8x32xf32> to vector<8x32xbf16>
    %c0_88 = arith.constant 0 : index
    %c0_89 = arith.constant 0 : index
    %273 = vector.load %arg16[%c0_88, %c0_89] : memref<32x64xbf16, #tpu.memory_space<vmem>>, vector<32x64xbf16>
    %cst_90 = arith.constant dense<0.000000e+00> : vector<8x64xf32>
    %274 = tpu.matmul %272, %273, %cst_90 {dimension_numbers = #tpu.dot_dimension_numbers<[1], [0], [0], [1], [0, 0, 1, 1], [], []>} : vector<8x32xbf16>, vector<32x64xbf16>, vector<8x64xf32> -> vector<8x64xf32>
    %c0_91 = arith.constant 0 : index
    %c0_92 = arith.constant 0 : index
    %275 = vector.load %arg17[%c0_91, %c0_92] : memref<1x64xf32, #tpu.memory_space<vmem>>, vector<1x64xf32>
    %276 = vector.broadcast %275 : vector<1x64xf32> to vector<8x64xf32>
    %277 = arith.addf %274, %276 : vector<8x64xf32>
    %cst_93 = arith.constant 0.000000e+00 : f32
    %278 = vector.broadcast %cst_93 : f32 to vector<8x64xf32>
    %279 = arith.maximumf %277, %278 : vector<8x64xf32>
    %280 = arith.truncf %279 : vector<8x64xf32> to vector<8x64xbf16>
    %c0_94 = arith.constant 0 : index
    %c0_95 = arith.constant 0 : index
    %281 = vector.load %arg18[%c0_94, %c0_95] : memref<64x32xbf16, #tpu.memory_space<vmem>>, vector<64x32xbf16>
    %cst_96 = arith.constant dense<0.000000e+00> : vector<8x32xf32>
    %282 = tpu.matmul %280, %281, %cst_96 {dimension_numbers = #tpu.dot_dimension_numbers<[1], [0], [0], [1], [0, 0, 1, 1], [], []>} : vector<8x64xbf16>, vector<64x32xbf16>, vector<8x32xf32> -> vector<8x32xf32>
    %c0_97 = arith.constant 0 : index
    %c0_98 = arith.constant 0 : index
    %283 = vector.load %arg19[%c0_97, %c0_98] : memref<1x32xf32, #tpu.memory_space<vmem>>, vector<1x32xf32>
    %284 = vector.broadcast %283 : vector<1x32xf32> to vector<8x32xf32>
    %285 = arith.addf %282, %284 : vector<8x32xf32>
    %286 = arith.addf %242, %285 : vector<8x32xf32>
    %cst_99 = arith.constant dense<0.000000e+00> : vector<8xf32>
    %287 = vector.multi_reduction <add>, %286, %cst_99 [1] : vector<8x32xf32> to vector<8xf32>
    %288 = vector.shape_cast %287 : vector<8xf32> to vector<8x1xf32>
    %cst_100 = arith.constant 3.200000e+01 : f32
    %289 = vector.broadcast %cst_100 : f32 to vector<8x1xf32>
    %290 = arith.divf %288, %289 : vector<8x1xf32>
    %291 = vector.broadcast %290 : vector<8x1xf32> to vector<8x32xf32>
    %292 = arith.subf %286, %291 : vector<8x32xf32>
    %293 = arith.mulf %292, %292 : vector<8x32xf32>
    %cst_101 = arith.constant dense<0.000000e+00> : vector<8xf32>
    %294 = vector.multi_reduction <add>, %293, %cst_101 [1] : vector<8x32xf32> to vector<8xf32>
    %295 = vector.shape_cast %294 : vector<8xf32> to vector<8x1xf32>
    %cst_102 = arith.constant 3.200000e+01 : f32
    %296 = vector.broadcast %cst_102 : f32 to vector<8x1xf32>
    %297 = arith.divf %295, %296 : vector<8x1xf32>
    %298 = vector.broadcast %290 : vector<8x1xf32> to vector<8x32xf32>
    %299 = arith.subf %286, %298 : vector<8x32xf32>
    %cst_103 = arith.constant 9.99999974E-6 : f32
    %300 = vector.broadcast %cst_103 : f32 to vector<8x1xf32>
    %301 = arith.addf %297, %300 : vector<8x1xf32>
    %302 = math.rsqrt %301 : vector<8x1xf32>
    %303 = vector.broadcast %302 : vector<8x1xf32> to vector<8x32xf32>
    %304 = arith.mulf %299, %303 : vector<8x32xf32>
    %c0_104 = arith.constant 0 : index
    %c0_105 = arith.constant 0 : index
    %305 = vector.load %arg20[%c0_104, %c0_105] : memref<1x32xf32, #tpu.memory_space<vmem>>, vector<1x32xf32>
    %306 = vector.broadcast %305 : vector<1x32xf32> to vector<8x32xf32>
    %307 = arith.mulf %304, %306 : vector<8x32xf32>
    %c0_106 = arith.constant 0 : index
    %c0_107 = arith.constant 0 : index
    %308 = vector.load %arg21[%c0_106, %c0_107] : memref<1x32xf32, #tpu.memory_space<vmem>>, vector<1x32xf32>
    %309 = vector.broadcast %308 : vector<1x32xf32> to vector<8x32xf32>
    %310 = arith.addf %307, %309 : vector<8x32xf32>
    %c0_108 = arith.constant 0 : index
    %c0_109 = arith.constant 0 : index
    %c0_110 = arith.constant 0 : index
    %311 = vector.load %arg22[%c0_108, %c0_109, %c0_110] : memref<1x8x32xf32, #tpu.memory_space<vmem>>, vector<1x8x32xf32>
    %312 = vector.shape_cast %311 : vector<1x8x32xf32> to vector<8x32xf32>
    %313 = vector.shape_cast %310 : vector<8x32xf32> to vector<1x8x32xf32>
    tpu.vector_store %arg22[%c0_108, %c0_109, %c0_110], %313 {strides = array<i32>} : memref<1x8x32xf32, #tpu.memory_space<vmem>>, vector<1x8x32xf32>,
    return
  }
  func.func @transform_0(%arg0: i32) -> (i32, i32, i32) {
    %c0_i32 = arith.constant 0 : i32
    %c0_i32_0 = arith.constant 0 : i32
    %c0_i32_1 = arith.constant 0 : i32
    return %arg0, %c0_i32, %c0_i32_0 : i32, i32, i32
  }
  func.func @transform_1(%arg0: i32) -> (i32, i32, i32) {
    %c0_i32 = arith.constant 0 : i32
    %c0_i32_0 = arith.constant 0 : i32
    %c0_i32_1 = arith.constant 0 : i32
    return %arg0, %c0_i32, %c0_i32_0 : i32, i32, i32
  }
  func.func @transform_2(%arg0: i32) -> (i32, i32, i32) {
    %c0_i32 = arith.constant 0 : i32
    %c0_i32_0 = arith.constant 0 : i32
    %c0_i32_1 = arith.constant 0 : i32
    return %arg0, %c0_i32, %c0_i32_0 : i32, i32, i32
  }
  func.func @transform_3(%arg0: i32) -> (i32, i32, i32) {
    %c0_i32 = arith.constant 0 : i32
    %c0_i32_0 = arith.constant 0 : i32
    %c0_i32_1 = arith.constant 0 : i32
    return %arg0, %c0_i32, %c0_i32_0 : i32, i32, i32
  }
  func.func @transform_4(%arg0: i32) -> (i32, i32) {
    %c0_i32 = arith.constant 0 : i32
    %c0_i32_0 = arith.constant 0 : i32
    %c0_i32_1 = arith.constant 0 : i32
    return %c0_i32, %c0_i32_0 : i32, i32
  }
  func.func @transform_5(%arg0: i32) -> (i32, i32) {
    %c0_i32 = arith.constant 0 : i32
    %c0_i32_0 = arith.constant 0 : i32
    %c0_i32_1 = arith.constant 0 : i32
    return %c0_i32, %c0_i32_0 : i32, i32
  }
  func.func @transform_6(%arg0: i32) -> (i32, i32) {
    %c0_i32 = arith.constant 0 : i32
    %c0_i32_0 = arith.constant 0 : i32
    %c0_i32_1 = arith.constant 0 : i32
    return %c0_i32, %c0_i32_0 : i32, i32
  }
  func.func @transform_7(%arg0: i32) -> (i32, i32) {
    %c0_i32 = arith.constant 0 : i32
    %c0_i32_0 = arith.constant 0 : i32
    %c0_i32_1 = arith.constant 0 : i32
    return %c0_i32, %c0_i32_0 : i32, i32
  }
  func.func @transform_8(%arg0: i32) -> (i32, i32) {
    %c0_i32 = arith.constant 0 : i32
    %c0_i32_0 = arith.constant 0 : i32
    %c0_i32_1 = arith.constant 0 : i32
    return %c0_i32, %c0_i32_0 : i32, i32
  }
  func.func @transform_9(%arg0: i32) -> (i32, i32) {
    %c0_i32 = arith.constant 0 : i32
    %c0_i32_0 = arith.constant 0 : i32
    %c0_i32_1 = arith.constant 0 : i32
    return %c0_i32, %c0_i32_0 : i32, i32
  }
  func.func @transform_10(%arg0: i32) -> (i32, i32) {
    %c0_i32 = arith.constant 0 : i32
    %c0_i32_0 = arith.constant 0 : i32
    %c0_i32_1 = arith.constant 0 : i32
    return %c0_i32, %c0_i32_0 : i32, i32
  }
  func.func @transform_11(%arg0: i32) -> (i32, i32) {
    %c0_i32 = arith.constant 0 : i32
    %c0_i32_0 = arith.constant 0 : i32
    %c0_i32_1 = arith.constant 0 : i32
    return %c0_i32, %c0_i32_0 : i32, i32
  }
  func.func @transform_12(%arg0: i32) -> (i32, i32) {
    %c0_i32 = arith.constant 0 : i32
    %c0_i32_0 = arith.constant 0 : i32
    %c0_i32_1 = arith.constant 0 : i32
    return %c0_i32, %c0_i32_0 : i32, i32
  }
  func.func @transform_13(%arg0: i32) -> (i32, i32) {
    %c0_i32 = arith.constant 0 : i32
    %c0_i32_0 = arith.constant 0 : i32
    %c0_i32_1 = arith.constant 0 : i32
    return %c0_i32, %c0_i32_0 : i32, i32
  }
  func.func @transform_14(%arg0: i32) -> (i32, i32) {
    %c0_i32 = arith.constant 0 : i32
    %c0_i32_0 = arith.constant 0 : i32
    %c0_i32_1 = arith.constant 0 : i32
    return %c0_i32, %c0_i32_0 : i32, i32
  }
  func.func @transform_15(%arg0: i32) -> (i32, i32) {
    %c0_i32 = arith.constant 0 : i32
    %c0_i32_0 = arith.constant 0 : i32
    %c0_i32_1 = arith.constant 0 : i32
    return %c0_i32, %c0_i32_0 : i32, i32
  }
  func.func @transform_16(%arg0: i32) -> (i32, i32) {
    %c0_i32 = arith.constant 0 : i32
    %c0_i32_0 = arith.constant 0 : i32
    %c0_i32_1 = arith.constant 0 : i32
    return %c0_i32, %c0_i32_0 : i32, i32
  }
  func.func @transform_17(%arg0: i32) -> (i32, i32) {
    %c0_i32 = arith.constant 0 : i32
    %c0_i32_0 = arith.constant 0 : i32
    %c0_i32_1 = arith.constant 0 : i32
    return %c0_i32, %c0_i32_0 : i32, i32
  }
  func.func @transform_18(%arg0: i32) -> (i32, i32) {
    %c0_i32 = arith.constant 0 : i32
    %c0_i32_0 = arith.constant 0 : i32
    %c0_i32_1 = arith.constant 0 : i32
    return %c0_i32, %c0_i32_0 : i32, i32
  }
  func.func @transform_19(%arg0: i32) -> (i32, i32) {
    %c0_i32 = arith.constant 0 : i32
    %c0_i32_0 = arith.constant 0 : i32
    %c0_i32_1 = arith.constant 0 : i32
    return %c0_i32, %c0_i32_0 : i32, i32
  }
  func.func @transform_20(%arg0: i32) -> (i32, i32) {
    %c0_i32 = arith.constant 0 : i32
    %c0_i32_0 = arith.constant 0 : i32
    %c0_i32_1 = arith.constant 0 : i32
    return %c0_i32, %c0_i32_0 : i32, i32
  }
  func.func @transform_21(%arg0: i32) -> (i32, i32, i32) {
    %c0_i32 = arith.constant 0 : i32
    %c0_i32_0 = arith.constant 0 : i32
    %c0_i32_1 = arith.constant 0 : i32
    return %arg0, %c0_i32, %c0_i32_0 : i32, i32, i32
  }
  func.func @transform_22(%arg0: i32) -> (i32, i32, i32) {
    %c0_i32 = arith.constant 0 : i32
    %c0_i32_0 = arith.constant 0 : i32
    %c0_i32_1 = arith.constant 0 : i32
    return %arg0, %c0_i32, %c0_i32_0 : i32, i32, i32
  }
}

</mosaic_0001>

<bundles_post_ra>
// kernel: transformer_decoder_forward.3
= control target key start
LH: loop header
LB: loop body
LE: loop exit
PB: predicated region body
PF: predicated region fallthrough
CT: control target
= control target key end

     0   :  { %s3367_s0 = inlined_call_operand.vmem [shape: f32[2,8,32], index: 0, kind: input, shape index: {}]   ;;  %s3368_s1 = inlined_call_operand.vmem [shape: f32[2,8,32], index: 1, kind: input, shape index: {}]   ;;  %s3369_s2 = inlined_call_operand.vmem [shape: f32[2,8,8], index: 2, kind: input, shape index: {}]   ;;  %s3370_s3 = inlined_call_operand.vmem [shape: f32[2,8,8], index: 3, kind: input, shape index: {}]   ;;  %s3371_s4 = inlined_call_operand.vmem [shape: f32[1,32], index: 4, kind: input, shape index: {}]   ;;  %s3372_s5 = inlined_call_operand.vmem [shape: f32[1,32], index: 5, kind: input, shape index: {}]   ;;  %s3373_s6 = inlined_call_operand.vmem [shape: bf16[32,96], index: 6, kind: input, shape index: {}]   ;;  %s3374_s7 = inlined_call_operand.vmem [shape: bf16[32,32], index: 7, kind: input, shape index: {}]   ;;  %s3375_s8 = inlined_call_operand.vmem [shape: f32[1,32], index: 8, kind: input, shape index: {}]   ;;  %s3376_s9 = inlined_call_operand.vmem [shape: f32[1,32], index: 9, kind: input, shape index: {}]   ;;  %s3377_s10 = inlined_call_operand.vmem [shape: bf16[32,32], index: 10, kind: input, shape index: {}]   ;;  %s3378_s11 = inlined_call_operand.vmem [shape: bf16[32,64], index: 11, kind: input, shape index: {}]   ;;  %s3379_s12 = inlined_call_operand.vmem [shape: bf16[32,32], index: 12, kind: input, shape index: {}]   ;;  %s3380_s13 = inlined_call_operand.vmem [shape: f32[1,32], index: 13, kind: input, shape index: {}]   ;;  %s3381_s14 = inlined_call_operand.vmem [shape: f32[1,32], index: 14, kind: input, shape index: {}]   ;;  %s3382_s15 = inlined_call_operand.vmem [shape: bf16[32,64], index: 15, kind: input, shape index: {}]   ;;  %s3383_s16 = inlined_call_operand.vmem [shape: f32[1,64], index: 16, kind: input, shape index: {}]   ;;  %s3384_s17 = inlined_call_operand.vmem [shape: bf16[64,32], index: 17, kind: input, shape index: {}]   ;;  %s3385_s18 = inlined_call_operand.vmem [shape: f32[1,32], index: 18, kind: input, shape index: {}]   ;;  %s3386_s19 = inlined_call_operand.vmem [shape: f32[1,32], index: 19, kind: input, shape index: {}]   ;;  %s3387_s20 = inlined_call_operand.vmem [shape: f32[1,32], index: 20, kind: input, shape index: {}]   ;;  %s3388_s21 = inlined_call_operand.vmem [shape: f32[2,8,32], index: 21, kind: output, shape index: {0}]   ;;  %s3389_s22 = inlined_call_operand.hbm [shape: f32[2,8,8], index: 22, kind: output, shape index: {1}]  }
   0x1   :  { %3409 = sst [smem:[#allocation8_spill]] %s3367_s0 }
   0x2   :  { %3410 = sst [smem:[#allocation9_spill]] %s3368_s1 }
   0x3   :  { %3411 = sst [smem:[#allocation10_spill]] %s3369_s2 }
   0x4   :  { %3412 = sst [smem:[#allocation11_spill]] %s3370_s3 }
   0x5   :  { %3413 = sst [smem:[#allocation12_spill]] %s3371_s4 }
   0x6   :  { %3414 = sst [smem:[#allocation13_spill]] %s3372_s5 }
   0x7   :  { %3415 = sst [smem:[#allocation14_spill]] %s3373_s6 }
   0x8   :  { %3416 = sst [smem:[#allocation15_spill]] %s3374_s7 }
   0x9   :  { %3417 = sst [smem:[#allocation16_spill]] %s3375_s8 }
   0xa   :  { %3418 = sst [smem:[#allocation17_spill]] %s3376_s9 }
   0xb   :  { %3419 = sst [smem:[#allocation18_spill]] %s3377_s10 }
   0xc   :  { %3420 = sst [smem:[#allocation19_spill]] %s3378_s11 }
   0xd   :  { %3421 = sst [smem:[#allocation20_spill]] %s3379_s12 }
   0xe   :  { %28 = vsyncpa [#allocation3], 0 }
   0xf   :  { %30 = vsyncpa [#allocation3 + $0x1], 0  ;;  %s2960_s3 = smov 0   ;;  %s2962_s28 = smov 0  }
  0x10   :  { %s2964_s29 = smov 0   ;;  %s2966_s30 = smov 0  }
  0x11 LB: > { %3422 = sst [smem:[#allocation5_spill]] %s2822_s29  ;;  %s2981_s4 = sadd.s32 4294967295, %s2826_s30   ;;  %s2826_s30 = sphi %s2966_s30, %s3453_s30   ;;  %s2822_s29 = sphi %s2964_s29, %s3455_s29   ;;  %s2818_s28 = sphi %s2962_s28, %s3457_s28   ;;  %s2814_s3 = sphi %s2960_s3, %s3456_s3  }
  0x12   : > { %s2379_s0 = sadd.s32 4294967294, %s2826_s30   ;;  %s2985_s23 = sadd.s32 1, %s2826_s30  }
  0x13   : > { %3423 = sst [smem:[#allocation6_spill]] %s2985_s23  ;;  %s530_s1 = sadd.s32 1, %s2822_s29 }
  0x14   : > { %s527_s5 = ssub.s32 %s2826_s30, %s2985_s23  ;;  %p540_p0 = scmp.ne.s32.totalorder %s2822_s29, %s2818_s28 }
  0x15   : > { %p528_p1 = scmp.eq.s32.totalorder %s527_s5, 0  ;;  %p541_p2 = scmp.eq.s32.totalorder %s2981_s4, 1 }
  0x16   : > { %p546_p3 = scmp.ne.s32.totalorder %s2818_s28, %s2814_s3  ;;  %p547_p4 = scmp.eq.s32.totalorder %s2379_s0, 1 }
  0x17   : > { %s2996_s24 = scalar_select %p528_p1, %s2822_s29, %s530_s1  }
  0x18   : > { %p2998_p5 = por %p541_p2, %p540_p0  ;;  %p3002_p6 = por %p547_p4, %p546_p3 }
  0x19   : > { %3424 = sst [smem:[#allocation7_spill]] %s2996_s24  ;;  %p2382_p7 = scmp.ge.s32.totalorder %s2826_s30, 1 }
  0x1a   : > { %p644_p8 = scmp.lt.s32.totalorder %s2826_s30, 3 }
  0x1c   : > { %p645_p9 = pnand %p2382_p7, %p644_p8 }
  0x1d   : > { %p721_p10 = scmp.lt.s32.totalorder (!%p645_p9), %s2981_s4, 1  ;;  %vm746_vm0 = vcmask (!%p645_p9), 261120   ;;  %s3427_s1 = sld [smem:[#allocation8_spill]] (!%p645_p9)  ;;  %v2828_v8 = vmov (!%p645_p9), 0.0   ;;  %vm2829_vm1 = vmmov (!%p645_p9), 0   ;;  %vm841_vm2 = vcmask (!%p645_p9), 64512  }
  0x1e   : > { %648 = sbr.rel (%p645_p9) target bundleno = 4664 (0x1238), region = 104  ;;  %s3428_s29 = sld [smem:[#allocation14_spill]] (!%p645_p9)  ;;  %2497 = vmatprep.subr.bf16.mxu1 (!%p645_p9), %v2828_v8  ;;  %2501 = vmatprep.mubr.msk.bf16.mxu1 (!%p645_p9), %vm2829_vm1, %v2828_v8  ;;  %vm905_vm3 = vcmask (!%p645_p9), 1043456   ;;  %vm1292_vm4 = vcmask (!%p645_p9), 130048   ;;  %vm1294_vm5 = vcmask (!%p645_p9), 195584   ;;  %vm2164_vm6 = vcmask (!%p645_p9), 523264  }
  0x1f   : > { %2511 = vmatprep.subr.bf16.mxu0 (!%p645_p9), %v2828_v8  ;;  %2513 = vmatprep.mubr.msk.bf16.mxu0 (!%p645_p9), %vm2829_vm1, %v2828_v8  ;;  %s3431_s27 = sld [smem:[#allocation13_spill]] (!%p645_p9)  ;;  %s3405_s0 = smov (!%p645_p9), 120  }
  0x20   : > { %s3397_s24 = smov (!%p645_p9), 88   ;;  %s3433_s7 = sld [smem:[#allocation15_spill]] (!%p645_p9) }
  0x21   : > { %s3434_s11 = sld [smem:[#allocation19_spill]] (!%p645_p9)  ;;  %s3436_s10 = sld [smem:[#allocation18_spill]] (!%p645_p9) }
  0x22   : > { %s3437_s8 = sld [smem:[#allocation16_spill]] (!%p645_p9)  ;;  %s3438_s9 = sld [smem:[#allocation17_spill]] (!%p645_p9) }
  0x23   : > { %s3448_s12 = sld [smem:[#allocation20_spill]] (!%p645_p9) }
  0x24   : > { %s3429_s23 = smov (!%p645_p9), %s3428_s29  ;;  %v2708_v7 = vld [vmem:[%s3428_s29] sm:$0xff] (!%p645_p9)   ;;  %s3396_s29 = smov (!%p645_p9), 96  }
  0x25   : > { %s722_s26 = scalar_select %p721_p10, %s2981_s4, 1  ;;  %2498 = vmatpush3.bf16.msra.mxu1 %v2708_v7  ;;  %v2709_v9 = vld [vmem:[%s3429_s23 + $0x8] sm:$0xff]   ;;  %v2390_v16 = vld [vmem:[%s3431_s27] ss:$0 sm:$0xff] }
  0x26   : > { %2499 = vmatprep.subr.bf16.mxu1 %v2828_v8  ;;  %s3398_s27 = smov 104  }
  0x27   : > { %s3010_s2 = sshll.u32 %s722_s26, 3  ;;  %s3395_s26 = smov 72  }
  0x28   : > { %s724_s5 = scalar_lea.vmem %s3427_s1, %s3010_s2  ;;  %s3430_s1 = sld [smem:[#allocation12_spill]] }
  0x29   : > { %v3016_v0 = vld [vmem:[%s724_s5] sm:$0xff]  ;;  %2500 = vmatpush3.bf16.msra.mxu1 %v2709_v9  ;;  %s3400_s5 = smov 112  }
  0x2a   : > { %v747_v1 = vsel %vm746_vm0, %v3016_v0, 0.0  ;;  %2505 = vmatprep.subr.bf16.mxu1 %v2828_v8 }
  0x2b   : > { %748 = vadd.xlane.f32.xlu0 %v747_v1 }
  0x2e   : > { %v2389_v14 = vld [vmem:[%s3430_s1] ss:$0 sm:$0xff]  ;;  %s3394_s1 = smov 80  }
  0xb8   : > { %v749_v2 = vpop.xlane.xlu0 %748 }
  0xb9   : > { %v751_v3 = vmul.f32 0.03125, %v749_v2 }
  0xbb   : > { %v752_v4 = vsub.f32 %v3016_v0, %v751_v3 }
  0xbd   : > { %v753_v5 = vmul.f32 %v752_v4, %v752_v4 }
  0xbf   : > { %v754_v6 = vsel %vm746_vm0, %v753_v5, 0.0 }
  0xc0   : > { %755 = vadd.xlane.f32.xlu0 %v754_v6 }
 0x14d   : > { %v756_v10 = vpop.xlane.xlu0 %755 }
 0x14e   : > { %v757_v11 = vmul.f32 0.03125, %v756_v10 }
 0x150   : > { %v758_v12 = vadd.f32 1e-05, %v757_v11 }
 0x152   : > { %2724 = vrsqrt.f32 %v758_v12 }
 0x15c   : > { %v2725_v13 = vpop.eup %2724 }
 0x15d   : > { %v760_v15 = vmul.f32 %v2725_v13, %v752_v4 }
 0x15f   : > { %v768_v17 = vmul.f32 %v2389_v14, %v760_v15 }
 0x161   : > { %v776_v18 = vadd.f32 %v2390_v16, %v768_v17 }
 0x163   : > { %v777_v19 = vpack.c.bf16 %v776_v18, %v776_v18 }
 0x165   : > { %2502 = vmatmul.mubr.msk.bf16.vlgmr.msra.gmra.mrb[0].mxu1 %vm746_vm0, %v777_v19 }
 0x166   : > { %2507 = vmatprep.mubr.msk.bf16.mxu1 %vm2829_vm1, %v2828_v8 }
 0x238   : > { %v831_v20 = vpop.f32.mrb[0].mxu1 }
 0x239   : > { %v3045_v21 = vpack.c.bf16 %v831_v20, %v831_v20  ;;  %v2503_v22 = vpop.f32.mrb[1].mxu1 }
 0x23a   : > { %v834_v23 = vpop.f32.mrb[2].mxu1 }
 0x23b   : > { %949 = vrot.lane.b32.xlu0 %v3045_v21, %s3405_s0  ;;  %839 = vrot.lane.b32.xlu1 %v3045_v21, %s3396_s29  ;;  %v2504_v24 = vpop.f32.mrb[3].mxu1  ;;  %s3432_s29 = sld [smem:[#allocation10_spill]]  ;;  %s3435_s0 = sld [smem:[#allocation9_spill]] }
 0x23f   : > { %951 = vrot.lane.b32.xlu1 %v3045_v21, %s3397_s24 }
 0x241   : > { %s732_s24 = scalar_lea.vmem %s3432_s29, %s3010_s2  ;;  %s2837_s29 = smov 64  }
 0x242   : > { %v744_v36 = vld [vmem:[%s732_s24] sm:$0xff]  ;;  %s2838_s24 = smov 56  }
 0x243   : > { %1061 = vrot.lane.b32.xlu1 %v3045_v21, %s3394_s1  ;;  %s2839_s1 = smov 48  }
 0x247   : > { %1059 = vrot.lane.b32.xlu1 %v3045_v21, %s3400_s5  ;;  %s3403_s5 = smov 16  }
 0x24b   : > { %1171 = vrot.lane.b32.xlu1 %v3045_v21, %s3395_s26  ;;  %s2840_s26 = smov 40  }
 0x24f   : > { %1169 = vrot.lane.b32.xlu1 %v3045_v21, %s3398_s27  ;;  %s3439_s27 = smov 120  }
 0x2ad   : > { %v840_v25 = vpop.permute.xlu1 %839  ;;  %v950_v30 = vpop.permute.xlu0 %949 }
 0x2ae   : > { %v846_v26 = vsel %vm841_vm2, %v840_v25, 0 }
 0x2af   : > { %2506 = vmatpush3.bf16.xpose.msra.mxu1 %v846_v26 }
 0x2b0   : > { %2517 = vmatprep.subr.bf16.mxu1 %v2828_v8 }
 0x2b1   : > { %v952_v27 = vpop.permute.xlu1 %951 }
 0x2b2   : > { %v957_v28 = vsel %vm841_vm2, %v952_v27, 0 }
 0x2b5   : > { %v1062_v29 = vpop.permute.xlu1 %1061 }
 0x2b6   : > { %2508 = vmatmul.mubr.msk.bf16.vlgmr.msra.gmra.mrb[4].mxu1 %vm841_vm2, %v3045_v21  ;;  %v1067_v32 = vsel %vm841_vm2, %v1062_v29, 0 }
 0x2b7   : > { %2518 = vmatpush3.bf16.xpose.msra.mxu1 %v957_v28  ;;  %2519 = vmatprep.mubr.msk.bf16.mxu1 %vm2829_vm1, %v2828_v8 }
 0x2b8   : > { %2529 = vmatprep.subr.bf16.mxu1 %v2828_v8 }
 0x2b9   : > { %v1060_v31 = vpop.permute.xlu1 %1059 }
 0x2bd   : > { %v1172_v33 = vpop.permute.xlu1 %1171 }
 0x2be   : > { %2520 = vmatmul.mubr.msk.bf16.vlgmr.msra.gmra.mrb[8].mxu1 %vm841_vm2, %v950_v30  ;;  %v1177_v34 = vsel %vm841_vm2, %v1172_v33, 0 }
 0x2bf   : > { %2530 = vmatpush3.bf16.xpose.msra.mxu1 %v1067_v32  ;;  %2531 = vmatprep.mubr.msk.bf16.mxu1 %vm2829_vm1, %v2828_v8 }
 0x2c0   : > { %2541 = vmatprep.subr.bf16.mxu1 %v2828_v8 }
 0x2c1   : > { %v1170_v35 = vpop.permute.xlu1 %1169 }
 0x2c6   : > { %2532 = vmatmul.mubr.msk.bf16.vlgmr.msra.gmra.mrb[12].mxu1 %vm841_vm2, %v1060_v31 }
 0x2c7   : > { %2542 = vmatpush3.bf16.xpose.msra.mxu1 %v1177_v34  ;;  %2543 = vmatprep.mubr.msk.bf16.mxu1 %vm2829_vm1, %v2828_v8 }
 0x2c8   : > { %2553 = vmatprep.subr.bf16.mxu1 %v2828_v8 }
 0x2ce   : > { %2544 = vmatmul.mubr.msk.bf16.vlgmr.msra.gmra.mrb[16].mxu1 %vm841_vm2, %v1170_v35 }
 0x2cf   : > { %2557 = vmatprep.mubr.msk.bf16.mxu1 %vm2829_vm1, %v2828_v8 }
 0x389   : > { %v882_v37 = vpop.f32.mrb[4].mxu1 }
 0x38a   : > { %v883_v38 = vadd.f32 %v882_v37, %v744_v36  ;;  %v2509_v39 = vpop.f32.mrb[5].mxu1 }
 0x38b   : > { %v885_v40 = vpop.f32.mrb[6].mxu1 }
 0x38c   : > { %v2510_v41 = vpop.f32.mrb[7].mxu1  ;;  %v888_v42 = vsel %vm841_vm2, %v883_v38, -inf }
 0x38d   : > { %889 = vmax.xlane.f32.xlu1 %v888_v42 }
 0x391   : > { %v993_v43 = vpop.f32.mrb[8].mxu1 }
 0x392   : > { %v994_v44 = vadd.f32 %v993_v43, %v744_v36  ;;  %v2521_v45 = vpop.f32.mrb[9].mxu1 }
 0x393   : > { %v996_v46 = vpop.f32.mrb[10].mxu1 }
 0x394   : > { %v2522_v47 = vpop.f32.mrb[11].mxu1  ;;  %v999_v48 = vsel %vm841_vm2, %v994_v44, -inf }
 0x395   : > { %1000 = vmax.xlane.f32.xlu0 %v999_v48 }
 0x399   : > { %v1103_v49 = vpop.f32.mrb[12].mxu1 }
 0x39a   : > { %v1104_v50 = vadd.f32 %v1103_v49, %v744_v36  ;;  %v2533_v51 = vpop.f32.mrb[13].mxu1 }
 0x39b   : > { %v1106_v52 = vpop.f32.mrb[14].mxu1  ;;  %v2710_v51 = vld [vmem:[%s3433_s7] sm:$0xff]  }
 0x39c   : > { %v2534_v53 = vpop.f32.mrb[15].mxu1  ;;  %v1109_v54 = vsel %vm841_vm2, %v1104_v50, -inf  ;;  %2554 = vmatpush3.bf16.msra.mxu1 %v2710_v51  ;;  %v2711_v52 = vld [vmem:[%s3433_s7 + $0x8] sm:$0xff]   ;;  %s728_s7 = scalar_lea.vmem %s3435_s0, %s3010_s2  ;;  %s3442_s0 = sld [smem:[#allocation11_spill]] }
 0x39d   : > { %1110 = vmax.xlane.f32.xlu1 %v1109_v54  ;;  %2555 = vmatprep.subr.bf16.mxu1 %v2828_v8 }
 0x3a0   : > { %2556 = vmatpush3.bf16.msra.mxu1 %v2711_v52 }
 0x3a1   : > { %v1213_v55 = vpop.f32.mrb[16].mxu1  ;;  %2569 = vmatprep.subr.bf16.mxu1 %v2828_v8 }
 0x3a2   : > { %v1214_v56 = vadd.f32 %v1213_v55, %v744_v36  ;;  %v2545_v57 = vpop.f32.mrb[17].mxu1 }
 0x3a3   : > { %v1216_v58 = vpop.f32.mrb[18].mxu1 }
 0x3a4   : > { %v2546_v59 = vpop.f32.mrb[19].mxu1  ;;  %v1219_v60 = vsel %vm841_vm2, %v1214_v56, -inf }
 0x3a5   : > { %1220 = vmax.xlane.f32.xlu0 %v1219_v60 }
 0x41a   : > { %v890_v61 = vpop.xlane.xlu1 %889 }
 0x41b   : > { %v891_v62 = vsub.f32 %v883_v38, %v890_v61 }
 0x41d   : > { %v892_v63 = vmul.f32 1.442695, %v891_v62 }
 0x41f   : > { %2726 = vpow2.f32 %v892_v63 }
 0x422   : > { %v1001_v1 = vpop.xlane.xlu0 %1000 }
 0x423   : > { %v1002_v2 = vsub.f32 %v994_v44, %v1001_v1 }
 0x425   : > { %v1003_v3 = vmul.f32 1.442695, %v1002_v2 }
 0x427   : > { %2728 = vpow2.f32 %v1003_v3 }
 0x429   : > { %v2727_v4 = vpop.eup %2726 }
 0x42a   : > { %v894_v5 = vsel %vm841_vm2, %v2727_v4, 0.0  ;;  %v1111_v14 = vpop.xlane.xlu1 %1110 }
 0x42b   : > { %895 = vadd.xlane.f32.xlu1 %v894_v5  ;;  %v1112_v15 = vsub.f32 %v1104_v50, %v1111_v14 }
 0x42d   : > { %v1113_v16 = vmul.f32 1.442695, %v1112_v15 }
 0x431   : > { %v2729_v6 = vpop.eup %2728 }
 0x432   : > { %v1221_v7 = vpop.xlane.xlu0 %1220  ;;  %v1005_v9 = vsel %vm841_vm2, %v2729_v6, 0.0 }
 0x433   : > { %v1222_v10 = vsub.f32 %v1214_v56, %v1221_v7  ;;  %1006 = vadd.xlane.f32.xlu0 %v1005_v9 }
 0x435   : > { %v1223_v11 = vmul.f32 1.442695, %v1222_v10 }
 0x437   : > { %2730 = vpow2.f32 %v1223_v11 }
 0x438   : > { %2732 = vpow2.f32 %v1113_v16 }
 0x43c   : > { %900 = vrot.lane.b32.xlu1 %v3045_v21, %s2837_s29  ;;  %s3404_s29 = smov 8  }
 0x441   : > { %v2731_v12 = vpop.eup %2730 }
 0x442   : > { %v1225_v13 = vsel %vm841_vm2, %v2731_v12, 0.0  ;;  %v2733_v17 = vpop.eup %2732 }
 0x443   : > { %1226 = vadd.xlane.f32.xlu0 %v1225_v13  ;;  %v1115_v18 = vsel %vm841_vm2, %v2733_v17, 0.0 }
 0x459   : > { %1011 = vrot.lane.b32.xlu0 %v3045_v21, %s2838_s24  ;;  %s3402_s24 = smov 24  }
 0x460   : > { %1116 = vadd.xlane.f32.xlu1 %v1115_v18  ;;  %v743_v18 = vld [vmem:[%s728_s7] sm:$0xff] }
 0x471   : > { %1121 = vrot.lane.b32.xlu1 %v3045_v21, %s2839_s1  ;;  %s3440_s1 = smov 112  }
 0x475   : > { %1231 = vrot.lane.b32.xlu1 %v3045_v21, %s2840_s26  ;;  %s3407_s26 = sand.u32 1, %s2818_s28  }
 0x476   : > { %s3246_s7 = sshll.u32 %s3407_s26, 3  ;;  %s3449_s26 = smov 16  }
 0x4b8   : > { %v896_v19 = vpop.xlane.xlu1 %895 }
 0x4b9   : > { %2734 = vrcp.f32 %v896_v19  ;;  %v1446_v19 = vpack.c.bf16 %v743_v18, %v743_v18 }
 0x4bc   : > { %v901_v20 = vpop.permute.xlu1 %900 }
 0x4bd   : > { %v907_v22 = vsel %vm905_vm3, %v901_v20, 0  ;;  %v2714_v20 = vld [vmem:[%s3436_s10] sm:$0xff]  }
 0x4be   : > { %2512 = vmatpush3.bf16.msra.mxu0 %v907_v22  ;;  %v2715_v22 = vld [vmem:[%s3436_s10 + $0x8] sm:$0xff]   ;;  %s2844_s10 = smov [#allocation2]  }
 0x4bf   : > { %2523 = vmatprep.subr.bf16.mxu0 %v2828_v8 }
 0x4c0   : > { %v1007_v24 = vpop.xlane.xlu0 %1006 }
 0x4c1   : > { %2736 = vrcp.f32 %v1007_v24 }
 0x4c3   : > { %v2735_v23 = vpop.eup %2734 }
 0x4c4   : > { %v898_v25 = vmul.f32 %v2735_v23, %v2727_v4 }
 0x4c6   : > { %v899_v26 = vpack.c.bf16 %v898_v25, %v898_v25 }
 0x4c8   : > { %2514 = vmatmul.mubr.msk.bf16.vlgmr.msra.gmra.mrb[0].mxu0 %vm841_vm2, %v899_v26 }
 0x4c9   : > { %2525 = vmatprep.mubr.msk.bf16.mxu0 %vm2829_vm1, %v2828_v8 }
 0x4cb   : > { %v2737_v21 = vpop.eup %2736 }
 0x4cc   : > { %v1009_v28 = vmul.f32 %v2737_v21, %v2729_v6  ;;  %v2405_v21 = vld [vmem:[%s3437_s8] ss:$0 sm:$0xff]  ;;  %s2439_s8 = sshll.u32 %s2981_s4, 7 }
 0x4ce   : > { %v1010_v31 = vpack.c.bf16 %v1009_v28, %v1009_v28  ;;  %v2406_v28 = vld [vmem:[%s3438_s9] ss:$0 sm:$0xff] }
 0x4d0   : > { %v1227_v27 = vpop.xlane.xlu0 %1226 }
 0x4d4   : > { %v1012_v29 = vpop.permute.xlu0 %1011 }
 0x4d5   : > { %v1017_v30 = vsel %vm905_vm3, %v1012_v29, 0 }
 0x4d6   : > { %2524 = vmatpush3.bf16.msra.mxu0 %v1017_v30 }
 0x4d7   : > { %2535 = vmatprep.subr.bf16.mxu0 %v2828_v8 }
 0x4d9   : > { %2526 = vmatmul.mubr.msk.bf16.vlgmr.msra.gmra.mrb[4].mxu0 %vm841_vm2, %v1010_v31 }
 0x4da   : > { %2537 = vmatprep.mubr.msk.bf16.mxu0 %vm2829_vm1, %v2828_v8 }
 0x4ed   : > { %v1117_v32 = vpop.xlane.xlu1 %1116 }
 0x4ee   : > { %2738 = vrcp.f32 %v1117_v32 }
 0x4ef   : > { %2740 = vrcp.f32 %v1227_v27 }
 0x4f1   : > { %v1122_v33 = vpop.permute.xlu1 %1121 }
 0x4f2   : > { %v1127_v34 = vsel %vm905_vm3, %v1122_v33, 0 }
 0x4f3   : > { %2536 = vmatpush3.bf16.msra.mxu0 %v1127_v34 }
 0x4f4   : > { %2547 = vmatprep.subr.bf16.mxu0 %v2828_v8 }
 0x4f5   : > { %v1232_v37 = vpop.permute.xlu1 %1231 }
 0x4f6   : > { %v1237_v40 = vsel %vm905_vm3, %v1232_v37, 0 }
 0x4f8   : > { %v2739_v35 = vpop.eup %2738 }
 0x4f9   : > { %v1119_v36 = vmul.f32 %v2739_v35, %v2733_v17  ;;  %v2741_v39 = vpop.eup %2740  ;;  %v2713_v17 = vld [vmem:[%s3434_s11 + $0x8] sm:$0xff]  }
 0x4fa   : > { %v1229_v41 = vmul.f32 %v2741_v39, %v2731_v12 }
 0x4fb   : > { %v1120_v38 = vpack.c.bf16 %v1119_v36, %v1119_v36 }
 0x4fc   : > { %v1230_v42 = vpack.c.bf16 %v1229_v41, %v1229_v41 }
 0x4fd   : > { %2538 = vmatmul.mubr.msk.bf16.vlgmr.msra.gmra.mrb[8].mxu0 %vm841_vm2, %v1120_v38 }
 0x4fe   : > { %2548 = vmatpush3.bf16.msra.mxu0 %v1237_v40  ;;  %2549 = vmatprep.mubr.msk.bf16.mxu0 %vm2829_vm1, %v2828_v8 }
 0x4ff   : > { %2561 = vmatprep.subr.bf16.mxu0 %v2828_v8 }
 0x505   : > { %2550 = vmatmul.mubr.msk.bf16.vlgmr.msra.gmra.mrb[12].mxu0 %vm841_vm2, %v1230_v42 }
 0x506   : > { %2565 = vmatprep.mubr.msk.bf16.mxu0 %vm2829_vm1, %v2828_v8  ;;  %2562 = vmatpush3.bf16.msra.mxu0 %v2714_v20 }
 0x507   : > { %2563 = vmatprep.subr.bf16.mxu0 %v2828_v8 }
 0x50a   : > { %2564 = vmatpush3.bf16.msra.mxu0 %v2715_v22 }
 0x50b   : > { %2577 = vmatprep.subr.bf16.mxu0 %v2828_v8 }
 0x59b   : > { %v943_v43 = vpop.f32.mrb[0].mxu0 }
 0x59c   : > { %v2515_v44 = vpop.f32.mrb[1].mxu0 }
 0x59d   : > { %v946_v45 = vpop.f32.mrb[2].mxu0 }
 0x59e   : > { %v2516_v46 = vpop.f32.mrb[3].mxu0 }
 0x5ac   : > { %v1053_v47 = vpop.f32.mrb[4].mxu0 }
 0x5ad   : > { %1280 = vrot.lane.b32.xlu0 %v1053_v47, %s3404_s29  ;;  %v2527_v48 = vpop.f32.mrb[5].mxu0  ;;  %s3443_s29 = smov 88  }
 0x5ae   : > { %v1056_v49 = vpop.f32.mrb[6].mxu0 }
 0x5af   : > { %v2528_v50 = vpop.f32.mrb[7].mxu0 }
 0x5d0   : > { %v1163_v53 = vpop.f32.mrb[8].mxu0 }
 0x5d1   : > { %1284 = vrot.lane.b32.xlu1 %v1163_v53, %s3403_s5  ;;  %v2539_v54 = vpop.f32.mrb[9].mxu0  ;;  %s736_s5 = scalar_lea.vmem %s3442_s0, %s3010_s2  ;;  %s3408_s0 = scalar_lea.vmem [#allocation2], %s3246_s7 }
 0x5d2   : > { %v1166_v55 = vpop.f32.mrb[10].mxu0  ;;  %v745_v52 = vld [vmem:[%s736_s5] sm:$0xff]  ;;  %s3447_s5 = smov 8  }
 0x5d3   : > { %v2540_v56 = vpop.f32.mrb[11].mxu0 }
 0x5d8   : > { %v1273_v57 = vpop.f32.mrb[12].mxu0 }
 0x5d9   : > { %1288 = vrot.lane.b32.xlu0 %v1273_v57, %s3402_s24  ;;  %v2551_v58 = vpop.f32.mrb[13].mxu0  ;;  %s3441_s24 = smov 104  }
 0x5da   : > { %v1276_v59 = vpop.f32.mrb[14].mxu0 }
 0x5db   : > { %v2552_v60 = vpop.f32.mrb[15].mxu0 }
 0x61f   : > { %v1281_v61 = vpop.permute.xlu0 %1280 }
 0x620   : > { %v1291_v63 = vsel %vm841_vm2, %v943_v43, %v1281_v61 }
 0x643   : > { %v1285_v62 = vpop.permute.xlu1 %1284 }
 0x644   : > { %v1293_v1 = vsel %vm1292_vm4, %v1291_v63, %v1285_v62 }
 0x64b   : > { %v1289_v2 = vpop.permute.xlu0 %1288 }
 0x64c   : > { %v1295_v3 = vsel %vm1294_vm5, %v1293_v1, %v1289_v2 }
 0x64d   : > { %v1296_v4 = vpack.c.bf16 %v1295_v3, %v1295_v3 }
 0x64f   : > { %2558 = vmatmul.mubr.msk.bf16.vlgmr.msra.gmra.mrb[20].mxu1 %vm746_vm0, %v1296_v4 }
 0x650   : > { %2573 = vmatprep.mubr.msk.bf16.mxu1 %vm2829_vm1, %v2828_v8 }
 0x722   : > { %v1350_v5 = vpop.f32.mrb[20].mxu1 }
 0x723   : > { %v3136_v6 = vadd.f32 %v1350_v5, %v3016_v0  ;;  %v2559_v7 = vpop.f32.mrb[21].mxu1  ;;  %v2712_v0 = vld [vmem:[%s3434_s11] sm:$0xff]   ;;  %s2768_s11 = sshll.u32 %s2844_s10, 4  ;;  %s2769_s11 = int_to_ptr.vmem [resolvable:$false] %s2768_s11 }
 0x724   : > { %v1353_v9 = vpop.f32.mrb[22].mxu1  ;;  %2570 = vmatpush3.bf16.msra.mxu1 %v2712_v0 }
 0x725   : > { %v2560_v10 = vpop.f32.mrb[23].mxu1  ;;  %v1357_v11 = vsel %vm746_vm0, %v3136_v6, 0.0  ;;  %2571 = vmatprep.subr.bf16.mxu1 %v2828_v8 }
 0x726   : > { %1358 = vadd.xlane.f32.xlu1 %v1357_v11 }
 0x728   : > { %2572 = vmatpush3.bf16.msra.mxu1 %v2713_v17 }
 0x729   : > { %2583 = vmatprep.subr.bf16.mxu1 %v2828_v8 }
 0x72b   : > { %2574 = vmatmul.mubr.msk.bf16.vlgmr.msra.gmra.mrb[24].mxu1 %vm746_vm0, %v1446_v19 }
 0x72c   : > { %2585 = vmatprep.mubr.msk.bf16.mxu1 %vm2829_vm1, %v2828_v8 }
 0x7b3   : > { %v1359_v12 = vpop.xlane.xlu1 %1358 }
 0x7b4   : > { %v1360_v13 = vmul.f32 0.03125, %v1359_v12 }
 0x7b6   : > { %v1361_v14 = vsub.f32 %v3136_v6, %v1360_v13 }
 0x7b8   : > { %v1362_v15 = vmul.f32 %v1361_v14, %v1361_v14 }
 0x7ba   : > { %v1363_v16 = vsel %vm746_vm0, %v1362_v15, 0.0 }
 0x7bb   : > { %1364 = vadd.xlane.f32.xlu0 %v1363_v16 }
 0x7fe   : > { %v1500_v32 = vpop.f32.mrb[24].mxu1 }
 0x7ff   : > { %v3174_v33 = vpack.c.bf16 %v1500_v32, %v1500_v32  ;;  %v2575_v34 = vpop.f32.mrb[25].mxu1 }
 0x800   : > { %v1503_v35 = vpop.f32.mrb[26].mxu1 }
 0x801   : > { %v2576_v36 = vpop.f32.mrb[27].mxu1  ;;  %1618 = vrot.lane.b32.xlu0 %v3174_v33, %s3439_s27  ;;  %v1512_v37 = vsel %vm841_vm2, %v3174_v33, 0 }
 0x848   : > { %v1365_v23 = vpop.xlane.xlu0 %1364 }
 0x849   : > { %v1366_v24 = vmul.f32 0.03125, %v1365_v23 }
 0x84b   : > { %v1367_v25 = vadd.f32 1e-05, %v1366_v24 }
 0x84d   : > { %2742 = vrsqrt.f32 %v1367_v25 }
 0x857   : > { %v2743_v26 = vpop.eup %2742 }
 0x858   : > { %v1369_v27 = vmul.f32 %v2743_v26, %v1361_v14 }
 0x85a   : > { %v1377_v29 = vmul.f32 %v2405_v21, %v1369_v27 }
 0x85c   : > { %v1385_v30 = vadd.f32 %v2406_v28, %v1377_v29 }
 0x85e   : > { %v1386_v31 = vpack.c.bf16 %v1385_v30, %v1385_v30 }
 0x860   : > { %2566 = vmatmul.mubr.msk.bf16.vlgmr.msra.gmra.mrb[16].mxu0 %vm746_vm0, %v1386_v31 }
 0x861   : > { %2579 = vmatprep.mubr.msk.bf16.mxu0 %vm2829_vm1, %v2828_v8  ;;  %2578 = vmatpush3.bf16.xpose.msra.mxu0 %v1512_v37 }
 0x862   : > { %2589 = vmatprep.subr.bf16.mxu0 %v2828_v8 }
 0x873   : > { %v1619_v38 = vpop.permute.xlu0 %1618 }
 0x874   : > { %v1624_v43 = vsel %vm841_vm2, %v1619_v38, 0 }
 0x933   : > { %v1440_v39 = vpop.f32.mrb[16].mxu0 }
 0x934   : > { %v1506_v40 = vpack.c.bf16 %v1440_v39, %v1440_v39  ;;  %v2567_v41 = vpop.f32.mrb[17].mxu0 }
 0x935   : > { %v1443_v42 = vpop.f32.mrb[18].mxu0 }
 0x936   : > { %1616 = vrot.lane.b32.xlu1 %v1506_v40, %s3439_s27  ;;  %v2568_v44 = vpop.f32.mrb[19].mxu0  ;;  %1727 = vrot.lane.b32.xlu0 %v1506_v40, %s3440_s1  ;;  %s3444_s27 = smov 96  }
 0x937   : > { %2580 = vmatmul.mubr.msk.bf16.vlgmr.msra.gmra.mrb[20].mxu0 %vm841_vm2, %v1506_v40 }
 0x938   : > { %2590 = vmatpush3.bf16.xpose.msra.mxu0 %v1624_v43  ;;  %2591 = vmatprep.mubr.msk.bf16.mxu0 %vm2829_vm1, %v2828_v8 }
 0x939   : > { %2601 = vmatprep.subr.bf16.mxu0 %v2828_v8 }
 0x93a   : > { %1729 = vrot.lane.b32.xlu1 %v3174_v33, %s3440_s1  ;;  %1838 = vrot.lane.b32.xlu0 %v1506_v40, %s3441_s24  ;;  %s3445_s1 = smov 72  }
 0x93e   : > { %1840 = vrot.lane.b32.xlu1 %v3174_v33, %s3441_s24  ;;  %s3446_s24 = smov 80  }
 0x9a8   : > { %v1617_v45 = vpop.permute.xlu1 %1616  ;;  %v1728_v49 = vpop.permute.xlu0 %1727 }
 0x9a9   : > { %2592 = vmatmul.mubr.msk.bf16.vlgmr.msra.gmra.mrb[24].mxu0 %vm841_vm2, %v1617_v45 }
 0x9aa   : > { %2603 = vmatprep.mubr.msk.bf16.mxu0 %vm2829_vm1, %v2828_v8 }
 0x9ac   : > { %v1730_v46 = vpop.permute.xlu1 %1729  ;;  %v1839_v51 = vpop.permute.xlu0 %1838 }
 0x9ad   : > { %v1735_v47 = vsel %vm841_vm2, %v1730_v46, 0 }
 0x9ae   : > { %2602 = vmatpush3.bf16.xpose.msra.mxu0 %v1735_v47 }
 0x9af   : > { %2613 = vmatprep.subr.bf16.mxu0 %v2828_v8 }
 0x9b0   : > { %v1841_v48 = vpop.permute.xlu1 %1840 }
 0x9b1   : > { %v1846_v50 = vsel %vm841_vm2, %v1841_v48, 0 }
 0x9b5   : > { %2604 = vmatmul.mubr.msk.bf16.vlgmr.msra.gmra.mrb[28].mxu0 %vm841_vm2, %v1728_v49 }
 0x9b6   : > { %2614 = vmatpush3.bf16.xpose.msra.mxu0 %v1846_v50  ;;  %2615 = vmatprep.mubr.msk.bf16.mxu0 %vm2829_vm1, %v2828_v8 }
 0x9b7   : > { %2625 = vmatprep.subr.bf16.mxu0 %v2828_v8 }
 0x9bd   : > { %2616 = vmatmul.mubr.msk.bf16.vlgmr.msra.gmra.mrb[32].mxu0 %vm841_vm2, %v1839_v51 }
 0x9be   : > { %2629 = vmatprep.mubr.msk.bf16.mxu0 %vm2829_vm1, %v2828_v8 }
 0xa0a   : > { %v1548_v53 = vpop.f32.mrb[20].mxu0 }
 0xa0b   : > { %v1549_v54 = vadd.f32 %v1548_v53, %v745_v52  ;;  %v2581_v55 = vpop.f32.mrb[21].mxu0 }
 0xa0c   : > { %v1551_v56 = vpop.f32.mrb[22].mxu0 }
 0xa0d   : > { %v2582_v57 = vpop.f32.mrb[23].mxu0  ;;  %v1554_v58 = vsel %vm841_vm2, %v1549_v54, -inf }
 0xa0e   : > { %1555 = vmax.xlane.f32.xlu1 %v1554_v58 }
 0xa7c   : > { %v1660_v59 = vpop.f32.mrb[24].mxu0 }
 0xa7d   : > { %v1661_v60 = vadd.f32 %v1660_v59, %v745_v52  ;;  %v2593_v61 = vpop.f32.mrb[25].mxu0 }
 0xa7e   : > { %v1663_v62 = vpop.f32.mrb[26].mxu0 }
 0xa7f   : > { %v2594_v63 = vpop.f32.mrb[27].mxu0  ;;  %v1666_v1 = vsel %vm841_vm2, %v1661_v60, -inf }
 0xa80   : > { %1667 = vmax.xlane.f32.xlu0 %v1666_v1 }
 0xa88   : > { %v1771_v2 = vpop.f32.mrb[28].mxu0 }
 0xa89   : > { %v1772_v3 = vadd.f32 %v1771_v2, %v745_v52  ;;  %v2605_v4 = vpop.f32.mrb[29].mxu0 }
 0xa8a   : > { %v1774_v5 = vpop.f32.mrb[30].mxu0 }
 0xa8b   : > { %v2606_v7 = vpop.f32.mrb[31].mxu0  ;;  %v1777_v9 = vsel %vm841_vm2, %v1772_v3, -inf }
 0xa8c   : > { %1778 = vmax.xlane.f32.xlu0 %v1777_v9 }
 0xa90   : > { %v1882_v10 = vpop.f32.mrb[32].mxu0 }
 0xa91   : > { %v1883_v11 = vadd.f32 %v1882_v10, %v745_v52  ;;  %v2617_v12 = vpop.f32.mrb[33].mxu0  ;;  %v2716_v10 = vld [vmem:[%s3448_s12] sm:$0xff]  }
 0xa92   : > { %v1885_v13 = vpop.f32.mrb[34].mxu0  ;;  %2626 = vmatpush3.bf16.msra.mxu0 %v2716_v10 }
 0xa93   : > { %v2618_v14 = vpop.f32.mrb[35].mxu0  ;;  %v1888_v15 = vsel %vm841_vm2, %v1883_v11, -inf  ;;  %2627 = vmatprep.subr.bf16.mxu0 %v2828_v8 }
 0xa94   : > { %1889 = vmax.xlane.f32.xlu1 %v1888_v15 }
 0xa9b   : > { %v1556_v16 = vpop.xlane.xlu1 %1555 }
 0xa9c   : > { %v1557_v0 = vsub.f32 %v1549_v54, %v1556_v16 }
 0xa9e   : > { %v1558_v17 = vmul.f32 1.442695, %v1557_v0 }
 0xaa0   : > { %2744 = vpow2.f32 %v1558_v17 }
 0xaaa   : > { %v2745_v18 = vpop.eup %2744 }
 0xaab   : > { %v1560_v19 = vsel %vm841_vm2, %v2745_v18, 0.0 }
 0xaac   : > { %1561 = vadd.xlane.f32.xlu0 %v1560_v19 }
 0xb0d   : > { %v1668_v20 = vpop.xlane.xlu0 %1667 }
 0xb0e   : > { %v1669_v22 = vsub.f32 %v1661_v60, %v1668_v20 }
 0xb10   : > { %v1670_v23 = vmul.f32 1.442695, %v1669_v22 }
 0xb12   : > { %2746 = vpow2.f32 %v1670_v23 }
 0xb19   : > { %v1779_v24 = vpop.xlane.xlu0 %1778 }
 0xb1a   : > { %v1780_v25 = vsub.f32 %v1772_v3, %v1779_v24 }
 0xb1c   : > { %v2747_v26 = vpop.eup %2746  ;;  %v1781_v21 = vmul.f32 1.442695, %v1780_v25 }
 0xb1d   : > { %v1672_v27 = vsel %vm841_vm2, %v2747_v26, 0.0 }
 0xb1e   : > { %2748 = vpow2.f32 %v1781_v21  ;;  %1673 = vadd.xlane.f32.xlu1 %v1672_v27 }
 0xb21   : > { %v1890_v30 = vpop.xlane.xlu1 %1889 }
 0xb22   : > { %v1891_v31 = vsub.f32 %v1883_v11, %v1890_v30  ;;  %v2717_v11 = vld [vmem:[%s3448_s12 + $0x8] sm:$0xff]   ;;  %s2770_s12 = scalar_lea.vmem %s2769_s11, 256 }
 0xb23   : > { %2628 = vmatpush3.bf16.msra.mxu0 %v2717_v11 }
 0xb24   : > { %v1892_v32 = vmul.f32 1.442695, %v1891_v31  ;;  %2641 = vmatprep.subr.bf16.mxu0 %v2828_v8 }
 0xb26   : > { %2750 = vpow2.f32 %v1892_v32 }
 0xb28   : > { %v2749_v28 = vpop.eup %2748 }
 0xb29   : > { %v1783_v29 = vsel %vm841_vm2, %v2749_v28, 0.0 }
 0xb2a   : > { %1784 = vadd.xlane.f32.xlu0 %v1783_v29 }
 0xb2f   : > { %1678 = vrot.lane.b32.xlu1 %v3174_v33, %s3443_s29  ;;  %s3318_s29 = scalar_lea.hbm %s3389_s22, %s2439_s8 }
 0xb30   : > { %v2751_v34 = vpop.eup %2750 }
 0xb31   : > { %v1894_v35 = vsel %vm841_vm2, %v2751_v34, 0.0 }
 0xb39   : > { %v1562_v36 = vpop.xlane.xlu0 %1561 }
 0xb3a   : > { %2752 = vrcp.f32 %v1562_v36 }
 0xb40   : > { %1567 = vrot.lane.b32.xlu0 %v3174_v33, %s3444_s27  ;;  %s3452_s27 = sand.u32 1, %s2818_s28  }
 0xb44   : > { %1900 = vrot.lane.b32.xlu0 %v3174_v33, %s3445_s1  ;;  %v2753_v38 = vpop.eup %2752  ;;  %s2244_s1 = scalar_lea.sflag [#allocation3], %s3452_s27 }
 0xb45   : > { %v1564_v40 = vmul.f32 %v2753_v38, %v2745_v18  ;;  %v2718_v38 = vld [vmem:[%s3382_s15] sm:$0xff]  }
 0xb47   : > { %v1565_v44 = vpack.c.bf16 %v1564_v40, %v1564_v40 }
 0xb53   : > { %1895 = vadd.xlane.f32.xlu1 %v1894_v35 }
 0xb64   : > { %1789 = vrot.lane.b32.xlu1 %v3174_v33, %s3446_s24 }
 0xbab   : > { %v1674_v37 = vpop.xlane.xlu1 %1673 }
 0xbac   : > { %2754 = vrcp.f32 %v1674_v37 }
 0xbaf   : > { %v1679_v43 = vpop.permute.xlu1 %1678 }
 0xbb0   : > { %v1684_v46 = vsel %vm905_vm3, %v1679_v43, 0 }
 0xbb6   : > { %v2755_v45 = vpop.eup %2754 }
 0xbb7   : > { %v1785_v39 = vpop.xlane.xlu0 %1784  ;;  %v1676_v33 = vmul.f32 %v2755_v45, %v2747_v26  ;;  %v2424_v45 = vld [vmem:[%s3380_s13] ss:$0 sm:$0xff] }
 0xbb8   : > { %2756 = vrcp.f32 %v1785_v39  ;;  %v2720_v39 = vld [vmem:[%s3384_s17] sm:$0xff]  }
 0xbb9   : > { %v1677_v47 = vpack.c.bf16 %v1676_v33, %v1676_v33  ;;  %v1726_v56 = vadd.f32 %v1676_v33, %v1564_v40  ;;  %v2721_v40 = vld [vmem:[%s3384_s17 + $0x8] sm:$0xff]   ;;  %v2425_v33 = vld [vmem:[%s3381_s14] ss:$0 sm:$0xff] }
 0xbbb   : > { %v1568_v41 = vpop.permute.xlu0 %1567 }
 0xbbc   : > { %v1573_v42 = vsel %vm905_vm3, %v1568_v41, 0 }
 0xbbd   : > { %2584 = vmatpush3.bf16.msra.mxu1 %v1573_v42 }
 0xbbe   : > { %2595 = vmatprep.subr.bf16.mxu1 %v2828_v8 }
 0xbbf   : > { %v1901_v53 = vpop.permute.xlu0 %1900 }
 0xbc0   : > { %2586 = vmatmul.mubr.msk.bf16.vlgmr.msra.gmra.mrb[28].mxu1 %vm841_vm2, %v1565_v44  ;;  %v1906_v55 = vsel %vm905_vm3, %v1901_v53, 0 }
 0xbc1   : > { %2596 = vmatpush3.bf16.msra.mxu1 %v1684_v46  ;;  %2597 = vmatprep.mubr.msk.bf16.mxu1 %vm2829_vm1, %v2828_v8 }
 0xbc2   : > { %2607 = vmatprep.subr.bf16.mxu1 %v2828_v8  ;;  %v2757_v48 = vpop.eup %2756 }
 0xbc3   : > { %v1787_v50 = vmul.f32 %v2757_v48, %v2749_v28 }
 0xbc5   : > { %v1788_v54 = vpack.c.bf16 %v1787_v50, %v1787_v50  ;;  %v1837_v59 = vadd.f32 %v1787_v50, %v1726_v56  ;;  %v2722_v50 = vld [vmem:[%s3384_s17 + $0x10] sm:$0xff]  }
 0xbc8   : > { %2598 = vmatmul.mubr.msk.bf16.vlgmr.msra.gmra.mrb[32].mxu1 %vm841_vm2, %v1677_v47 }
 0xbc9   : > { %2609 = vmatprep.mubr.msk.bf16.mxu1 %vm2829_vm1, %v2828_v8 }
 0xbe0   : > { %v1896_v49 = vpop.xlane.xlu1 %1895 }
 0xbe1   : > { %2758 = vrcp.f32 %v1896_v49 }
 0xbe4   : > { %v1790_v51 = vpop.permute.xlu1 %1789 }
 0xbe5   : > { %v1795_v52 = vsel %vm905_vm3, %v1790_v51, 0  ;;  %v2723_v51 = vld [vmem:[%s3384_s17 + $0x18] sm:$0xff]  }
 0xbe6   : > { %2608 = vmatpush3.bf16.msra.mxu1 %v1795_v52  ;;  %v2426_v52 = vld [vmem:[%s3383_s16] ss:$0 sm:$0xff] }
 0xbe7   : > { %2619 = vmatprep.subr.bf16.mxu1 %v2828_v8 }
 0xbe9   : > { %2610 = vmatmul.mubr.msk.bf16.vlgmr.msra.gmra.mrb[36].mxu1 %vm841_vm2, %v1788_v54 }
 0xbea   : > { %2620 = vmatpush3.bf16.msra.mxu1 %v1906_v55  ;;  %2621 = vmatprep.mubr.msk.bf16.mxu1 %vm2829_vm1, %v2828_v8 }
 0xbeb   : > { %v2759_v57 = vpop.eup %2758  ;;  %2633 = vmatprep.subr.bf16.mxu1 %v2828_v8 }
 0xbec   : > { %v1898_v58 = vmul.f32 %v2759_v57, %v2751_v34 }
 0xbee   : > { %v1899_v60 = vpack.c.bf16 %v1898_v58, %v1898_v58  ;;  %v1948_v61 = vadd.f32 %v1898_v58, %v1837_v59 }
 0xbf0   : > { %v2025_v62 = vmul.f32 0.25, %v1948_v61 }
 0xbf1   : > { %2622 = vmatmul.mubr.msk.bf16.vlgmr.msra.gmra.mrb[40].mxu1 %vm841_vm2, %v1899_v60 }
 0xbf2   : > { %2637 = vmatprep.mubr.msk.bf16.mxu1 %vm2829_vm1, %v2828_v8  ;;  %2026 = vst.msk [vmem:[%s3408_s0] sm:$0xff] %vm841_vm2, %v2025_v62  ;;  %2634 = vmatpush3.bf16.msra.mxu1 %v2718_v38  ;;  %s3451_s0 = scalar_lea.vmem [#allocation2], %s3246_s7 }
 0xbf3   : > { %2635 = vmatprep.subr.bf16.mxu1 %v2828_v8  ;;  %s2260_s24 = sshll.u32 %s3451_s0, 4  ;;  %s2261_s24 = int_to_ptr.vmem [resolvable:$true] %s2260_s24 }
 0xbf4   : > { %s2764_s9 = scalar_lea.vmem %s2261_s24, 128  ;;  %p2771_p0 = scmp.lt.s32.totalorder %s2261_s24, %s2769_s11 }
 0xbf5   : > { %p2765_p11 = scmp.ne.s32.totalorder %s2261_s24, %s2764_s9  ;;  %p2772_p1 = scmp.lt.s32.totalorder %s2770_s12, %s2764_s9 }
 0xbf7   : > { %p2766_p12 = pnand %p2765_p11, %p2998_p5  ;;  %p2773_p2 = por %p2772_p1, %p2771_p0 }
 0xbf9   : > { %p2767_p13 = pneg %p2766_p12 }
 0xbfb   : > { %p2774_p3 = pnand %p2773_p2, %p2767_p13 }
 0xc93   : > { %v1609_v63 = vpop.f32.mrb[28].mxu1 }
 0xc94   : > { %v2587_v1 = vpop.f32.mrb[29].mxu1 }
 0xc95   : > { %v1612_v2 = vpop.f32.mrb[30].mxu1 }
 0xc96   : > { %v2588_v3 = vpop.f32.mrb[31].mxu1 }
 0xc9b   : > { %v1720_v4 = vpop.f32.mrb[32].mxu1 }
 0xc9c   : > { %1950 = vrot.lane.b32.xlu1 %v1720_v4, %s3447_s5  ;;  %v2599_v5 = vpop.f32.mrb[33].mxu1  ;;  %s3450_s5 = smov 24  }
 0xc9d   : > { %v1723_v7 = vpop.f32.mrb[34].mxu1 }
 0xc9e   : > { %v2600_v9 = vpop.f32.mrb[35].mxu1 }
 0xcbc   : > { %v1831_v12 = vpop.f32.mrb[36].mxu1 }
 0xcbd   : > { %1954 = vrot.lane.b32.xlu0 %v1831_v12, %s3449_s26  ;;  %v2611_v13 = vpop.f32.mrb[37].mxu1 }
 0xcbe   : > { %v1834_v14 = vpop.f32.mrb[38].mxu1 }
 0xcbf   : > { %v2612_v15 = vpop.f32.mrb[39].mxu1 }
 0xcc4   : > { %v1942_v16 = vpop.f32.mrb[40].mxu1 }
 0xcc5   : > { %1958 = vrot.lane.b32.xlu1 %v1942_v16, %s3450_s5  ;;  %v2623_v0 = vpop.f32.mrb[41].mxu1 }
 0xcc6   : > { %v1945_v17 = vpop.f32.mrb[42].mxu1 }
 0xcc7   : > { %v2624_v18 = vpop.f32.mrb[43].mxu1 }
 0xd0e   : > { %v1951_v19 = vpop.permute.xlu1 %1950 }
 0xd0f   : > { %v1961_v22 = vsel %vm841_vm2, %v1609_v63, %v1951_v19 }
 0xd2f   : > { %v1955_v20 = vpop.permute.xlu0 %1954 }
 0xd30   : > { %v1962_v23 = vsel %vm1292_vm4, %v1961_v22, %v1955_v20 }
 0xd37   : > { %v1959_v24 = vpop.permute.xlu1 %1958 }
 0xd38   : > { %v1963_v25 = vsel %vm1294_vm5, %v1962_v23, %v1959_v24 }
 0xd39   : > { %v1964_v26 = vpack.c.bf16 %v1963_v25, %v1963_v25 }
 0xd3b   : > { %2630 = vmatmul.mubr.msk.bf16.vlgmr.msra.gmra.mrb[36].mxu0 %vm746_vm0, %v1964_v26 }
 0xd3c   : > { %2649 = vmatprep.mubr.msk.bf16.mxu0 %vm2829_vm1, %v2828_v8  ;;  %2642 = vmatpush3.bf16.msra.mxu0 %v2720_v39 }
 0xd3d   : > { %2643 = vmatprep.subr.bf16.mxu0 %v2828_v8 }
 0xd40   : > { %2644 = vmatpush3.bf16.msra.mxu0 %v2721_v40 }
 0xd41   : > { %2645 = vmatprep.subr.bf16.mxu0 %v2828_v8 }
 0xd44   : > { %2646 = vmatpush3.bf16.msra.mxu0 %v2722_v50 }
 0xd45   : > { %2647 = vmatprep.subr.bf16.mxu0 %v2828_v8  ;;  %v2430_v8 = vld [vmem:[%s3385_s18] ss:$0 sm:$0xff] }
 0xd48   : > { %2648 = vmatpush3.bf16.msra.mxu0 %v2723_v51 }
 0xe0e   : > { %v2018_v21 = vpop.f32.mrb[36].mxu0 }
 0xe0f   : > { %v2024_v27 = vadd.f32 %v2018_v21, %v3136_v6  ;;  %v2631_v28 = vpop.f32.mrb[37].mxu0  ;;  %v2719_v6 = vld [vmem:[%s3382_s15 + $0x8] sm:$0xff]  }
 0xe10   : > { %v2021_v29 = vpop.f32.mrb[38].mxu0  ;;  %2636 = vmatpush3.bf16.msra.mxu1 %v2719_v6 }
 0xe11   : > { %v2632_v30 = vpop.f32.mrb[39].mxu0  ;;  %v2027_v31 = vsel %vm746_vm0, %v2024_v27, 0.0 }
 0xe12   : > { %2028 = vadd.xlane.f32.xlu0 %v2027_v31 }
 0xe9f   : > { %v2029_v32 = vpop.xlane.xlu0 %2028 }
 0xea0   : > { %v2030_v34 = vmul.f32 0.03125, %v2029_v32 }
 0xea2   : > { %v2031_v35 = vsub.f32 %v2024_v27, %v2030_v34 }
 0xea4   : > { %v2032_v36 = vmul.f32 %v2031_v35, %v2031_v35 }
 0xea6   : > { %v2033_v37 = vsel %vm746_vm0, %v2032_v36, 0.0 }
 0xea7   : > { %2034 = vadd.xlane.f32.xlu1 %v2033_v37 }
 0xf34   : > { %v2035_v41 = vpop.xlane.xlu1 %2034 }
 0xf35   : > { %v2036_v42 = vmul.f32 0.03125, %v2035_v41 }
 0xf37   : > { %v2037_v43 = vadd.f32 1e-05, %v2036_v42 }
 0xf39   : > { %2760 = vrsqrt.f32 %v2037_v43 }
 0xf43   : > { %v2761_v44 = vpop.eup %2760 }
 0xf44   : > { %v2039_v46 = vmul.f32 %v2761_v44, %v2031_v35 }
 0xf46   : > { %v2047_v47 = vmul.f32 %v2424_v45, %v2039_v46 }
 0xf48   : > { %v2055_v48 = vadd.f32 %v2425_v33, %v2047_v47 }
 0xf4a   : > { %v2056_v49 = vpack.c.bf16 %v2055_v48, %v2055_v48 }
 0xf4c   : > { %2638 = vmatmul.mubr.msk.bf16.vlgmr.msra.gmra.mrb[44].mxu1 %vm746_vm0, %v2056_v49 }
0x101f   : > { %v2117_v53 = vpop.f32.mrb[44].mxu1 }
0x1020   : > { %v2118_v54 = vadd.f32 %v2426_v52, %v2117_v53  ;;  %v2639_v55 = vpop.f32.mrb[45].mxu1 }
0x1021   : > { %v2120_v56 = vpop.f32.mrb[46].mxu1 }
0x1022   : > { %v2123_v57 = vmax.f32 %v2118_v54, 0.0  ;;  %v2640_v58 = vpop.f32.mrb[47].mxu1 }
0x1024   : > { %v2124_v59 = vpack.c.bf16 %v2123_v57, %v2123_v57 }
0x1026   : > { %2650 = vmatmul.mubr.msk.bf16.vlgmr.msra.gmra.mrb[40].mxu0 %vm2164_vm6, %v2124_v59 }
0x10f9   : > { %v2202_v60 = vpop.f32.mrb[40].mxu0 }
0x10fa   : > { %v2203_v61 = vadd.f32 %v2430_v8, %v2202_v60  ;;  %v2651_v62 = vpop.f32.mrb[41].mxu0 }
0x10fb   : > { %v2205_v63 = vpop.f32.mrb[42].mxu0 }
0x10fc   : > { %v2652_v1 = vpop.f32.mrb[43].mxu0  ;;  %v2208_v2 = vadd.f32 %v2203_v61, %v2024_v27 }
0x10fe   : > { %v2209_v3 = vsel %vm746_vm0, %v2208_v2, 0.0 }
0x10ff   : > { %2210 = vadd.xlane.f32.xlu0 %v2209_v3 }
0x118c   : > { %v2211_v4 = vpop.xlane.xlu0 %2210 }
0x118d   : > { %v2212_v5 = vmul.f32 0.03125, %v2211_v4 }
0x118f   : > { %v2213_v7 = vsub.f32 %v2208_v2, %v2212_v5 }
0x1191   : > { %v2214_v9 = vmul.f32 %v2213_v7, %v2213_v7 }
0x1193   : > { %v2215_v10 = vsel %vm746_vm0, %v2214_v9, 0.0 }
0x1194   : > { %2216 = vadd.xlane.f32.xlu0 %v2215_v10 }
0x1195   : > { %2777 = shalt.err (!%p2774_p3)
}
0x1196   : > { %s2778_s4 = scalar_lea.hbm %s3318_s29, 128  ;;  %s2782_s10 = scalar_lea.hbm %s3389_s22, 256 }
0x1197   : > { %p2779_p4 = scmp.ne.s32.totalorder %s3318_s29, %s2778_s4  ;;  %p2783_p9 = scmp.lt.u32.totalorder %s3318_s29, %s3389_s22 }
0x1198   : > { %p2784_p10 = scmp.lt.u32.totalorder %s2782_s10, %s2778_s4  ;;  %p2786_p12 = scmp.lt.u32.totalorder %s2778_s4, %s3318_s29 }
0x1199   : > { %p2780_p7 = pnand %p2779_p4, %p2998_p5 }
0x119a   : > { %p2785_p11 = por %p2784_p10, %p2783_p9 }
0x119b   : > { %p2781_p8 = pneg %p2780_p7 }
0x119c   : > { %p2787_p13 = por %p2786_p12, %p2785_p11 }
0x119e   : > { %p2788_p0 = pnand %p2787_p13, %p2781_p8 }
0x11a0   : > { %2791 = shalt.err (!%p2788_p0)
}
0x11a1   : > { %2653 = dma.vmem_to_hbm [thread:$0]  (%p2998_p5), %s2261_s24, 128, %s3318_s29, %s2244_s1   ;;  %v2436_v15 = vld [vmem:[%s3386_s19] ss:$0 sm:$0xff] }
0x11a2   : > { %v2437_v0 = vld [vmem:[%s3387_s20] ss:$0 sm:$0xff]  ;;  %s740_s4 = scalar_lea.vmem %s3388_s21, %s3010_s2 }
0x1221   : > { %v2217_v11 = vpop.xlane.xlu0 %2216 }
0x1222   : > { %v2218_v12 = vmul.f32 0.03125, %v2217_v11 }
0x1224   : > { %v2219_v13 = vadd.f32 1e-05, %v2218_v12 }
0x1226   : > { %2762 = vrsqrt.f32 %v2219_v13 }
0x1230   : > { %v2763_v14 = vpop.eup %2762 }
0x1231   : > { %v2221_v16 = vmul.f32 %v2763_v14, %v2213_v7 }
0x1233   : > { %v2229_v17 = vmul.f32 %v2436_v15, %v2221_v16 }
0x1235   : > { %v2237_v18 = vadd.f32 %v2437_v0, %v2229_v17 }
0x1237   : > { %2238 = vst.msk [vmem:[%s740_s4] sm:$0xff] %vm746_vm0, %v2237_v18 }
0x1238 PF: > { %p2659_p5 = scmp.ge.s32.totalorder %s2826_s30, 2  ;;  %s2279_s24 = sand.u32 1, %s2814_s3  }
0x1239   : > { %s2280_s29 = scalar_lea.sflag [#allocation3], %s2279_s24 }
0x123a   : > { %p2656_p1 = pnand %p2659_p5, %p3002_p6 }
0x123c   : > { %2809 = dma.done.wait (!%p2656_p1), %s2280_s29, 128  }
0x123d   : > { %2811 = vsyncadd (!%p2656_p1), %s2280_s29, 4294967168  ;;  %s3453_s30 = sld [smem:[#allocation6_spill]]  ;;  %s3454_s1 = sld [smem:[#allocation5_spill]] }
0x123e   : > { %s3455_s29 = sld [smem:[#allocation7_spill]]  ;;  %s3456_s3 = smov %s2818_s28 }
0x1243   : > { %p33_p2 = scmp.ge.s32.totalorder %s3453_s30, 4   ;;  %s3457_s28 = smov %s3454_s1 }
0x1245   :  { %35 = sbr.rel (!%p33_p2) target bundleno = 17 (0x11), region = 160 }
0x124c   :  { %2285 = vsyncpa [#allocation3], 1 }
0x124d   :  { %2287 = vsyncpa [#allocation3 + $0x1], 1 }

// kernel: transformer_decoder_forward.2
= control target key start
LH: loop header
LB: loop body
LE: loop exit
PB: predicated region body
PF: predicated region fallthrough
CT: control target
= control target key end

     0   :  { %s3331_s0 = inlined_call_operand.vmem [shape: f32[2,8,32], index: 0, kind: input, shape index: {}]   ;;  %s3332_s1 = inlined_call_operand.vmem [shape: f32[2,8,32], index: 1, kind: input, shape index: {}]   ;;  %s3333_s2 = inlined_call_operand.vmem [shape: f32[2,8,8], index: 2, kind: input, shape index: {}]   ;;  %s3334_s3 = inlined_call_operand.vmem [shape: f32[2,8,8], index: 3, kind: input, shape index: {}]   ;;  %s3335_s4 = inlined_call_operand.vmem [shape: f32[1,32], index: 4, kind: input, shape index: {}]   ;;  %s3336_s5 = inlined_call_operand.vmem [shape: f32[1,32], index: 5, kind: input, shape index: {}]   ;;  %s3337_s6 = inlined_call_operand.vmem [shape: bf16[32,96], index: 6, kind: input, shape index: {}]   ;;  %s3338_s7 = inlined_call_operand.vmem [shape: bf16[32,32], index: 7, kind: input, shape index: {}]   ;;  %s3339_s8 = inlined_call_operand.vmem [shape: f32[1,32], index: 8, kind: input, shape index: {}]   ;;  %s3340_s9 = inlined_call_operand.vmem [shape: f32[1,32], index: 9, kind: input, shape index: {}]   ;;  %s3341_s10 = inlined_call_operand.vmem [shape: bf16[32,32], index: 10, kind: input, shape index: {}]   ;;  %s3342_s11 = inlined_call_operand.vmem [shape: bf16[32,64], index: 11, kind: input, shape index: {}]   ;;  %s3343_s12 = inlined_call_operand.vmem [shape: bf16[32,32], index: 12, kind: input, shape index: {}]   ;;  %s3344_s13 = inlined_call_operand.vmem [shape: f32[1,32], index: 13, kind: input, shape index: {}]   ;;  %s3345_s14 = inlined_call_operand.vmem [shape: f32[1,32], index: 14, kind: input, shape index: {}]   ;;  %s3346_s15 = inlined_call_operand.vmem [shape: bf16[32,64], index: 15, kind: input, shape index: {}]   ;;  %s3347_s16 = inlined_call_operand.vmem [shape: f32[1,64], index: 16, kind: input, shape index: {}]   ;;  %s3348_s17 = inlined_call_operand.vmem [shape: bf16[64,32], index: 17, kind: input, shape index: {}]   ;;  %s3349_s18 = inlined_call_operand.vmem [shape: f32[1,32], index: 18, kind: input, shape index: {}]   ;;  %s3350_s19 = inlined_call_operand.vmem [shape: f32[1,32], index: 19, kind: input, shape index: {}]   ;;  %s3351_s20 = inlined_call_operand.vmem [shape: f32[1,32], index: 20, kind: input, shape index: {}]   ;;  %s3352_s21 = inlined_call_operand.vmem [shape: f32[2,8,32], index: 21, kind: output, shape index: {0}]   ;;  %s3353_s22 = inlined_call_operand.hbm [shape: f32[2,8,8], index: 22, kind: output, shape index: {1}]  }
   0x1   :  { %3371 = sst [smem:[#allocation5_spill]] %s3331_s0 }
   0x2   :  { %3372 = sst [smem:[#allocation6_spill]] %s3332_s1 }
   0x3   :  { %3373 = sst [smem:[#allocation7_spill]] %s3333_s2 }
   0x4   :  { %3374 = sst [smem:[#allocation8_spill]] %s3334_s3 }
   0x5   :  { %3375 = sst [smem:[#allocation9_spill]] %s3335_s4 }
   0x6   :  { %3376 = sst [smem:[#allocation10_spill]] %s3336_s5 }
   0x7   :  { %3377 = sst [smem:[#allocation11_spill]] %s3337_s6 }
   0x8   :  { %3378 = sst [smem:[#allocation12_spill]] %s3338_s7 }
   0x9   :  { %3379 = sst [smem:[#allocation13_spill]] %s3339_s8 }
   0xa   :  { %3380 = sst [smem:[#allocation14_spill]] %s3340_s9 }
   0xb   :  { %3381 = sst [smem:[#allocation15_spill]] %s3341_s10 }
   0xc   :  { %3382 = sst [smem:[#allocation16_spill]] %s3342_s11 }
   0xd   :  { %3383 = sst [smem:[#allocation17_spill]] %s3343_s12 }
   0xe   :  { %28 = vsyncpa [#allocation3], 0 }
   0xf   :  { %30 = vsyncpa [#allocation3 + $0x1], 0  ;;  %s2927_s3 = smov 0   ;;  %s2929_s28 = smov 0  }
  0x10   :  { %s2931_s29 = smov 0   ;;  %s2933_s30 = smov 0  }
  0x11 LB: > { %s2948_s19 = sadd.s32 4294967295, %s2793_s30   ;;  %s2350_s20 = sadd.s32 4294967294, %s2793_s30   ;;  %s2793_s30 = sphi %s2933_s30, %s3414_s30   ;;  %s2789_s29 = sphi %s2931_s29, %s3413_s29   ;;  %s2785_s28 = sphi %s2929_s28, %s3412_s28   ;;  %s2781_s3 = sphi %s2927_s3, %s3411_s3  }
  0x12   : > { %s2952_s4 = sadd.s32 1, %s2793_s30   ;;  %s530_s0 = sadd.s32 1, %s2789_s29 }
  0x13   : > { %s527_s23 = ssub.s32 %s2793_s30, %s2952_s4  ;;  %p540_p0 = scmp.ne.s32.totalorder %s2789_s29, %s2785_s28 }
  0x14   : > { %p528_p1 = scmp.eq.s32.totalorder %s527_s23, 0  ;;  %p541_p2 = scmp.eq.s32.totalorder %s2948_s19, 1 }
  0x15   : > { %p546_p3 = scmp.ne.s32.totalorder %s2785_s28, %s2781_s3  ;;  %p547_p4 = scmp.eq.s32.totalorder %s2350_s20, 1 }
  0x16   : > { %s2963_s1 = scalar_select %p528_p1, %s2789_s29, %s530_s0  }
  0x17   : > { %p2965_p5 = por %p541_p2, %p540_p0  ;;  %p2969_p6 = por %p547_p4, %p546_p3 }
  0x18   : > { %p2353_p7 = scmp.ge.s32.totalorder %s2793_s30, 1  ;;  %p644_p8 = scmp.lt.s32.totalorder %s2793_s30, 3 }
  0x1a   : > { %p645_p9 = pnand %p2353_p7, %p644_p8 }
  0x1b   : > { %p721_p10 = scmp.lt.s32.totalorder (!%p645_p9), %s2948_s19, 1  ;;  %vm746_vm0 = vcmask (!%p645_p9), 261120   ;;  %s3386_s27 = sld [smem:[#allocation5_spill]] (!%p645_p9)  ;;  %v2795_v8 = vmov (!%p645_p9), 0.0   ;;  %vm2796_vm1 = vmmov (!%p645_p9), 0   ;;  %vm841_vm2 = vcmask (!%p645_p9), 64512  }
  0x1c   : > { %648 = sbr.rel (%p645_p9) target bundleno = 4349 (0x10fd), region = 104  ;;  %2466 = vmatprep.subr.bf16.mxu1 (!%p645_p9), %v2795_v8  ;;  %2470 = vmatprep.mubr.msk.bf16.mxu1 (!%p645_p9), %vm2796_vm1, %v2795_v8  ;;  %s3388_s0 = sld [smem:[#allocation9_spill]] (!%p645_p9)  ;;  %vm905_vm3 = vcmask (!%p645_p9), 1043456   ;;  %vm1292_vm4 = vcmask (!%p645_p9), 130048   ;;  %vm1294_vm5 = vcmask (!%p645_p9), 195584   ;;  %vm2164_vm6 = vcmask (!%p645_p9), 523264  }
  0x1d   : > { %2480 = vmatprep.subr.bf16.mxu0 (!%p645_p9), %v2795_v8  ;;  %2482 = vmatprep.mubr.msk.bf16.mxu0 (!%p645_p9), %vm2796_vm1, %v2795_v8  ;;  %s3389_s2 = sld [smem:[#allocation10_spill]] (!%p645_p9)  ;;  %s3357_s23 = smov (!%p645_p9), 80  }
  0x1e   : > { %s3363_s26 = smov (!%p645_p9), 112   ;;  %s3391_s7 = sld [smem:[#allocation12_spill]] (!%p645_p9) }
  0x1f   : > { %s3392_s11 = sld [smem:[#allocation16_spill]] (!%p645_p9)  ;;  %s3394_s10 = sld [smem:[#allocation15_spill]] (!%p645_p9) }
  0x20   : > { %s3395_s8 = sld [smem:[#allocation13_spill]] (!%p645_p9)  ;;  %s3396_s9 = sld [smem:[#allocation14_spill]] (!%p645_p9) }
  0x21   : > { %s3406_s12 = sld [smem:[#allocation17_spill]] (!%p645_p9) }
  0x22   : > { %v2360_v14 = vld [vmem:[%s3388_s0] ss:$0 sm:$0xff] (!%p645_p9)  ;;  %s3360_s0 = smov (!%p645_p9), 88  }
  0x23   : > { %s722_s6 = scalar_select %p721_p10, %s2948_s19, 1  ;;  %v2361_v16 = vld [vmem:[%s3389_s2] ss:$0 sm:$0xff] }
  0x24   : > { %s3358_s2 = smov 72  }
  0x25   : > { %s2977_s25 = sshll.u32 %s722_s6, 3  ;;  %s3387_s6 = sld [smem:[#allocation11_spill]] }
  0x26   : > { %s724_s20 = scalar_lea.vmem %s3386_s27, %s2977_s25  ;;  %s3355_s27 = smov 120  }
  0x27   : > { %v2983_v0 = vld [vmem:[%s724_s20] sm:$0xff]  ;;  %s3359_s20 = smov 96  }
  0x28   : > { %v747_v1 = vsel %vm746_vm0, %v2983_v0, 0.0 }
  0x29   : > { %748 = vadd.xlane.f32.xlu0 %v747_v1 }
  0x2b   : > { %v2677_v7 = vld [vmem:[%s3387_s6] sm:$0xff]   ;;  %v2678_v9 = vld [vmem:[%s3387_s6 + $0x8] sm:$0xff]   ;;  %s3393_s6 = sld [smem:[#allocation6_spill]] }
  0x2c   : > { %2467 = vmatpush3.bf16.msra.mxu1 %v2677_v7 }
  0x2d   : > { %2468 = vmatprep.subr.bf16.mxu1 %v2795_v8 }
  0x30   : > { %2469 = vmatpush3.bf16.msra.mxu1 %v2678_v9 }
  0x31   : > { %2474 = vmatprep.subr.bf16.mxu1 %v2795_v8 }
  0xb6   : > { %v749_v2 = vpop.xlane.xlu0 %748 }
  0xb7   : > { %v751_v3 = vmul.f32 0.03125, %v749_v2 }
  0xb9   : > { %v752_v4 = vsub.f32 %v2983_v0, %v751_v3 }
  0xbb   : > { %v753_v5 = vmul.f32 %v752_v4, %v752_v4 }
  0xbd   : > { %v754_v6 = vsel %vm746_vm0, %v753_v5, 0.0 }
  0xbe   : > { %755 = vadd.xlane.f32.xlu0 %v754_v6 }
 0x14b   : > { %v756_v10 = vpop.xlane.xlu0 %755 }
 0x14c   : > { %v757_v11 = vmul.f32 0.03125, %v756_v10 }
 0x14e   : > { %v758_v12 = vadd.f32 1e-05, %v757_v11 }
 0x150   : > { %2693 = vrsqrt.f32 %v758_v12 }
 0x15a   : > { %v2694_v13 = vpop.eup %2693 }
 0x15b   : > { %v760_v15 = vmul.f32 %v2694_v13, %v752_v4 }
 0x15d   : > { %v768_v17 = vmul.f32 %v2360_v14, %v760_v15 }
 0x15f   : > { %v776_v18 = vadd.f32 %v2361_v16, %v768_v17 }
 0x161   : > { %v777_v19 = vpack.c.bf16 %v776_v18, %v776_v18 }
 0x163   : > { %2471 = vmatmul.mubr.msk.bf16.vlgmr.msra.gmra.mrb[0].mxu1 %vm746_vm0, %v777_v19 }
 0x164   : > { %2476 = vmatprep.mubr.msk.bf16.mxu1 %vm2796_vm1, %v2795_v8 }
 0x236   : > { %v831_v20 = vpop.f32.mrb[0].mxu1 }
 0x237   : > { %v3012_v21 = vpack.c.bf16 %v831_v20, %v831_v20  ;;  %v2472_v22 = vpop.f32.mrb[1].mxu1 }
 0x238   : > { %v834_v23 = vpop.f32.mrb[2].mxu1 }
 0x239   : > { %949 = vrot.lane.b32.xlu0 %v3012_v21, %s3355_s27  ;;  %839 = vrot.lane.b32.xlu1 %v3012_v21, %s3359_s20  ;;  %v2473_v24 = vpop.f32.mrb[3].mxu1  ;;  %s3361_s27 = smov 104   ;;  %s3390_s20 = sld [smem:[#allocation7_spill]] }
 0x23d   : > { %951 = vrot.lane.b32.xlu1 %v3012_v21, %s3360_s0 }
 0x23f   : > { %s732_s0 = scalar_lea.vmem %s3390_s20, %s2977_s25  ;;  %s2804_s20 = smov 64  }
 0x240   : > { %v744_v36 = vld [vmem:[%s732_s0] sm:$0xff]  ;;  %s2805_s0 = smov 56  }
 0x241   : > { %1061 = vrot.lane.b32.xlu1 %v3012_v21, %s3357_s23  ;;  %s2806_s23 = smov 48  }
 0x245   : > { %1059 = vrot.lane.b32.xlu1 %v3012_v21, %s3363_s26  ;;  %s3366_s26 = smov 16  }
 0x249   : > { %1171 = vrot.lane.b32.xlu1 %v3012_v21, %s3358_s2  ;;  %s2807_s2 = smov 40  }
 0x24d   : > { %1169 = vrot.lane.b32.xlu1 %v3012_v21, %s3361_s27  ;;  %s3397_s27 = smov 120  }
 0x2ab   : > { %v840_v25 = vpop.permute.xlu1 %839  ;;  %v950_v30 = vpop.permute.xlu0 %949 }
 0x2ac   : > { %v846_v26 = vsel %vm841_vm2, %v840_v25, 0 }
 0x2ad   : > { %2475 = vmatpush3.bf16.xpose.msra.mxu1 %v846_v26 }
 0x2ae   : > { %2486 = vmatprep.subr.bf16.mxu1 %v2795_v8 }
 0x2af   : > { %v952_v27 = vpop.permute.xlu1 %951 }
 0x2b0   : > { %v957_v28 = vsel %vm841_vm2, %v952_v27, 0 }
 0x2b3   : > { %v1062_v29 = vpop.permute.xlu1 %1061 }
 0x2b4   : > { %2477 = vmatmul.mubr.msk.bf16.vlgmr.msra.gmra.mrb[4].mxu1 %vm841_vm2, %v3012_v21  ;;  %v1067_v32 = vsel %vm841_vm2, %v1062_v29, 0 }
 0x2b5   : > { %2487 = vmatpush3.bf16.xpose.msra.mxu1 %v957_v28  ;;  %2488 = vmatprep.mubr.msk.bf16.mxu1 %vm2796_vm1, %v2795_v8 }
 0x2b6   : > { %2498 = vmatprep.subr.bf16.mxu1 %v2795_v8 }
 0x2b7   : > { %v1060_v31 = vpop.permute.xlu1 %1059 }
 0x2bb   : > { %v1172_v33 = vpop.permute.xlu1 %1171 }
 0x2bc   : > { %2489 = vmatmul.mubr.msk.bf16.vlgmr.msra.gmra.mrb[8].mxu1 %vm841_vm2, %v950_v30  ;;  %v1177_v34 = vsel %vm841_vm2, %v1172_v33, 0 }
 0x2bd   : > { %2499 = vmatpush3.bf16.xpose.msra.mxu1 %v1067_v32  ;;  %2500 = vmatprep.mubr.msk.bf16.mxu1 %vm2796_vm1, %v2795_v8 }
 0x2be   : > { %2510 = vmatprep.subr.bf16.mxu1 %v2795_v8 }
 0x2bf   : > { %v1170_v35 = vpop.permute.xlu1 %1169 }
 0x2c4   : > { %2501 = vmatmul.mubr.msk.bf16.vlgmr.msra.gmra.mrb[12].mxu1 %vm841_vm2, %v1060_v31 }
 0x2c5   : > { %2511 = vmatpush3.bf16.xpose.msra.mxu1 %v1177_v34  ;;  %2512 = vmatprep.mubr.msk.bf16.mxu1 %vm2796_vm1, %v2795_v8 }
 0x2c6   : > { %2522 = vmatprep.subr.bf16.mxu1 %v2795_v8 }
 0x2cc   : > { %2513 = vmatmul.mubr.msk.bf16.vlgmr.msra.gmra.mrb[16].mxu1 %vm841_vm2, %v1170_v35 }
 0x2cd   : > { %2526 = vmatprep.mubr.msk.bf16.mxu1 %vm2796_vm1, %v2795_v8 }
 0x387   : > { %v882_v37 = vpop.f32.mrb[4].mxu1 }
 0x388   : > { %v883_v38 = vadd.f32 %v882_v37, %v744_v36  ;;  %v2478_v39 = vpop.f32.mrb[5].mxu1 }
 0x389   : > { %v885_v40 = vpop.f32.mrb[6].mxu1 }
 0x38a   : > { %v2479_v41 = vpop.f32.mrb[7].mxu1  ;;  %v888_v42 = vsel %vm841_vm2, %v883_v38, -inf }
 0x38b   : > { %889 = vmax.xlane.f32.xlu1 %v888_v42 }
 0x38f   : > { %v993_v43 = vpop.f32.mrb[8].mxu1 }
 0x390   : > { %v994_v44 = vadd.f32 %v993_v43, %v744_v36  ;;  %v2490_v45 = vpop.f32.mrb[9].mxu1 }
 0x391   : > { %v996_v46 = vpop.f32.mrb[10].mxu1 }
 0x392   : > { %v2491_v47 = vpop.f32.mrb[11].mxu1  ;;  %v999_v48 = vsel %vm841_vm2, %v994_v44, -inf }
 0x393   : > { %1000 = vmax.xlane.f32.xlu0 %v999_v48 }
 0x397   : > { %v1103_v49 = vpop.f32.mrb[12].mxu1 }
 0x398   : > { %v1104_v50 = vadd.f32 %v1103_v49, %v744_v36  ;;  %v2502_v51 = vpop.f32.mrb[13].mxu1 }
 0x399   : > { %v1106_v52 = vpop.f32.mrb[14].mxu1  ;;  %v2679_v51 = vld [vmem:[%s3391_s7] sm:$0xff]  }
 0x39a   : > { %v2503_v53 = vpop.f32.mrb[15].mxu1  ;;  %v1109_v54 = vsel %vm841_vm2, %v1104_v50, -inf  ;;  %2523 = vmatpush3.bf16.msra.mxu1 %v2679_v51  ;;  %v2680_v52 = vld [vmem:[%s3391_s7 + $0x8] sm:$0xff]   ;;  %s728_s7 = scalar_lea.vmem %s3393_s6, %s2977_s25  ;;  %s3400_s6 = sld [smem:[#allocation8_spill]] }
 0x39b   : > { %1110 = vmax.xlane.f32.xlu1 %v1109_v54  ;;  %2524 = vmatprep.subr.bf16.mxu1 %v2795_v8 }
 0x39e   : > { %2525 = vmatpush3.bf16.msra.mxu1 %v2680_v52 }
 0x39f   : > { %v1213_v55 = vpop.f32.mrb[16].mxu1  ;;  %2538 = vmatprep.subr.bf16.mxu1 %v2795_v8 }
 0x3a0   : > { %v1214_v56 = vadd.f32 %v1213_v55, %v744_v36  ;;  %v2514_v57 = vpop.f32.mrb[17].mxu1 }
 0x3a1   : > { %v1216_v58 = vpop.f32.mrb[18].mxu1 }
 0x3a2   : > { %v2515_v59 = vpop.f32.mrb[19].mxu1  ;;  %v1219_v60 = vsel %vm841_vm2, %v1214_v56, -inf }
 0x3a3   : > { %1220 = vmax.xlane.f32.xlu0 %v1219_v60 }
 0x418   : > { %v890_v61 = vpop.xlane.xlu1 %889 }
 0x419   : > { %v891_v62 = vsub.f32 %v883_v38, %v890_v61 }
 0x41b   : > { %v892_v63 = vmul.f32 1.442695, %v891_v62 }
 0x41d   : > { %2695 = vpow2.f32 %v892_v63 }
 0x420   : > { %v1001_v1 = vpop.xlane.xlu0 %1000 }
 0x421   : > { %v1002_v2 = vsub.f32 %v994_v44, %v1001_v1 }
 0x423   : > { %v1003_v3 = vmul.f32 1.442695, %v1002_v2 }
 0x425   : > { %2697 = vpow2.f32 %v1003_v3 }
 0x427   : > { %v2696_v4 = vpop.eup %2695 }
 0x428   : > { %v894_v5 = vsel %vm841_vm2, %v2696_v4, 0.0  ;;  %v1111_v14 = vpop.xlane.xlu1 %1110 }
 0x429   : > { %895 = vadd.xlane.f32.xlu1 %v894_v5  ;;  %v1112_v15 = vsub.f32 %v1104_v50, %v1111_v14 }
 0x42b   : > { %v1113_v16 = vmul.f32 1.442695, %v1112_v15 }
 0x42f   : > { %v2698_v6 = vpop.eup %2697 }
 0x430   : > { %v1221_v7 = vpop.xlane.xlu0 %1220  ;;  %v1005_v9 = vsel %vm841_vm2, %v2698_v6, 0.0 }
 0x431   : > { %v1222_v10 = vsub.f32 %v1214_v56, %v1221_v7  ;;  %1006 = vadd.xlane.f32.xlu0 %v1005_v9 }
 0x433   : > { %v1223_v11 = vmul.f32 1.442695, %v1222_v10 }
 0x435   : > { %2699 = vpow2.f32 %v1223_v11 }
 0x436   : > { %2701 = vpow2.f32 %v1113_v16 }
 0x43a   : > { %900 = vrot.lane.b32.xlu1 %v3012_v21, %s2804_s20  ;;  %s3367_s20 = smov 8  }
 0x43f   : > { %v2700_v12 = vpop.eup %2699 }
 0x440   : > { %v1225_v13 = vsel %vm841_vm2, %v2700_v12, 0.0  ;;  %v2702_v17 = vpop.eup %2701 }
 0x441   : > { %1226 = vadd.xlane.f32.xlu0 %v1225_v13  ;;  %v1115_v18 = vsel %vm841_vm2, %v2702_v17, 0.0 }
 0x457   : > { %1011 = vrot.lane.b32.xlu0 %v3012_v21, %s2805_s0  ;;  %s3365_s0 = smov 24  }
 0x45e   : > { %1116 = vadd.xlane.f32.xlu1 %v1115_v18  ;;  %v743_v18 = vld [vmem:[%s728_s7] sm:$0xff] }
 0x46f   : > { %1121 = vrot.lane.b32.xlu1 %v3012_v21, %s2806_s23  ;;  %s3398_s23 = smov 112  }
 0x473   : > { %1231 = vrot.lane.b32.xlu1 %v3012_v21, %s2807_s2  ;;  %s3369_s2 = sand.u32 1, %s2785_s28  }
 0x474   : > { %s3213_s7 = sshll.u32 %s3369_s2, 3  ;;  %s3407_s2 = smov 16  }
 0x4b6   : > { %v896_v19 = vpop.xlane.xlu1 %895 }
 0x4b7   : > { %2703 = vrcp.f32 %v896_v19  ;;  %v1446_v19 = vpack.c.bf16 %v743_v18, %v743_v18 }
 0x4ba   : > { %v901_v20 = vpop.permute.xlu1 %900 }
 0x4bb   : > { %v907_v22 = vsel %vm905_vm3, %v901_v20, 0  ;;  %v2683_v20 = vld [vmem:[%s3394_s10] sm:$0xff]  }
 0x4bc   : > { %2481 = vmatpush3.bf16.msra.mxu0 %v907_v22  ;;  %v2684_v22 = vld [vmem:[%s3394_s10 + $0x8] sm:$0xff]   ;;  %s2811_s10 = smov [#allocation2]  }
 0x4bd   : > { %2492 = vmatprep.subr.bf16.mxu0 %v2795_v8 }
 0x4be   : > { %v1007_v24 = vpop.xlane.xlu0 %1006 }
 0x4bf   : > { %2705 = vrcp.f32 %v1007_v24 }
 0x4c1   : > { %v2704_v23 = vpop.eup %2703 }
 0x4c2   : > { %v898_v25 = vmul.f32 %v2704_v23, %v2696_v4 }
 0x4c4   : > { %v899_v26 = vpack.c.bf16 %v898_v25, %v898_v25 }
 0x4c6   : > { %2483 = vmatmul.mubr.msk.bf16.vlgmr.msra.gmra.mrb[0].mxu0 %vm841_vm2, %v899_v26 }
 0x4c7   : > { %2494 = vmatprep.mubr.msk.bf16.mxu0 %vm2796_vm1, %v2795_v8 }
 0x4c9   : > { %v2706_v21 = vpop.eup %2705 }
 0x4ca   : > { %v1009_v28 = vmul.f32 %v2706_v21, %v2698_v6  ;;  %v2376_v21 = vld [vmem:[%s3395_s8] ss:$0 sm:$0xff] }
 0x4cc   : > { %v1010_v31 = vpack.c.bf16 %v1009_v28, %v1009_v28  ;;  %v2377_v28 = vld [vmem:[%s3396_s9] ss:$0 sm:$0xff] }
 0x4ce   : > { %v1227_v27 = vpop.xlane.xlu0 %1226 }
 0x4d2   : > { %v1012_v29 = vpop.permute.xlu0 %1011 }
 0x4d3   : > { %v1017_v30 = vsel %vm905_vm3, %v1012_v29, 0 }
 0x4d4   : > { %2493 = vmatpush3.bf16.msra.mxu0 %v1017_v30 }
 0x4d5   : > { %2504 = vmatprep.subr.bf16.mxu0 %v2795_v8 }
 0x4d7   : > { %2495 = vmatmul.mubr.msk.bf16.vlgmr.msra.gmra.mrb[4].mxu0 %vm841_vm2, %v1010_v31 }
 0x4d8   : > { %2506 = vmatprep.mubr.msk.bf16.mxu0 %vm2796_vm1, %v2795_v8 }
 0x4eb   : > { %v1117_v32 = vpop.xlane.xlu1 %1116 }
 0x4ec   : > { %2707 = vrcp.f32 %v1117_v32 }
 0x4ed   : > { %2709 = vrcp.f32 %v1227_v27 }
 0x4ef   : > { %v1122_v33 = vpop.permute.xlu1 %1121 }
 0x4f0   : > { %v1127_v34 = vsel %vm905_vm3, %v1122_v33, 0 }
 0x4f1   : > { %2505 = vmatpush3.bf16.msra.mxu0 %v1127_v34 }
 0x4f2   : > { %2516 = vmatprep.subr.bf16.mxu0 %v2795_v8 }
 0x4f3   : > { %v1232_v37 = vpop.permute.xlu1 %1231 }
 0x4f4   : > { %v1237_v40 = vsel %vm905_vm3, %v1232_v37, 0 }
 0x4f6   : > { %v2708_v35 = vpop.eup %2707 }
 0x4f7   : > { %v1119_v36 = vmul.f32 %v2708_v35, %v2702_v17  ;;  %v2710_v39 = vpop.eup %2709  ;;  %v2682_v17 = vld [vmem:[%s3392_s11 + $0x8] sm:$0xff]  }
 0x4f8   : > { %v1229_v41 = vmul.f32 %v2710_v39, %v2700_v12 }
 0x4f9   : > { %v1120_v38 = vpack.c.bf16 %v1119_v36, %v1119_v36 }
 0x4fa   : > { %v1230_v42 = vpack.c.bf16 %v1229_v41, %v1229_v41 }
 0x4fb   : > { %2507 = vmatmul.mubr.msk.bf16.vlgmr.msra.gmra.mrb[8].mxu0 %vm841_vm2, %v1120_v38 }
 0x4fc   : > { %2517 = vmatpush3.bf16.msra.mxu0 %v1237_v40  ;;  %2518 = vmatprep.mubr.msk.bf16.mxu0 %vm2796_vm1, %v2795_v8 }
 0x4fd   : > { %2530 = vmatprep.subr.bf16.mxu0 %v2795_v8 }
 0x503   : > { %2519 = vmatmul.mubr.msk.bf16.vlgmr.msra.gmra.mrb[12].mxu0 %vm841_vm2, %v1230_v42 }
 0x504   : > { %2534 = vmatprep.mubr.msk.bf16.mxu0 %vm2796_vm1, %v2795_v8  ;;  %2531 = vmatpush3.bf16.msra.mxu0 %v2683_v20 }
 0x505   : > { %2532 = vmatprep.subr.bf16.mxu0 %v2795_v8 }
 0x508   : > { %2533 = vmatpush3.bf16.msra.mxu0 %v2684_v22 }
 0x509   : > { %2546 = vmatprep.subr.bf16.mxu0 %v2795_v8 }
 0x599   : > { %v943_v43 = vpop.f32.mrb[0].mxu0 }
 0x59a   : > { %v2484_v44 = vpop.f32.mrb[1].mxu0 }
 0x59b   : > { %v946_v45 = vpop.f32.mrb[2].mxu0 }
 0x59c   : > { %v2485_v46 = vpop.f32.mrb[3].mxu0 }
 0x5aa   : > { %v1053_v47 = vpop.f32.mrb[4].mxu0 }
 0x5ab   : > { %1280 = vrot.lane.b32.xlu0 %v1053_v47, %s3367_s20  ;;  %v2496_v48 = vpop.f32.mrb[5].mxu0  ;;  %s3401_s20 = smov 88  }
 0x5ac   : > { %v1056_v49 = vpop.f32.mrb[6].mxu0 }
 0x5ad   : > { %v2497_v50 = vpop.f32.mrb[7].mxu0 }
 0x5ce   : > { %v1163_v53 = vpop.f32.mrb[8].mxu0 }
 0x5cf   : > { %1284 = vrot.lane.b32.xlu1 %v1163_v53, %s3366_s26  ;;  %v2508_v54 = vpop.f32.mrb[9].mxu0  ;;  %s736_s26 = scalar_lea.vmem %s3400_s6, %s2977_s25  ;;  %s3370_s6 = scalar_lea.vmem [#allocation2], %s3213_s7 }
 0x5d0   : > { %v1166_v55 = vpop.f32.mrb[10].mxu0  ;;  %v745_v52 = vld [vmem:[%s736_s26] sm:$0xff]  ;;  %s3405_s26 = smov 8  }
 0x5d1   : > { %v2509_v56 = vpop.f32.mrb[11].mxu0 }
 0x5d6   : > { %v1273_v57 = vpop.f32.mrb[12].mxu0 }
 0x5d7   : > { %1288 = vrot.lane.b32.xlu0 %v1273_v57, %s3365_s0  ;;  %v2520_v58 = vpop.f32.mrb[13].mxu0  ;;  %s3399_s0 = smov 104  }
 0x5d8   : > { %v1276_v59 = vpop.f32.mrb[14].mxu0 }
 0x5d9   : > { %v2521_v60 = vpop.f32.mrb[15].mxu0 }
 0x61d   : > { %v1281_v61 = vpop.permute.xlu0 %1280 }
 0x61e   : > { %v1291_v63 = vsel %vm841_vm2, %v943_v43, %v1281_v61 }
 0x641   : > { %v1285_v62 = vpop.permute.xlu1 %1284 }
 0x642   : > { %v1293_v1 = vsel %vm1292_vm4, %v1291_v63, %v1285_v62 }
 0x649   : > { %v1289_v2 = vpop.permute.xlu0 %1288 }
 0x64a   : > { %v1295_v3 = vsel %vm1294_vm5, %v1293_v1, %v1289_v2 }
 0x64b   : > { %v1296_v4 = vpack.c.bf16 %v1295_v3, %v1295_v3 }
 0x64d   : > { %2527 = vmatmul.mubr.msk.bf16.vlgmr.msra.gmra.mrb[20].mxu1 %vm746_vm0, %v1296_v4 }
 0x64e   : > { %2542 = vmatprep.mubr.msk.bf16.mxu1 %vm2796_vm1, %v2795_v8 }
 0x720   : > { %v1350_v5 = vpop.f32.mrb[20].mxu1 }
 0x721   : > { %v3103_v6 = vadd.f32 %v1350_v5, %v2983_v0  ;;  %v2528_v7 = vpop.f32.mrb[21].mxu1  ;;  %v2681_v0 = vld [vmem:[%s3392_s11] sm:$0xff]   ;;  %s2735_s11 = sshll.u32 %s2811_s10, 4  ;;  %s2736_s11 = int_to_ptr.vmem [resolvable:$false] %s2735_s11 }
 0x722   : > { %v1353_v9 = vpop.f32.mrb[22].mxu1  ;;  %2539 = vmatpush3.bf16.msra.mxu1 %v2681_v0 }
 0x723   : > { %v2529_v10 = vpop.f32.mrb[23].mxu1  ;;  %v1357_v11 = vsel %vm746_vm0, %v3103_v6, 0.0  ;;  %2540 = vmatprep.subr.bf16.mxu1 %v2795_v8 }
 0x724   : > { %1358 = vadd.xlane.f32.xlu1 %v1357_v11 }
 0x726   : > { %2541 = vmatpush3.bf16.msra.mxu1 %v2682_v17 }
 0x727   : > { %2552 = vmatprep.subr.bf16.mxu1 %v2795_v8 }
 0x729   : > { %2543 = vmatmul.mubr.msk.bf16.vlgmr.msra.gmra.mrb[24].mxu1 %vm746_vm0, %v1446_v19 }
 0x72a   : > { %2554 = vmatprep.mubr.msk.bf16.mxu1 %vm2796_vm1, %v2795_v8 }
 0x7b1   : > { %v1359_v12 = vpop.xlane.xlu1 %1358 }
 0x7b2   : > { %v1360_v13 = vmul.f32 0.03125, %v1359_v12 }
 0x7b4   : > { %v1361_v14 = vsub.f32 %v3103_v6, %v1360_v13 }
 0x7b6   : > { %v1362_v15 = vmul.f32 %v1361_v14, %v1361_v14 }
 0x7b8   : > { %v1363_v16 = vsel %vm746_vm0, %v1362_v15, 0.0 }
 0x7b9   : > { %1364 = vadd.xlane.f32.xlu0 %v1363_v16 }
 0x7fc   : > { %v1500_v32 = vpop.f32.mrb[24].mxu1 }
 0x7fd   : > { %v3141_v33 = vpack.c.bf16 %v1500_v32, %v1500_v32  ;;  %v2544_v34 = vpop.f32.mrb[25].mxu1 }
 0x7fe   : > { %v1503_v35 = vpop.f32.mrb[26].mxu1 }
 0x7ff   : > { %v2545_v36 = vpop.f32.mrb[27].mxu1  ;;  %1618 = vrot.lane.b32.xlu0 %v3141_v33, %s3397_s27  ;;  %v1512_v37 = vsel %vm841_vm2, %v3141_v33, 0 }
 0x846   : > { %v1365_v23 = vpop.xlane.xlu0 %1364 }
 0x847   : > { %v1366_v24 = vmul.f32 0.03125, %v1365_v23 }
 0x849   : > { %v1367_v25 = vadd.f32 1e-05, %v1366_v24 }
 0x84b   : > { %2711 = vrsqrt.f32 %v1367_v25 }
 0x855   : > { %v2712_v26 = vpop.eup %2711 }
 0x856   : > { %v1369_v27 = vmul.f32 %v2712_v26, %v1361_v14 }
 0x858   : > { %v1377_v29 = vmul.f32 %v2376_v21, %v1369_v27 }
 0x85a   : > { %v1385_v30 = vadd.f32 %v2377_v28, %v1377_v29 }
 0x85c   : > { %v1386_v31 = vpack.c.bf16 %v1385_v30, %v1385_v30 }
 0x85e   : > { %2535 = vmatmul.mubr.msk.bf16.vlgmr.msra.gmra.mrb[16].mxu0 %vm746_vm0, %v1386_v31 }
 0x85f   : > { %2548 = vmatprep.mubr.msk.bf16.mxu0 %vm2796_vm1, %v2795_v8  ;;  %2547 = vmatpush3.bf16.xpose.msra.mxu0 %v1512_v37 }
 0x860   : > { %2558 = vmatprep.subr.bf16.mxu0 %v2795_v8 }
 0x871   : > { %v1619_v38 = vpop.permute.xlu0 %1618 }
 0x872   : > { %v1624_v43 = vsel %vm841_vm2, %v1619_v38, 0 }
 0x931   : > { %v1440_v39 = vpop.f32.mrb[16].mxu0 }
 0x932   : > { %v1506_v40 = vpack.c.bf16 %v1440_v39, %v1440_v39  ;;  %v2536_v41 = vpop.f32.mrb[17].mxu0 }
 0x933   : > { %v1443_v42 = vpop.f32.mrb[18].mxu0 }
 0x934   : > { %1616 = vrot.lane.b32.xlu1 %v1506_v40, %s3397_s27  ;;  %v2537_v44 = vpop.f32.mrb[19].mxu0  ;;  %1727 = vrot.lane.b32.xlu0 %v1506_v40, %s3398_s23  ;;  %s3402_s27 = smov 96  }
 0x935   : > { %2549 = vmatmul.mubr.msk.bf16.vlgmr.msra.gmra.mrb[20].mxu0 %vm841_vm2, %v1506_v40 }
 0x936   : > { %2559 = vmatpush3.bf16.xpose.msra.mxu0 %v1624_v43  ;;  %2560 = vmatprep.mubr.msk.bf16.mxu0 %vm2796_vm1, %v2795_v8 }
 0x937   : > { %2570 = vmatprep.subr.bf16.mxu0 %v2795_v8 }
 0x938   : > { %1729 = vrot.lane.b32.xlu1 %v3141_v33, %s3398_s23  ;;  %1838 = vrot.lane.b32.xlu0 %v1506_v40, %s3399_s0  ;;  %s3403_s23 = smov 72  }
 0x93c   : > { %1840 = vrot.lane.b32.xlu1 %v3141_v33, %s3399_s0  ;;  %s3404_s0 = smov 80  }
 0x9a6   : > { %v1617_v45 = vpop.permute.xlu1 %1616  ;;  %v1728_v49 = vpop.permute.xlu0 %1727 }
 0x9a7   : > { %2561 = vmatmul.mubr.msk.bf16.vlgmr.msra.gmra.mrb[24].mxu0 %vm841_vm2, %v1617_v45 }
 0x9a8   : > { %2572 = vmatprep.mubr.msk.bf16.mxu0 %vm2796_vm1, %v2795_v8 }
 0x9aa   : > { %v1730_v46 = vpop.permute.xlu1 %1729  ;;  %v1839_v51 = vpop.permute.xlu0 %1838 }
 0x9ab   : > { %v1735_v47 = vsel %vm841_vm2, %v1730_v46, 0 }
 0x9ac   : > { %2571 = vmatpush3.bf16.xpose.msra.mxu0 %v1735_v47 }
 0x9ad   : > { %2582 = vmatprep.subr.bf16.mxu0 %v2795_v8 }
 0x9ae   : > { %v1841_v48 = vpop.permute.xlu1 %1840 }
 0x9af   : > { %v1846_v50 = vsel %vm841_vm2, %v1841_v48, 0 }
 0x9b3   : > { %2573 = vmatmul.mubr.msk.bf16.vlgmr.msra.gmra.mrb[28].mxu0 %vm841_vm2, %v1728_v49 }
 0x9b4   : > { %2583 = vmatpush3.bf16.xpose.msra.mxu0 %v1846_v50  ;;  %2584 = vmatprep.mubr.msk.bf16.mxu0 %vm2796_vm1, %v2795_v8 }
 0x9b5   : > { %2594 = vmatprep.subr.bf16.mxu0 %v2795_v8 }
 0x9bb   : > { %2585 = vmatmul.mubr.msk.bf16.vlgmr.msra.gmra.mrb[32].mxu0 %vm841_vm2, %v1839_v51 }
 0x9bc   : > { %2598 = vmatprep.mubr.msk.bf16.mxu0 %vm2796_vm1, %v2795_v8 }
 0xa08   : > { %v1548_v53 = vpop.f32.mrb[20].mxu0 }
 0xa09   : > { %v1549_v54 = vadd.f32 %v1548_v53, %v745_v52  ;;  %v2550_v55 = vpop.f32.mrb[21].mxu0 }
 0xa0a   : > { %v1551_v56 = vpop.f32.mrb[22].mxu0 }
 0xa0b   : > { %v2551_v57 = vpop.f32.mrb[23].mxu0  ;;  %v1554_v58 = vsel %vm841_vm2, %v1549_v54, -inf }
 0xa0c   : > { %1555 = vmax.xlane.f32.xlu1 %v1554_v58 }
 0xa7a   : > { %v1660_v59 = vpop.f32.mrb[24].mxu0 }
 0xa7b   : > { %v1661_v60 = vadd.f32 %v1660_v59, %v745_v52  ;;  %v2562_v61 = vpop.f32.mrb[25].mxu0 }
 0xa7c   : > { %v1663_v62 = vpop.f32.mrb[26].mxu0 }
 0xa7d   : > { %v2563_v63 = vpop.f32.mrb[27].mxu0  ;;  %v1666_v1 = vsel %vm841_vm2, %v1661_v60, -inf }
 0xa7e   : > { %1667 = vmax.xlane.f32.xlu0 %v1666_v1 }
 0xa86   : > { %v1771_v2 = vpop.f32.mrb[28].mxu0 }
 0xa87   : > { %v1772_v3 = vadd.f32 %v1771_v2, %v745_v52  ;;  %v2574_v4 = vpop.f32.mrb[29].mxu0 }
 0xa88   : > { %v1774_v5 = vpop.f32.mrb[30].mxu0 }
 0xa89   : > { %v2575_v7 = vpop.f32.mrb[31].mxu0  ;;  %v1777_v9 = vsel %vm841_vm2, %v1772_v3, -inf }
 0xa8a   : > { %1778 = vmax.xlane.f32.xlu0 %v1777_v9 }
 0xa8e   : > { %v1882_v10 = vpop.f32.mrb[32].mxu0 }
 0xa8f   : > { %v1883_v11 = vadd.f32 %v1882_v10, %v745_v52  ;;  %v2586_v12 = vpop.f32.mrb[33].mxu0  ;;  %v2685_v10 = vld [vmem:[%s3406_s12] sm:$0xff]  }
 0xa90   : > { %v1885_v13 = vpop.f32.mrb[34].mxu0  ;;  %2595 = vmatpush3.bf16.msra.mxu0 %v2685_v10 }
 0xa91   : > { %v2587_v14 = vpop.f32.mrb[35].mxu0  ;;  %v1888_v15 = vsel %vm841_vm2, %v1883_v11, -inf  ;;  %2596 = vmatprep.subr.bf16.mxu0 %v2795_v8 }
 0xa92   : > { %1889 = vmax.xlane.f32.xlu1 %v1888_v15 }
 0xa99   : > { %v1556_v16 = vpop.xlane.xlu1 %1555 }
 0xa9a   : > { %v1557_v0 = vsub.f32 %v1549_v54, %v1556_v16 }
 0xa9c   : > { %v1558_v17 = vmul.f32 1.442695, %v1557_v0 }
 0xa9e   : > { %2713 = vpow2.f32 %v1558_v17 }
 0xaa8   : > { %v2714_v18 = vpop.eup %2713 }
 0xaa9   : > { %v1560_v19 = vsel %vm841_vm2, %v2714_v18, 0.0 }
 0xaaa   : > { %1561 = vadd.xlane.f32.xlu0 %v1560_v19 }
 0xb0b   : > { %v1668_v20 = vpop.xlane.xlu0 %1667 }
 0xb0c   : > { %v1669_v22 = vsub.f32 %v1661_v60, %v1668_v20 }
 0xb0e   : > { %v1670_v23 = vmul.f32 1.442695, %v1669_v22 }
 0xb10   : > { %2715 = vpow2.f32 %v1670_v23 }
 0xb17   : > { %v1779_v24 = vpop.xlane.xlu0 %1778 }
 0xb18   : > { %v1780_v25 = vsub.f32 %v1772_v3, %v1779_v24 }
 0xb1a   : > { %v2716_v26 = vpop.eup %2715  ;;  %v1781_v21 = vmul.f32 1.442695, %v1780_v25 }
 0xb1b   : > { %v1672_v27 = vsel %vm841_vm2, %v2716_v26, 0.0 }
 0xb1c   : > { %2717 = vpow2.f32 %v1781_v21  ;;  %1673 = vadd.xlane.f32.xlu1 %v1672_v27 }
 0xb1f   : > { %v1890_v30 = vpop.xlane.xlu1 %1889 }
 0xb20   : > { %v1891_v31 = vsub.f32 %v1883_v11, %v1890_v30  ;;  %v2686_v11 = vld [vmem:[%s3406_s12 + $0x8] sm:$0xff]   ;;  %s2737_s12 = scalar_lea.vmem %s2736_s11, 256 }
 0xb21   : > { %2597 = vmatpush3.bf16.msra.mxu0 %v2686_v11 }
 0xb22   : > { %v1892_v32 = vmul.f32 1.442695, %v1891_v31  ;;  %2610 = vmatprep.subr.bf16.mxu0 %v2795_v8 }
 0xb24   : > { %2719 = vpow2.f32 %v1892_v32 }
 0xb26   : > { %v2718_v28 = vpop.eup %2717 }
 0xb27   : > { %v1783_v29 = vsel %vm841_vm2, %v2718_v28, 0.0 }
 0xb28   : > { %1784 = vadd.xlane.f32.xlu0 %v1783_v29 }
 0xb2d   : > { %1678 = vrot.lane.b32.xlu1 %v3141_v33, %s3401_s20 }
 0xb2e   : > { %v2720_v34 = vpop.eup %2719 }
 0xb2f   : > { %v1894_v35 = vsel %vm841_vm2, %v2720_v34, 0.0 }
 0xb37   : > { %v1562_v36 = vpop.xlane.xlu0 %1561 }
 0xb38   : > { %2721 = vrcp.f32 %v1562_v36 }
 0xb3e   : > { %1567 = vrot.lane.b32.xlu0 %v3141_v33, %s3402_s27  ;;  %s2408_s27 = sshll.u32 %s2948_s19, 7 }
 0xb42   : > { %1900 = vrot.lane.b32.xlu0 %v3141_v33, %s3403_s23  ;;  %v2722_v38 = vpop.eup %2721  ;;  %s3409_s23 = scalar_lea.vmem [#allocation2], %s3213_s7 }
 0xb43   : > { %v1564_v40 = vmul.f32 %v2722_v38, %v2714_v18  ;;  %v2688_v38 = vld [vmem:[%s3346_s15 + $0x8] sm:$0xff]   ;;  %s2231_s8 = sshll.u32 %s3409_s23, 4  ;;  %s2232_s8 = int_to_ptr.vmem [resolvable:$true] %s2231_s8 }
 0xb44   : > { %s2731_s9 = scalar_lea.vmem %s2232_s8, 128  ;;  %p2738_p0 = scmp.lt.s32.totalorder %s2232_s8, %s2736_s11 }
 0xb45   : > { %v1565_v44 = vpack.c.bf16 %v1564_v40, %v1564_v40  ;;  %p2732_p11 = scmp.ne.s32.totalorder %s2232_s8, %s2731_s9  ;;  %p2739_p1 = scmp.lt.s32.totalorder %s2737_s12, %s2731_s9 }
 0xb47   : > { %p2733_p12 = pnand %p2732_p11, %p2965_p5  ;;  %p2740_p2 = por %p2739_p1, %p2738_p0 }
 0xb49   : > { %p2734_p13 = pneg %p2733_p12 }
 0xb4b   : > { %p2741_p3 = pnand %p2740_p2, %p2734_p13 }
 0xb51   : > { %1895 = vadd.xlane.f32.xlu1 %v1894_v35 }
 0xb62   : > { %1789 = vrot.lane.b32.xlu1 %v3141_v33, %s3404_s0 }
 0xba9   : > { %v1674_v37 = vpop.xlane.xlu1 %1673 }
 0xbaa   : > { %2723 = vrcp.f32 %v1674_v37 }
 0xbad   : > { %v1679_v43 = vpop.permute.xlu1 %1678 }
 0xbae   : > { %v1684_v46 = vsel %vm905_vm3, %v1679_v43, 0 }
 0xbb4   : > { %v2724_v45 = vpop.eup %2723 }
 0xbb5   : > { %v1785_v39 = vpop.xlane.xlu0 %1784  ;;  %v1676_v33 = vmul.f32 %v2724_v45, %v2716_v26  ;;  %v2395_v45 = vld [vmem:[%s3344_s13] ss:$0 sm:$0xff] }
 0xbb6   : > { %2725 = vrcp.f32 %v1785_v39  ;;  %v2689_v39 = vld [vmem:[%s3348_s17] sm:$0xff]  }
 0xbb7   : > { %v1677_v47 = vpack.c.bf16 %v1676_v33, %v1676_v33  ;;  %v1726_v56 = vadd.f32 %v1676_v33, %v1564_v40  ;;  %v2690_v40 = vld [vmem:[%s3348_s17 + $0x8] sm:$0xff]   ;;  %v2396_v33 = vld [vmem:[%s3345_s14] ss:$0 sm:$0xff] }
 0xbb9   : > { %v1568_v41 = vpop.permute.xlu0 %1567 }
 0xbba   : > { %v1573_v42 = vsel %vm905_vm3, %v1568_v41, 0 }
 0xbbb   : > { %2553 = vmatpush3.bf16.msra.mxu1 %v1573_v42 }
 0xbbc   : > { %2564 = vmatprep.subr.bf16.mxu1 %v2795_v8 }
 0xbbd   : > { %v1901_v53 = vpop.permute.xlu0 %1900 }
 0xbbe   : > { %2555 = vmatmul.mubr.msk.bf16.vlgmr.msra.gmra.mrb[28].mxu1 %vm841_vm2, %v1565_v44  ;;  %v1906_v55 = vsel %vm905_vm3, %v1901_v53, 0 }
 0xbbf   : > { %2565 = vmatpush3.bf16.msra.mxu1 %v1684_v46  ;;  %2566 = vmatprep.mubr.msk.bf16.mxu1 %vm2796_vm1, %v2795_v8 }
 0xbc0   : > { %2576 = vmatprep.subr.bf16.mxu1 %v2795_v8  ;;  %v2726_v48 = vpop.eup %2725 }
 0xbc1   : > { %v1787_v50 = vmul.f32 %v2726_v48, %v2718_v28 }
 0xbc3   : > { %v1788_v54 = vpack.c.bf16 %v1787_v50, %v1787_v50  ;;  %v1837_v59 = vadd.f32 %v1787_v50, %v1726_v56  ;;  %v2691_v50 = vld [vmem:[%s3348_s17 + $0x10] sm:$0xff]  }
 0xbc6   : > { %2567 = vmatmul.mubr.msk.bf16.vlgmr.msra.gmra.mrb[32].mxu1 %vm841_vm2, %v1677_v47 }
 0xbc7   : > { %2578 = vmatprep.mubr.msk.bf16.mxu1 %vm2796_vm1, %v2795_v8 }
 0xbde   : > { %v1896_v49 = vpop.xlane.xlu1 %1895 }
 0xbdf   : > { %2727 = vrcp.f32 %v1896_v49 }
 0xbe2   : > { %v1790_v51 = vpop.permute.xlu1 %1789 }
 0xbe3   : > { %v1795_v52 = vsel %vm905_vm3, %v1790_v51, 0  ;;  %v2692_v51 = vld [vmem:[%s3348_s17 + $0x18] sm:$0xff]  }
 0xbe4   : > { %2577 = vmatpush3.bf16.msra.mxu1 %v1795_v52  ;;  %v2397_v52 = vld [vmem:[%s3347_s16] ss:$0 sm:$0xff] }
 0xbe5   : > { %2588 = vmatprep.subr.bf16.mxu1 %v2795_v8 }
 0xbe7   : > { %2579 = vmatmul.mubr.msk.bf16.vlgmr.msra.gmra.mrb[36].mxu1 %vm841_vm2, %v1788_v54 }
 0xbe8   : > { %2589 = vmatpush3.bf16.msra.mxu1 %v1906_v55  ;;  %2590 = vmatprep.mubr.msk.bf16.mxu1 %vm2796_vm1, %v2795_v8 }
 0xbe9   : > { %v2728_v57 = vpop.eup %2727  ;;  %2602 = vmatprep.subr.bf16.mxu1 %v2795_v8 }
 0xbea   : > { %v1898_v58 = vmul.f32 %v2728_v57, %v2720_v34 }
 0xbec   : > { %v1899_v60 = vpack.c.bf16 %v1898_v58, %v1898_v58  ;;  %v1948_v61 = vadd.f32 %v1898_v58, %v1837_v59 }
 0xbee   : > { %v2025_v62 = vmul.f32 0.25, %v1948_v61 }
 0xbef   : > { %2591 = vmatmul.mubr.msk.bf16.vlgmr.msra.gmra.mrb[40].mxu1 %vm841_vm2, %v1899_v60 }
 0xbf0   : > { %2606 = vmatprep.mubr.msk.bf16.mxu1 %vm2796_vm1, %v2795_v8  ;;  %2026 = vst.msk [vmem:[%s3370_s6] sm:$0xff] %vm841_vm2, %v2025_v62 }
 0xc91   : > { %v1609_v63 = vpop.f32.mrb[28].mxu1 }
 0xc92   : > { %v2556_v1 = vpop.f32.mrb[29].mxu1 }
 0xc93   : > { %v1612_v2 = vpop.f32.mrb[30].mxu1 }
 0xc94   : > { %v2557_v3 = vpop.f32.mrb[31].mxu1 }
 0xc99   : > { %v1720_v4 = vpop.f32.mrb[32].mxu1 }
 0xc9a   : > { %1950 = vrot.lane.b32.xlu1 %v1720_v4, %s3405_s26  ;;  %v2568_v5 = vpop.f32.mrb[33].mxu1  ;;  %s3408_s26 = smov 24  }
 0xc9b   : > { %v1723_v7 = vpop.f32.mrb[34].mxu1 }
 0xc9c   : > { %v2569_v9 = vpop.f32.mrb[35].mxu1 }
 0xcba   : > { %v1831_v12 = vpop.f32.mrb[36].mxu1 }
 0xcbb   : > { %1954 = vrot.lane.b32.xlu0 %v1831_v12, %s3407_s2  ;;  %v2580_v13 = vpop.f32.mrb[37].mxu1  ;;  %s3410_s2 = sand.u32 1, %s2785_s28  }
 0xcbc   : > { %v1834_v14 = vpop.f32.mrb[38].mxu1  ;;  %s2215_s20 = scalar_lea.sflag [#allocation3], %s3410_s2 }
 0xcbd   : > { %v2581_v15 = vpop.f32.mrb[39].mxu1 }
 0xcc2   : > { %v1942_v16 = vpop.f32.mrb[40].mxu1 }
 0xcc3   : > { %1958 = vrot.lane.b32.xlu1 %v1942_v16, %s3408_s26  ;;  %v2592_v0 = vpop.f32.mrb[41].mxu1  ;;  %s3284_s26 = scalar_lea.hbm %s3353_s22, %s2408_s27 }
 0xcc4   : > { %v1945_v17 = vpop.f32.mrb[42].mxu1 }
 0xcc5   : > { %v2593_v18 = vpop.f32.mrb[43].mxu1 }
 0xd0c   : > { %v1951_v19 = vpop.permute.xlu1 %1950 }
 0xd0d   : > { %v1961_v22 = vsel %vm841_vm2, %v1609_v63, %v1951_v19 }
 0xd2d   : > { %v1955_v20 = vpop.permute.xlu0 %1954 }
 0xd2e   : > { %v1962_v23 = vsel %vm1292_vm4, %v1961_v22, %v1955_v20 }
 0xd35   : > { %v1959_v24 = vpop.permute.xlu1 %1958 }
 0xd36   : > { %v1963_v25 = vsel %vm1294_vm5, %v1962_v23, %v1959_v24 }
 0xd37   : > { %v1964_v26 = vpack.c.bf16 %v1963_v25, %v1963_v25 }
 0xd39   : > { %2599 = vmatmul.mubr.msk.bf16.vlgmr.msra.gmra.mrb[36].mxu0 %vm746_vm0, %v1964_v26 }
 0xd3a   : > { %2618 = vmatprep.mubr.msk.bf16.mxu0 %vm2796_vm1, %v2795_v8  ;;  %2611 = vmatpush3.bf16.msra.mxu0 %v2689_v39 }
 0xd3b   : > { %2612 = vmatprep.subr.bf16.mxu0 %v2795_v8 }
 0xd3e   : > { %2613 = vmatpush3.bf16.msra.mxu0 %v2690_v40 }
 0xd3f   : > { %2614 = vmatprep.subr.bf16.mxu0 %v2795_v8 }
 0xd42   : > { %2615 = vmatpush3.bf16.msra.mxu0 %v2691_v50 }
 0xd43   : > { %2616 = vmatprep.subr.bf16.mxu0 %v2795_v8 }
 0xd46   : > { %2617 = vmatpush3.bf16.msra.mxu0 %v2692_v51 }
 0xe0c   : > { %v2018_v21 = vpop.f32.mrb[36].mxu0 }
 0xe0d   : > { %v3240_v27 = vadd.f32 %v2018_v21, %v3103_v6  ;;  %v2600_v28 = vpop.f32.mrb[37].mxu0  ;;  %v2687_v6 = vld [vmem:[%s3346_s15] sm:$0xff]  }
 0xe0e   : > { %v2021_v29 = vpop.f32.mrb[38].mxu0  ;;  %2603 = vmatpush3.bf16.msra.mxu1 %v2687_v6 }
 0xe0f   : > { %v2601_v30 = vpop.f32.mrb[39].mxu0  ;;  %v2027_v31 = vsel %vm746_vm0, %v3240_v27, 0.0  ;;  %2604 = vmatprep.subr.bf16.mxu1 %v2795_v8 }
 0xe10   : > { %2028 = vadd.xlane.f32.xlu0 %v2027_v31 }
 0xe12   : > { %2605 = vmatpush3.bf16.msra.mxu1 %v2688_v38 }
 0xe9d   : > { %v2029_v32 = vpop.xlane.xlu0 %2028 }
 0xe9e   : > { %v2030_v34 = vmul.f32 0.03125, %v2029_v32 }
 0xea0   : > { %v2031_v35 = vsub.f32 %v3240_v27, %v2030_v34 }
 0xea2   : > { %v2032_v36 = vmul.f32 %v2031_v35, %v2031_v35 }
 0xea4   : > { %v2033_v37 = vsel %vm746_vm0, %v2032_v36, 0.0 }
 0xea5   : > { %2034 = vadd.xlane.f32.xlu1 %v2033_v37 }
 0xf32   : > { %v2035_v41 = vpop.xlane.xlu1 %2034 }
 0xf33   : > { %v2036_v42 = vmul.f32 0.03125, %v2035_v41 }
 0xf35   : > { %v2037_v43 = vadd.f32 1e-05, %v2036_v42 }
 0xf37   : > { %2729 = vrsqrt.f32 %v2037_v43 }
 0xf41   : > { %v2730_v44 = vpop.eup %2729 }
 0xf42   : > { %v2039_v46 = vmul.f32 %v2730_v44, %v2031_v35 }
 0xf44   : > { %v2047_v47 = vmul.f32 %v2395_v45, %v2039_v46 }
 0xf46   : > { %v2055_v48 = vadd.f32 %v2396_v33, %v2047_v47 }
 0xf48   : > { %v2056_v49 = vpack.c.bf16 %v2055_v48, %v2055_v48 }
 0xf4a   : > { %2607 = vmatmul.mubr.msk.bf16.vlgmr.msra.gmra.mrb[44].mxu1 %vm746_vm0, %v2056_v49 }
0x101d   : > { %v2117_v53 = vpop.f32.mrb[44].mxu1 }
0x101e   : > { %v2118_v54 = vadd.f32 %v2397_v52, %v2117_v53  ;;  %v2608_v55 = vpop.f32.mrb[45].mxu1 }
0x101f   : > { %v2120_v56 = vpop.f32.mrb[46].mxu1 }
0x1020   : > { %v2123_v57 = vmax.f32 %v2118_v54, 0.0  ;;  %v2609_v58 = vpop.f32.mrb[47].mxu1 }
0x1022   : > { %v2124_v59 = vpack.c.bf16 %v2123_v57, %v2123_v57 }
0x1024   : > { %2619 = vmatmul.mubr.msk.bf16.vlgmr.msra.gmra.mrb[40].mxu0 %vm2164_vm6, %v2124_v59 }
0x1025   : > { %2744 = shalt.err (!%p2741_p3)
}
0x1026   : > { %s2745_s19 = scalar_lea.hbm %s3284_s26, 128  ;;  %s2749_s10 = scalar_lea.hbm %s3353_s22, 256 }
0x1027   : > { %p2746_p4 = scmp.ne.s32.totalorder %s3284_s26, %s2745_s19  ;;  %p2750_p9 = scmp.lt.u32.totalorder %s3284_s26, %s3353_s22 }
0x1028   : > { %p2751_p10 = scmp.lt.u32.totalorder %s2749_s10, %s2745_s19  ;;  %p2753_p12 = scmp.lt.u32.totalorder %s2745_s19, %s3284_s26 }
0x1029   : > { %p2747_p7 = pnand %p2746_p4, %p2965_p5 }
0x102a   : > { %p2752_p11 = por %p2751_p10, %p2750_p9 }
0x102b   : > { %p2748_p8 = pneg %p2747_p7 }
0x102c   : > { %p2754_p13 = por %p2753_p12, %p2752_p11 }
0x102e   : > { %p2755_p0 = pnand %p2754_p13, %p2748_p8 }
0x1030   : > { %2758 = shalt.err (!%p2755_p0)
}
0x1031   : > { %2622 = dma.vmem_to_hbm [thread:$0]  (%p2965_p5), %s2232_s8, 128, %s3284_s26, %s2215_s20   ;;  %v2401_v8 = vld [vmem:[%s3349_s18] ss:$0 sm:$0xff] }
0x1032   : > { %s740_s2 = scalar_lea.vmem %s3352_s21, %s2977_s25 }
0x10f7   : > { %v2202_v60 = vpop.f32.mrb[40].mxu0 }
0x10f8   : > { %v2203_v61 = vadd.f32 %v2401_v8, %v2202_v60  ;;  %v2620_v62 = vpop.f32.mrb[41].mxu0 }
0x10f9   : > { %v2205_v63 = vpop.f32.mrb[42].mxu0 }
0x10fa   : > { %v2208_v1 = vadd.f32 %v2203_v61, %v3240_v27  ;;  %v2621_v2 = vpop.f32.mrb[43].mxu0 }
0x10fc   : > { %2209 = vst.msk [vmem:[%s740_s2] sm:$0xff] %vm746_vm0, %v2208_v1 }
0x10fd PF: > { %p2628_p5 = scmp.ge.s32.totalorder %s2793_s30, 2  ;;  %s2250_s5 = sand.u32 1, %s2781_s3  }
0x10fe   : > { %s2251_s8 = scalar_lea.sflag [#allocation3], %s2250_s5 }
0x10ff   : > { %p2625_p1 = pnand %p2628_p5, %p2969_p6 }
0x1101   : > { %2776 = dma.done.wait (!%p2625_p1), %s2251_s8, 128  }
0x1102   : > { %2778 = vsyncadd (!%p2625_p1), %s2251_s8, 4294967168  ;;  %p33_p2 = scmp.ge.s32.totalorder %s2952_s4, 4   ;;  %s3411_s3 = smov %s2785_s28 }
0x1103   : > { %s3412_s28 = smov %s2789_s29  ;;  %s3413_s29 = smov %s2963_s1 }
0x1104   : > { %s3414_s30 = smov %s2952_s4  ;;  %35 = sbr.rel (!%p33_p2) target bundleno = 17 (0x11), region = 160 }
0x110b   :  { %2256 = vsyncpa [#allocation3], 1 }
0x110c   :  { %2258 = vsyncpa [#allocation3 + $0x1], 1 }

</bundles_post_ra>
